<compile_context>
chip_gen: v5e
topology: v5e:2x2
jax: 0.10.0
libtpu: 0.0.40
codegen_flags: <defaults>
</compile_context>

<pallas_src>
import functools

import jax
import jax.numpy as jnp
from jax.experimental import pallas as pl
from jax.experimental.pallas import tpu as pltpu

LANE = 128   # channel / feature padding target (lane width)
SUB = 8      # sublane alignment


def _round_up(v, m):
    return ((v + m - 1) // m) * m


# ----------------------------------------------------------------------------
# Kernel 1: fused 3x3 conv (+ folded BN bias, + optional ReLU), NHWC, per image
# ----------------------------------------------------------------------------
def conv3x3_kernel(x_ref, w_ref, b_ref, o_ref, acc_ref, *, relu, ow_valid):
    """One image:  o[h,w,co] = relu?( sum_{dh,dw,ci} x[h+dh,w+dw,ci]*w[dh,dw,ci,co] + b[co] ).

    x_ref  : (IH, IW, Cin)        IW >= OW_store + 2, Cin % 128 == 0
    w_ref  : (9, Cin, Cout)       (dh*3+dw) major, BN scale pre-folded
    b_ref  : (1, Cout)            folded BN shift (or zeros)
    o_ref  : (OH, OW_store, Cout) OW_store % 8 == 0; columns >= ow_valid zeroed
    acc_ref: (OH*OW_store, Cout)  f32 VMEM accumulator
    Replaces im2col + matmul: the 9x patch slab never touches HBM.
    """
    oh, ow_s, cout = o_ref.shape
    cin = x_ref.shape[2]

    acc_ref[...] = jnp.zeros_like(acc_ref)
    for k in range(9):
        dh, dw = k // 3, k % 3
        # (oh, ow_s, cin) slice; merge to (oh*ow_s, cin) is layout-free since
        # ow_s is a multiple of 8.
        patch = x_ref[dh:dh + oh, dw:dw + ow_s, :].reshape(oh * ow_s, cin)
        acc_ref[...] += jnp.dot(patch, w_ref[k],
                                preferred_element_type=jnp.float32)

    y = acc_ref[...] + b_ref[...]
    if relu:
        y = jnp.maximum(y, 0.0)
    y = y.reshape(oh, ow_s, cout)
    if ow_valid < ow_s:
        # zero the over-computed right-edge columns so they stay inert downstream
        col = jax.lax.broadcasted_iota(jnp.int32, (oh, ow_s, cout), 1)
        y = jnp.where(col < ow_valid, y, 0.0)
    o_ref[...] = y.astype(o_ref.dtype)


def conv3x3(x, w9, bias, *, relu, ow_valid, ow_store, out_dtype=jnp.bfloat16):
    """x: (N, IH, IW, Cin) NHWC (Cin pre-padded to 128, IW >= ow_store + 2).
    w9: (9, Cin, Cout); bias: (Cout,).  Returns (N, IH-2, ow_store, Cout)."""
    N, IH, IW, Cin = x.shape
    Cout = w9.shape[2]
    OH = IH - 2
    assert ow_store % SUB == 0 and ow_store >= ow_valid and IW >= ow_store + 2
    assert Cin % LANE == 0 and Cout % LANE == 0

    return pl.pallas_call(
        functools.partial(conv3x3_kernel, relu=relu, ow_valid=ow_valid),
        out_shape=jax.ShapeDtypeStruct((N, OH, ow_store, Cout), out_dtype),
        grid=(N,),
        in_specs=[
            pl.BlockSpec((None, IH, IW, Cin), lambda n: (n, 0, 0, 0)),
            pl.BlockSpec((9, Cin, Cout), lambda n: (0, 0, 0)),
            pl.BlockSpec((1, Cout), lambda n: (0, 0)),
        ],
        out_specs=pl.BlockSpec((None, OH, ow_store, Cout),
                               lambda n: (n, 0, 0, 0)),
        scratch_shapes=[pltpu.VMEM((OH * ow_store, Cout), jnp.float32)],
        compiler_params=pltpu.CompilerParams(
            dimension_semantics=("parallel",)),
    )(x.astype(jnp.bfloat16), w9.astype(jnp.bfloat16),
      bias.reshape(1, -1).astype(jnp.float32))


# ----------------------------------------------------------------------------
# Kernel 2: K-tiled matmul + bias, f32 output accumulated directly in o_ref
# ----------------------------------------------------------------------------
def matmul_bias_f32_kernel(x_ref, w_ref, b_ref, o_ref):
    @pl.when(pl.program_id(2) == 0)
    def _():
        o_ref[...] = jnp.zeros_like(o_ref)

    o_ref[...] += jnp.dot(x_ref[...], w_ref[...],
                          preferred_element_type=jnp.float32)

    @pl.when(pl.program_id(2) == pl.num_programs(2) - 1)
    def _():
        o_ref[...] += b_ref[...]


def matmul_bias_f32(x, w, bias, *, tm_max=256, tk_max=2048, tn_max=512):
    """x: (M, K)  w: (K, N)  bias: (N,) -> PADDED (Mp, Np) f32 result of x@w+b.

    The output block is VMEM-resident across the K ("arbitrary") axis, so it is
    the accumulator itself (no scratch)."""
    M, K = x.shape
    K2, N = w.shape
    assert K2 == K
    Mp = _round_up(M, SUB); tm = min(tm_max, Mp); Mp = _round_up(Mp, tm)
    Kp = _round_up(K, LANE); tk = min(tk_max, Kp); Kp = _round_up(Kp, tk)
    Np = _round_up(N, LANE); tn = min(tn_max, Np); Np = _round_up(Np, tn)

    xp = x if (Mp == M and Kp == K) else jnp.pad(x, ((0, Mp - M), (0, Kp - K)))
    wp = w if (Kp == K and Np == N) else jnp.pad(w, ((0, Kp - K), (0, Np - N)))
    bp = bias if Np == N else jnp.pad(bias, (0, Np - N))

    return pl.pallas_call(
        matmul_bias_f32_kernel,
        out_shape=jax.ShapeDtypeStruct((Mp, Np), jnp.float32),
        grid=(Mp // tm, Np // tn, Kp // tk),
        in_specs=[
            pl.BlockSpec((tm, tk), lambda i, j, k: (i, k)),
            pl.BlockSpec((tk, tn), lambda i, j, k: (k, j)),
            pl.BlockSpec((1, tn), lambda i, j, k: (0, j)),
        ],
        out_specs=pl.BlockSpec((tm, tn), lambda i, j, k: (i, j)),
        compiler_params=pltpu.CompilerParams(
            dimension_semantics=("parallel", "parallel", "arbitrary")),
    )(xp.astype(jnp.bfloat16), wp.astype(jnp.bfloat16),
      bp.reshape(1, -1).astype(jnp.float32))


# ----------------------------------------------------------------------------
# Kernel 3: MagLinear head (per-row work hoisted across the C axis)
# ----------------------------------------------------------------------------
def maglinear_kernel(x_ref, wn_ref, cos_ref, cosm_ref, xnorm_ref,
                     xn_sc, cos_m_sc, sin_m_sc, mm_sc, thr_sc, *,
                     scale, l_a, u_a, l_margin, u_margin, easy_margin):
    # Per-row work (norm, adaptive-margin trig, normalize + bf16 cast) runs
    # once per B tile at the first C step; results live in VMEM scratch across
    # the C ("arbitrary") axis, so the inner loop is MXU + cheap epilogue only.
    @pl.when(pl.program_id(1) == 0)
    def _():
        x = x_ref[...].astype(jnp.float32)                            # (tb, E)
        raw_norm = jnp.sqrt(jnp.sum(x * x, axis=1, keepdims=True))    # (tb, 1)
        x_norm = jnp.clip(raw_norm, l_a, u_a)
        # adaptive margin m(a) = (u_m - l_m)/(u_a - l_a) * (a - l_a) + l_m
        ada = (u_margin - l_margin) / (u_a - l_a) * (x_norm - l_a) + l_margin
        cos_m_sc[...] = jnp.cos(ada)
        sin_m_sc[...] = jnp.sin(ada)
        if not easy_margin:
            mm_sc[...] = jnp.sin(jnp.pi - ada) * ada
            thr_sc[...] = jnp.cos(jnp.pi - ada)
        # F.normalize(x) (weight already column-normalized in the wrapper).
        xn_sc[...] = (x / jnp.maximum(raw_norm, 1e-12)).astype(jnp.bfloat16)
        # lane-dense (tb, 128) x_norm block, resident across the C axis
        xnorm_ref[...] = jnp.broadcast_to(x_norm, xnorm_ref.shape).astype(
            xnorm_ref.dtype)

    cos_theta = jnp.dot(xn_sc[...], wn_ref[...],
                        preferred_element_type=jnp.float32)           # (tb, tc)
    cos_theta = jnp.clip(cos_theta, -1.0, 1.0)
    sin_theta = jnp.sqrt(jnp.maximum(1.0 - cos_theta * cos_theta, 0.0))
    cos_theta_m = cos_theta * cos_m_sc[...] - sin_theta * sin_m_sc[...]
    if easy_margin:
        cos_theta_m = jnp.where(cos_theta > 0.0, cos_theta_m, cos_theta)
    else:
        cos_theta_m = jnp.where(cos_theta > thr_sc[...], cos_theta_m,
                                cos_theta - mm_sc[...])
    cos_ref[...] = (scale * cos_theta).astype(cos_ref.dtype)
    cosm_ref[...] = (scale * cos_theta_m).astype(cosm_ref.dtype)


def maglinear(x_pad, w, *, batch, n_classes, scale, l_a, u_a,
              l_margin, u_margin, easy_margin, tb_max=256, tc_max=1024):
    """x_pad: (Bp, Ep) f32 (row/col zero-padded).  w: (emb, n_classes).

    Returns ((s*cos_theta, s*cos_theta_m), x_norm) at real (batch, n_classes)."""
    Bp, Ep = x_pad.shape
    emb, C = w.shape
    assert C == n_classes and emb <= Ep and Ep % LANE == 0

    # Weight column norms are constant per forward -> normalize outside the
    # kernel (removes the E*C square + cross-sublane reduce + divide in-kernel).
    w32 = w.astype(jnp.float32)
    w_n = w32 / jnp.maximum(
        jnp.sqrt(jnp.sum(w32 * w32, axis=0, keepdims=True)), 1e-12)

    Cp = _round_up(C, LANE)
    tc = min(tc_max, Cp); Cp = _round_up(Cp, tc)
    tb = min(tb_max, Bp); Bp2 = _round_up(Bp, tb)
    # With a single B tile (typical batch <= tb_max) the (E x C) bf16 weight
    # streams from HBM exactly once.
    # TODO(synk): on v7x (2 TensorCores) a single B tile leaves one core idle;
    #             split tb (or shard C) for megacore if the head dominates.

    xp = x_pad if Bp2 == Bp else jnp.pad(x_pad, ((0, Bp2 - Bp), (0, 0)))
    wp = jnp.pad(w_n, ((0, Ep - emb), (0, Cp - C))).astype(jnp.bfloat16)

    kernel = functools.partial(
        maglinear_kernel, scale=scale, l_a=l_a, u_a=u_a,
        l_margin=l_margin, u_margin=u_margin, easy_margin=easy_margin)

    cos_t, cos_tm, x_norm = pl.pallas_call(
        kernel,
        out_shape=(
            jax.ShapeDtypeStruct((Bp2, Cp), jnp.float32),
            jax.ShapeDtypeStruct((Bp2, Cp), jnp.float32),
            jax.ShapeDtypeStruct((Bp2, LANE), jnp.float32),
        ),
        grid=(Bp2 // tb, Cp // tc),
        in_specs=[
            pl.BlockSpec((tb, Ep), lambda i, j: (i, 0)),
            pl.BlockSpec((Ep, tc), lambda i, j: (0, j)),
        ],
        out_specs=(
            pl.BlockSpec((tb, tc), lambda i, j: (i, j)),
            pl.BlockSpec((tb, tc), lambda i, j: (i, j)),
            pl.BlockSpec((tb, LANE), lambda i, j: (i, 0)),
        ),
        scratch_shapes=[
            pltpu.VMEM((tb, Ep), jnp.bfloat16),   # normalized x (MXU operand)
            pltpu.VMEM((tb, 1), jnp.float32),     # cos(m)
            pltpu.VMEM((tb, 1), jnp.float32),     # sin(m)
            pltpu.VMEM((tb, 1), jnp.float32),     # mm   (hard-margin path)
            pltpu.VMEM((tb, 1), jnp.float32),     # threshold
        ],
        compiler_params=pltpu.CompilerParams(
            dimension_semantics=("parallel", "arbitrary")),
    )(xp, wp)
    return (cos_t[:batch, :C], cos_tm[:batch, :C]), x_norm[:batch, :1]


# ----------------------------------------------------------------------------
# Glue (plain JAX): BN folding, parameter layout, forward pass
# ----------------------------------------------------------------------------
def fold_bn(gamma, beta, mean, var, eps):
    s = gamma / jnp.sqrt(var + eps)
    return s.reshape(1, -1), (beta - mean * s).reshape(1, -1)


def init_params(key, *, c_in, c_feat, out_conv, img, emb, n_classes):
    ks = jax.random.split(key, 12)
    oh = img - 2                      # after Backbone.conv (3x3, no pad)
    in_features = out_conv * oh * oh  # flattened (NCHW order)
    p = {
        # stand-in timm backbone stem: conv3x3 pad1, (kh*kw*cin, cout) flat
        "stem_w": jax.random.normal(ks[0], (3 * 3 * c_in, c_feat), jnp.float32) * 0.2,
        # Backbone.conv: 3x3, no bias
        "conv_w": jax.random.normal(ks[1], (3 * 3 * c_feat, out_conv), jnp.float32) * 0.1,
        # bn2 (BatchNorm2d over out_conv channels, eps=2e-5)
        "bn2_gamma": jax.random.uniform(ks[2], (out_conv,), jnp.float32, 0.5, 1.5),
        "bn2_beta": jax.random.normal(ks[3], (out_conv,), jnp.float32) * 0.1,
        "bn2_mean": jax.random.normal(ks[4], (out_conv,), jnp.float32) * 0.1,
        "bn2_var": jax.random.uniform(ks[5], (out_conv,), jnp.float32, 0.5, 1.5),
        # fc: Linear(in_features, emb)
        "fc_w": jax.random.normal(ks[6], (in_features, emb), jnp.float32) * 0.05,
        "fc_b": jax.random.normal(ks[7], (emb,), jnp.float32) * 0.05,
        # bn (BatchNorm1d over emb)
        "bn1_gamma": jax.random.uniform(ks[8], (emb,), jnp.float32, 0.5, 1.5),
        "bn1_beta": jax.random.normal(ks[9], (emb,), jnp.float32) * 0.1,
        "bn1_mean": jnp.zeros((emb,), jnp.float32),
        "bn1_var": jnp.ones((emb,), jnp.float32),
        # MagLinear weight: (emb, n_classes), column-normalized in the wrapper
        "mag_w": jax.random.uniform(ks[10], (emb, n_classes), jnp.float32, -1.0, 1.0),
    }
    return p


def model_forward(params, x_nchw, target, *, cfg):
    del target  # forward() returns (logits, x_norm); target is unused there
    B, c_in, img_h, img_w = x_nchw.shape
    c_feat = params["stem_w"].shape[1]
    out_conv = params["conv_w"].shape[1]
    emb = params["fc_w"].shape[1]
    n_classes = params["mag_w"].shape[1]

    # ---- conv geometry (stem: 3x3 pad=1 keeps size; Backbone.conv: 3x3 valid)
    oh1, ow1 = img_h, img_w
    oh2, ow2 = img_h - 2, img_w - 2
    ow2_s = _round_up(ow2, SUB)                   # conv2 stored width
    ow1_s = _round_up(max(ow1, ow2_s + 2), SUB)   # conv1 stored width feeds conv2
    ih1, iw1 = oh1 + 2, ow1_s + 2

    # ---- fold BN + lay out weights once (small).  Activations stay 128-padded
    #      end-to-end: no pad->slice ping-pong between layers.
    stem_w = params["stem_w"].reshape(3, 3, c_in, c_feat)
    stem_w = jnp.pad(stem_w, ((0, 0), (0, 0), (0, LANE - c_in), (0, LANE - c_feat)))
    stem_w = stem_w.reshape(9, LANE, LANE)
    stem_b = jnp.zeros((LANE,), jnp.float32)

    bn2_s, bn2_b = fold_bn(params["bn2_gamma"], params["bn2_beta"],
                           params["bn2_mean"], params["bn2_var"], eps=2e-5)
    conv_w = (params["conv_w"] * bn2_s).reshape(3, 3, c_feat, out_conv)
    conv_w = jnp.pad(conv_w, ((0, 0), (0, 0), (0, LANE - c_feat), (0, LANE - out_conv)))
    conv_w = conv_w.reshape(9, LANE, LANE)
    conv_b = jnp.pad(bn2_b.reshape(-1), (0, LANE - out_conv))

    bn1_s, bn1_b = fold_bn(params["bn1_gamma"], params["bn1_beta"],
                           params["bn1_mean"], params["bn1_var"], eps=1e-5)
    emb_p = _round_up(emb, LANE)
    fc_w = (params["fc_w"] * bn1_s).reshape(out_conv, oh2, ow2, emb)
    # permute PyTorch x.view(B,-1) NCHW-flatten order -> our padded-NHWC flatten
    # TODO(synk): real PyTorch OIHW conv weights also need an OIHW->HWIO permute.
    fc_w = jnp.transpose(fc_w, (1, 2, 0, 3))
    fc_w = jnp.pad(fc_w, ((0, 0), (0, ow2_s - ow2),
                          (0, LANE - out_conv), (0, emb_p - emb)))
    fc_w = fc_w.reshape(oh2 * ow2_s * LANE, emb_p)
    fc_shift = jnp.pad(params["fc_b"] * bn1_s.reshape(-1) + bn1_b.reshape(-1),
                       (0, emb_p - emb))

    # ---- input: NCHW f32 -> NHWC bf16, one up-front spatial + channel pad
    x = jnp.transpose(x_nchw, (0, 2, 3, 1)).astype(jnp.bfloat16)
    x = jnp.pad(x, ((0, 0), (1, ih1 - img_h - 1), (1, iw1 - img_w - 1),
                    (0, LANE - c_in)))

    # --- stand-in timm backbone stem: fused conv3x3 pad=1 + ReLU (no im2col) --
    feat = conv3x3(x, stem_w, stem_b, relu=True, ow_valid=ow1, ow_store=ow1_s)

    # --- Backbone.conv (3x3, no bias) + bn2 (folded into weight/shift) -------
    y = conv3x3(feat, conv_w, conv_b, relu=False, ow_valid=ow2, ow_store=ow2_s)

    # Dropout2d: identity (eval).  Flatten stays in the padded NHWC layout
    # (contiguous reshape, no copy); the fc weight above was permuted to match.
    flat = y.reshape(B, oh2 * ow2_s * LANE)
    b_p = _round_up(B, SUB)
    if b_p != B:
        flat = jnp.pad(flat, ((0, b_p - B), (0, 0)))

    # --- fc + BatchNorm1d (folded into weight/shift) --------------------------
    e = matmul_bias_f32(flat, fc_w, fc_shift)     # (b_p, emb_p), pad cols zero

    # --- MagLinear head --------------------------------------------------------
    logits, x_norm = maglinear(
        e, params["mag_w"], batch=B, n_classes=n_classes,
        scale=cfg["scale"], l_a=cfg["l_a"], u_a=cfg["u_a"],
        l_margin=cfg["l_margin"], u_margin=cfg["u_margin"],
        easy_margin=cfg["easy_margin"])
    return logits, x_norm


# ----------------------------------------------------------------------------
if __name__ == "__main__":
    cfg = dict(scale=64.0, l_margin=0.45, u_margin=0.8,
               l_a=10.0, u_a=110.0, easy_margin=True)
    B, C_IN, IMG = 2, 3, 16
    C_FEAT, OUT_CONV, EMB, N_CLASSES = 8, 4, 32, 16

    key = jax.random.PRNGKey(0)
    k_p, k_x, k_t = jax.random.split(key, 3)
    params = init_params(k_p, c_in=C_IN, c_feat=C_FEAT, out_conv=OUT_CONV,
                         img=IMG, emb=EMB, n_classes=N_CLASSES)
    x = jax.random.normal(k_x, (B, C_IN, IMG, IMG), jnp.float32)   # NCHW like PyTorch
    target = jax.random.randint(k_t, (B,), 0, N_CLASSES)

    (cos_theta, cos_theta_m), x_norm = model_forward(params, x, target, cfg=cfg)
    jax.block_until_ready((cos_theta, cos_theta_m, x_norm))

    assert cos_theta.shape == (B, N_CLASSES)
    assert cos_theta_m.shape == (B, N_CLASSES)
    assert x_norm.shape == (B, 1)
    print("KERNEL_OK")
</pallas_src>

<mosaic_0001>
module attributes {stable_mosaic.version = 11 : i64} {
  func.func @conv3x3_kernel(%arg0: i32, %arg1: memref<1x18x26x128xbf16, #tpu.memory_space<vmem>>, %arg2: memref<9x128x128xbf16, #tpu.memory_space<vmem>>, %arg3: memref<1x128xf32, #tpu.memory_space<vmem>>, %arg4: memref<1x16x24x128xbf16, #tpu.memory_space<vmem>>, %arg5: memref<384x128xf32, #tpu.memory_space<vmem>>) attributes {dimension_semantics = [#tpu.dimension_semantics<parallel>], iteration_bounds = array<i64: 2>, scalar_prefetch = 0 : i64, scratch_operands = 1 : i64, tpu.core_type = #tpu.core_type<tc>, window_params = [{transform_indices = @transform_0, window_bounds = array<i64: 1, 18, 26, 128>}, {pipeline_mode = #tpu.pipeline_mode<synchronous>, transform_indices = @transform_1, window_bounds = array<i64: 9, 128, 128>}, {pipeline_mode = #tpu.pipeline_mode<synchronous>, transform_indices = @transform_2, window_bounds = array<i64: 1, 128>}, {transform_indices = @transform_3, window_bounds = array<i64: 1, 16, 24, 128>}]} {
    %cst = arith.constant 0.000000e+00 : f32
    %0 = vector.broadcast %cst : f32 to vector<384x128xf32>
    %c0 = arith.constant 0 : index
    %c0_0 = arith.constant 0 : index
    %1 = vector.load %arg5[%c0, %c0_0] : memref<384x128xf32, #tpu.memory_space<vmem>>, vector<384x128xf32>
    tpu.vector_store %arg5[%c0, %c0_0], %0 {strides = array<i32>} : memref<384x128xf32, #tpu.memory_space<vmem>>, vector<384x128xf32>,
    %c0_1 = arith.constant 0 : index
    %c0_2 = arith.constant 0 : index
    %c0_3 = arith.constant 0 : index
    %c0_4 = arith.constant 0 : index
    %2 = vector.load %arg1[%c0_1, %c0_2, %c0_3, %c0_4] : memref<1x18x26x128xbf16, #tpu.memory_space<vmem>>, vector<1x16x24x128xbf16>
    %3 = vector.shape_cast %2 : vector<1x16x24x128xbf16> to vector<16x24x128xbf16>
    %4 = vector.shape_cast %3 : vector<16x24x128xbf16> to vector<384x128xbf16>
    %c0_5 = arith.constant 0 : index
    %c0_6 = arith.constant 0 : index
    %5 = vector.load %arg5[%c0_5, %c0_6] : memref<384x128xf32, #tpu.memory_space<vmem>>, vector<384x128xf32>
    %c0_7 = arith.constant 0 : index
    %c0_8 = arith.constant 0 : index
    %c0_9 = arith.constant 0 : index
    %6 = vector.load %arg2[%c0_7, %c0_8, %c0_9] : memref<9x128x128xbf16, #tpu.memory_space<vmem>>, vector<1x128x128xbf16>
    %7 = vector.shape_cast %6 : vector<1x128x128xbf16> to vector<128x128xbf16>
    %cst_10 = arith.constant dense<0.000000e+00> : vector<384x128xf32>
    %8 = tpu.matmul %4, %7, %cst_10 {dimension_numbers = #tpu.dot_dimension_numbers<[1], [0], [0], [1], [0, 0, 1, 1], [], []>} : vector<384x128xbf16>, vector<128x128xbf16>, vector<384x128xf32> -> vector<384x128xf32>
    %9 = arith.addf %5, %8 : vector<384x128xf32>
    %c0_11 = arith.constant 0 : index
    %c0_12 = arith.constant 0 : index
    %10 = vector.load %arg5[%c0_11, %c0_12] : memref<384x128xf32, #tpu.memory_space<vmem>>, vector<384x128xf32>
    tpu.vector_store %arg5[%c0_11, %c0_12], %9 {strides = array<i32>} : memref<384x128xf32, #tpu.memory_space<vmem>>, vector<384x128xf32>,
    %c0_13 = arith.constant 0 : index
    %c0_14 = arith.constant 0 : index
    %c1 = arith.constant 1 : index
    %c0_15 = arith.constant 0 : index
    %11 = vector.load %arg1[%c0_13, %c0_14, %c1, %c0_15] : memref<1x18x26x128xbf16, #tpu.memory_space<vmem>>, vector<1x16x24x128xbf16>
    %12 = vector.shape_cast %11 : vector<1x16x24x128xbf16> to vector<16x24x128xbf16>
    %13 = vector.shape_cast %12 : vector<16x24x128xbf16> to vector<384x128xbf16>
    %c0_16 = arith.constant 0 : index
    %c0_17 = arith.constant 0 : index
    %14 = vector.load %arg5[%c0_16, %c0_17] : memref<384x128xf32, #tpu.memory_space<vmem>>, vector<384x128xf32>
    %c1_18 = arith.constant 1 : index
    %c0_19 = arith.constant 0 : index
    %c0_20 = arith.constant 0 : index
    %15 = vector.load %arg2[%c1_18, %c0_19, %c0_20] : memref<9x128x128xbf16, #tpu.memory_space<vmem>>, vector<1x128x128xbf16>
    %16 = vector.shape_cast %15 : vector<1x128x128xbf16> to vector<128x128xbf16>
    %cst_21 = arith.constant dense<0.000000e+00> : vector<384x128xf32>
    %17 = tpu.matmul %13, %16, %cst_21 {dimension_numbers = #tpu.dot_dimension_numbers<[1], [0], [0], [1], [0, 0, 1, 1], [], []>} : vector<384x128xbf16>, vector<128x128xbf16>, vector<384x128xf32> -> vector<384x128xf32>
    %18 = arith.addf %14, %17 : vector<384x128xf32>
    %c0_22 = arith.constant 0 : index
    %c0_23 = arith.constant 0 : index
    %19 = vector.load %arg5[%c0_22, %c0_23] : memref<384x128xf32, #tpu.memory_space<vmem>>, vector<384x128xf32>
    tpu.vector_store %arg5[%c0_22, %c0_23], %18 {strides = array<i32>} : memref<384x128xf32, #tpu.memory_space<vmem>>, vector<384x128xf32>,
    %c0_24 = arith.constant 0 : index
    %c0_25 = arith.constant 0 : index
    %c2 = arith.constant 2 : index
    %c0_26 = arith.constant 0 : index
    %20 = vector.load %arg1[%c0_24, %c0_25, %c2, %c0_26] : memref<1x18x26x128xbf16, #tpu.memory_space<vmem>>, vector<1x16x24x128xbf16>
    %21 = vector.shape_cast %20 : vector<1x16x24x128xbf16> to vector<16x24x128xbf16>
    %22 = vector.shape_cast %21 : vector<16x24x128xbf16> to vector<384x128xbf16>
    %c0_27 = arith.constant 0 : index
    %c0_28 = arith.constant 0 : index
    %23 = vector.load %arg5[%c0_27, %c0_28] : memref<384x128xf32, #tpu.memory_space<vmem>>, vector<384x128xf32>
    %c2_29 = arith.constant 2 : index
    %c0_30 = arith.constant 0 : index
    %c0_31 = arith.constant 0 : index
    %24 = vector.load %arg2[%c2_29, %c0_30, %c0_31] : memref<9x128x128xbf16, #tpu.memory_space<vmem>>, vector<1x128x128xbf16>
    %25 = vector.shape_cast %24 : vector<1x128x128xbf16> to vector<128x128xbf16>
    %cst_32 = arith.constant dense<0.000000e+00> : vector<384x128xf32>
    %26 = tpu.matmul %22, %25, %cst_32 {dimension_numbers = #tpu.dot_dimension_numbers<[1], [0], [0], [1], [0, 0, 1, 1], [], []>} : vector<384x128xbf16>, vector<128x128xbf16>, vector<384x128xf32> -> vector<384x128xf32>
    %27 = arith.addf %23, %26 : vector<384x128xf32>
    %c0_33 = arith.constant 0 : index
    %c0_34 = arith.constant 0 : index
    %28 = vector.load %arg5[%c0_33, %c0_34] : memref<384x128xf32, #tpu.memory_space<vmem>>, vector<384x128xf32>
    tpu.vector_store %arg5[%c0_33, %c0_34], %27 {strides = array<i32>} : memref<384x128xf32, #tpu.memory_space<vmem>>, vector<384x128xf32>,
    %c0_35 = arith.constant 0 : index
    %c1_36 = arith.constant 1 : index
    %c0_37 = arith.constant 0 : index
    %c0_38 = arith.constant 0 : index
    %29 = vector.load %arg1[%c0_35, %c1_36, %c0_37, %c0_38] : memref<1x18x26x128xbf16, #tpu.memory_space<vmem>>, vector<1x16x24x128xbf16>
    %30 = vector.shape_cast %29 : vector<1x16x24x128xbf16> to vector<16x24x128xbf16>
    %31 = vector.shape_cast %30 : vector<16x24x128xbf16> to vector<384x128xbf16>
    %c0_39 = arith.constant 0 : index
    %c0_40 = arith.constant 0 : index
    %32 = vector.load %arg5[%c0_39, %c0_40] : memref<384x128xf32, #tpu.memory_space<vmem>>, vector<384x128xf32>
    %c3 = arith.constant 3 : index
    %c0_41 = arith.constant 0 : index
    %c0_42 = arith.constant 0 : index
    %33 = vector.load %arg2[%c3, %c0_41, %c0_42] : memref<9x128x128xbf16, #tpu.memory_space<vmem>>, vector<1x128x128xbf16>
    %34 = vector.shape_cast %33 : vector<1x128x128xbf16> to vector<128x128xbf16>
    %cst_43 = arith.constant dense<0.000000e+00> : vector<384x128xf32>
    %35 = tpu.matmul %31, %34, %cst_43 {dimension_numbers = #tpu.dot_dimension_numbers<[1], [0], [0], [1], [0, 0, 1, 1], [], []>} : vector<384x128xbf16>, vector<128x128xbf16>, vector<384x128xf32> -> vector<384x128xf32>
    %36 = arith.addf %32, %35 : vector<384x128xf32>
    %c0_44 = arith.constant 0 : index
    %c0_45 = arith.constant 0 : index
    %37 = vector.load %arg5[%c0_44, %c0_45] : memref<384x128xf32, #tpu.memory_space<vmem>>, vector<384x128xf32>
    tpu.vector_store %arg5[%c0_44, %c0_45], %36 {strides = array<i32>} : memref<384x128xf32, #tpu.memory_space<vmem>>, vector<384x128xf32>,
    %c0_46 = arith.constant 0 : index
    %c1_47 = arith.constant 1 : index
    %c1_48 = arith.constant 1 : index
    %c0_49 = arith.constant 0 : index
    %38 = vector.load %arg1[%c0_46, %c1_47, %c1_48, %c0_49] : memref<1x18x26x128xbf16, #tpu.memory_space<vmem>>, vector<1x16x24x128xbf16>
    %39 = vector.shape_cast %38 : vector<1x16x24x128xbf16> to vector<16x24x128xbf16>
    %40 = vector.shape_cast %39 : vector<16x24x128xbf16> to vector<384x128xbf16>
    %c0_50 = arith.constant 0 : index
    %c0_51 = arith.constant 0 : index
    %41 = vector.load %arg5[%c0_50, %c0_51] : memref<384x128xf32, #tpu.memory_space<vmem>>, vector<384x128xf32>
    %c4 = arith.constant 4 : index
    %c0_52 = arith.constant 0 : index
    %c0_53 = arith.constant 0 : index
    %42 = vector.load %arg2[%c4, %c0_52, %c0_53] : memref<9x128x128xbf16, #tpu.memory_space<vmem>>, vector<1x128x128xbf16>
    %43 = vector.shape_cast %42 : vector<1x128x128xbf16> to vector<128x128xbf16>
    %cst_54 = arith.constant dense<0.000000e+00> : vector<384x128xf32>
    %44 = tpu.matmul %40, %43, %cst_54 {dimension_numbers = #tpu.dot_dimension_numbers<[1], [0], [0], [1], [0, 0, 1, 1], [], []>} : vector<384x128xbf16>, vector<128x128xbf16>, vector<384x128xf32> -> vector<384x128xf32>
    %45 = arith.addf %41, %44 : vector<384x128xf32>
    %c0_55 = arith.constant 0 : index
    %c0_56 = arith.constant 0 : index
    %46 = vector.load %arg5[%c0_55, %c0_56] : memref<384x128xf32, #tpu.memory_space<vmem>>, vector<384x128xf32>
    tpu.vector_store %arg5[%c0_55, %c0_56], %45 {strides = array<i32>} : memref<384x128xf32, #tpu.memory_space<vmem>>, vector<384x128xf32>,
    %c0_57 = arith.constant 0 : index
    %c1_58 = arith.constant 1 : index
    %c2_59 = arith.constant 2 : index
    %c0_60 = arith.constant 0 : index
    %47 = vector.load %arg1[%c0_57, %c1_58, %c2_59, %c0_60] : memref<1x18x26x128xbf16, #tpu.memory_space<vmem>>, vector<1x16x24x128xbf16>
    %48 = vector.shape_cast %47 : vector<1x16x24x128xbf16> to vector<16x24x128xbf16>
    %49 = vector.shape_cast %48 : vector<16x24x128xbf16> to vector<384x128xbf16>
    %c0_61 = arith.constant 0 : index
    %c0_62 = arith.constant 0 : index
    %50 = vector.load %arg5[%c0_61, %c0_62] : memref<384x128xf32, #tpu.memory_space<vmem>>, vector<384x128xf32>
    %c5 = arith.constant 5 : index
    %c0_63 = arith.constant 0 : index
    %c0_64 = arith.constant 0 : index
    %51 = vector.load %arg2[%c5, %c0_63, %c0_64] : memref<9x128x128xbf16, #tpu.memory_space<vmem>>, vector<1x128x128xbf16>
    %52 = vector.shape_cast %51 : vector<1x128x128xbf16> to vector<128x128xbf16>
    %cst_65 = arith.constant dense<0.000000e+00> : vector<384x128xf32>
    %53 = tpu.matmul %49, %52, %cst_65 {dimension_numbers = #tpu.dot_dimension_numbers<[1], [0], [0], [1], [0, 0, 1, 1], [], []>} : vector<384x128xbf16>, vector<128x128xbf16>, vector<384x128xf32> -> vector<384x128xf32>
    %54 = arith.addf %50, %53 : vector<384x128xf32>
    %c0_66 = arith.constant 0 : index
    %c0_67 = arith.constant 0 : index
    %55 = vector.load %arg5[%c0_66, %c0_67] : memref<384x128xf32, #tpu.memory_space<vmem>>, vector<384x128xf32>
    tpu.vector_store %arg5[%c0_66, %c0_67], %54 {strides = array<i32>} : memref<384x128xf32, #tpu.memory_space<vmem>>, vector<384x128xf32>,
    %c0_68 = arith.constant 0 : index
    %c2_69 = arith.constant 2 : index
    %c0_70 = arith.constant 0 : index
    %c0_71 = arith.constant 0 : index
    %56 = vector.load %arg1[%c0_68, %c2_69, %c0_70, %c0_71] : memref<1x18x26x128xbf16, #tpu.memory_space<vmem>>, vector<1x16x24x128xbf16>
    %57 = vector.shape_cast %56 : vector<1x16x24x128xbf16> to vector<16x24x128xbf16>
    %58 = vector.shape_cast %57 : vector<16x24x128xbf16> to vector<384x128xbf16>
    %c0_72 = arith.constant 0 : index
    %c0_73 = arith.constant 0 : index
    %59 = vector.load %arg5[%c0_72, %c0_73] : memref<384x128xf32, #tpu.memory_space<vmem>>, vector<384x128xf32>
    %c6 = arith.constant 6 : index
    %c0_74 = arith.constant 0 : index
    %c0_75 = arith.constant 0 : index
    %60 = vector.load %arg2[%c6, %c0_74, %c0_75] : memref<9x128x128xbf16, #tpu.memory_space<vmem>>, vector<1x128x128xbf16>
    %61 = vector.shape_cast %60 : vector<1x128x128xbf16> to vector<128x128xbf16>
    %cst_76 = arith.constant dense<0.000000e+00> : vector<384x128xf32>
    %62 = tpu.matmul %58, %61, %cst_76 {dimension_numbers = #tpu.dot_dimension_numbers<[1], [0], [0], [1], [0, 0, 1, 1], [], []>} : vector<384x128xbf16>, vector<128x128xbf16>, vector<384x128xf32> -> vector<384x128xf32>
    %63 = arith.addf %59, %62 : vector<384x128xf32>
    %c0_77 = arith.constant 0 : index
    %c0_78 = arith.constant 0 : index
    %64 = vector.load %arg5[%c0_77, %c0_78] : memref<384x128xf32, #tpu.memory_space<vmem>>, vector<384x128xf32>
    tpu.vector_store %arg5[%c0_77, %c0_78], %63 {strides = array<i32>} : memref<384x128xf32, #tpu.memory_space<vmem>>, vector<384x128xf32>,
    %c0_79 = arith.constant 0 : index
    %c2_80 = arith.constant 2 : index
    %c1_81 = arith.constant 1 : index
    %c0_82 = arith.constant 0 : index
    %65 = vector.load %arg1[%c0_79, %c2_80, %c1_81, %c0_82] : memref<1x18x26x128xbf16, #tpu.memory_space<vmem>>, vector<1x16x24x128xbf16>
    %66 = vector.shape_cast %65 : vector<1x16x24x128xbf16> to vector<16x24x128xbf16>
    %67 = vector.shape_cast %66 : vector<16x24x128xbf16> to vector<384x128xbf16>
    %c0_83 = arith.constant 0 : index
    %c0_84 = arith.constant 0 : index
    %68 = vector.load %arg5[%c0_83, %c0_84] : memref<384x128xf32, #tpu.memory_space<vmem>>, vector<384x128xf32>
    %c7 = arith.constant 7 : index
    %c0_85 = arith.constant 0 : index
    %c0_86 = arith.constant 0 : index
    %69 = vector.load %arg2[%c7, %c0_85, %c0_86] : memref<9x128x128xbf16, #tpu.memory_space<vmem>>, vector<1x128x128xbf16>
    %70 = vector.shape_cast %69 : vector<1x128x128xbf16> to vector<128x128xbf16>
    %cst_87 = arith.constant dense<0.000000e+00> : vector<384x128xf32>
    %71 = tpu.matmul %67, %70, %cst_87 {dimension_numbers = #tpu.dot_dimension_numbers<[1], [0], [0], [1], [0, 0, 1, 1], [], []>} : vector<384x128xbf16>, vector<128x128xbf16>, vector<384x128xf32> -> vector<384x128xf32>
    %72 = arith.addf %68, %71 : vector<384x128xf32>
    %c0_88 = arith.constant 0 : index
    %c0_89 = arith.constant 0 : index
    %73 = vector.load %arg5[%c0_88, %c0_89] : memref<384x128xf32, #tpu.memory_space<vmem>>, vector<384x128xf32>
    tpu.vector_store %arg5[%c0_88, %c0_89], %72 {strides = array<i32>} : memref<384x128xf32, #tpu.memory_space<vmem>>, vector<384x128xf32>,
    %c0_90 = arith.constant 0 : index
    %c2_91 = arith.constant 2 : index
    %c2_92 = arith.constant 2 : index
    %c0_93 = arith.constant 0 : index
    %74 = vector.load %arg1[%c0_90, %c2_91, %c2_92, %c0_93] : memref<1x18x26x128xbf16, #tpu.memory_space<vmem>>, vector<1x16x24x128xbf16>
    %75 = vector.shape_cast %74 : vector<1x16x24x128xbf16> to vector<16x24x128xbf16>
    %76 = vector.shape_cast %75 : vector<16x24x128xbf16> to vector<384x128xbf16>
    %c0_94 = arith.constant 0 : index
    %c0_95 = arith.constant 0 : index
    %77 = vector.load %arg5[%c0_94, %c0_95] : memref<384x128xf32, #tpu.memory_space<vmem>>, vector<384x128xf32>
    %c8 = arith.constant 8 : index
    %c0_96 = arith.constant 0 : index
    %c0_97 = arith.constant 0 : index
    %78 = vector.load %arg2[%c8, %c0_96, %c0_97] : memref<9x128x128xbf16, #tpu.memory_space<vmem>>, vector<1x128x128xbf16>
    %79 = vector.shape_cast %78 : vector<1x128x128xbf16> to vector<128x128xbf16>
    %cst_98 = arith.constant dense<0.000000e+00> : vector<384x128xf32>
    %80 = tpu.matmul %76, %79, %cst_98 {dimension_numbers = #tpu.dot_dimension_numbers<[1], [0], [0], [1], [0, 0, 1, 1], [], []>} : vector<384x128xbf16>, vector<128x128xbf16>, vector<384x128xf32> -> vector<384x128xf32>
    %81 = arith.addf %77, %80 : vector<384x128xf32>
    %c0_99 = arith.constant 0 : index
    %c0_100 = arith.constant 0 : index
    %82 = vector.load %arg5[%c0_99, %c0_100] : memref<384x128xf32, #tpu.memory_space<vmem>>, vector<384x128xf32>
    tpu.vector_store %arg5[%c0_99, %c0_100], %81 {strides = array<i32>} : memref<384x128xf32, #tpu.memory_space<vmem>>, vector<384x128xf32>,
    %c0_101 = arith.constant 0 : index
    %c0_102 = arith.constant 0 : index
    %83 = vector.load %arg5[%c0_101, %c0_102] : memref<384x128xf32, #tpu.memory_space<vmem>>, vector<384x128xf32>
    %c0_103 = arith.constant 0 : index
    %c0_104 = arith.constant 0 : index
    %84 = vector.load %arg3[%c0_103, %c0_104] : memref<1x128xf32, #tpu.memory_space<vmem>>, vector<1x128xf32>
    %85 = vector.broadcast %84 : vector<1x128xf32> to vector<384x128xf32>
    %86 = arith.addf %83, %85 : vector<384x128xf32>
    %cst_105 = arith.constant 0.000000e+00 : f32
    %87 = vector.broadcast %cst_105 : f32 to vector<384x128xf32>
    %88 = arith.maximumf %86, %87 : vector<384x128xf32>
    %89 = vector.shape_cast %88 : vector<384x128xf32> to vector<16x24x128xf32>
    %90 = tpu.iota {dimensions = array<i32: 1>} : vector<16x24x128xi32>
    %c16_i32 = arith.constant 16 : i32
    %91 = vector.broadcast %c16_i32 : i32 to vector<16x24x128xi32>
    %92 = arith.cmpi slt, %90, %91 : vector<16x24x128xi32>
    %cst_106 = arith.constant 0.000000e+00 : f32
    %93 = vector.broadcast %cst_106 : f32 to vector<16x24x128xf32>
    %94 = arith.select %92, %89, %93 : vector<16x24x128xi1>, vector<16x24x128xf32>
    %95 = arith.truncf %94 : vector<16x24x128xf32> to vector<16x24x128xbf16>
    %c0_107 = arith.constant 0 : index
    %c0_108 = arith.constant 0 : index
    %c0_109 = arith.constant 0 : index
    %c0_110 = arith.constant 0 : index
    %96 = vector.load %arg4[%c0_107, %c0_108, %c0_109, %c0_110] : memref<1x16x24x128xbf16, #tpu.memory_space<vmem>>, vector<1x16x24x128xbf16>
    %97 = vector.shape_cast %96 : vector<1x16x24x128xbf16> to vector<16x24x128xbf16>
    %98 = vector.shape_cast %95 : vector<16x24x128xbf16> to vector<1x16x24x128xbf16>
    tpu.vector_store %arg4[%c0_107, %c0_108, %c0_109, %c0_110], %98 {strides = array<i32>} : memref<1x16x24x128xbf16, #tpu.memory_space<vmem>>, vector<1x16x24x128xbf16>,
    return
  }
  func.func @transform_0(%arg0: i32) -> (i32, i32, i32, i32) {
    %c0_i32 = arith.constant 0 : i32
    %c0_i32_0 = arith.constant 0 : i32
    %c0_i32_1 = arith.constant 0 : i32
    %c0_i32_2 = arith.constant 0 : i32
    return %arg0, %c0_i32, %c0_i32_0, %c0_i32_1 : i32, i32, i32, i32
  }
  func.func @transform_1(%arg0: i32) -> (i32, i32, i32) {
    %c0_i32 = arith.constant 0 : i32
    %c0_i32_0 = arith.constant 0 : i32
    %c0_i32_1 = arith.constant 0 : i32
    %c0_i32_2 = arith.constant 0 : i32
    return %c0_i32, %c0_i32_0, %c0_i32_1 : i32, i32, i32
  }
  func.func @transform_2(%arg0: i32) -> (i32, i32) {
    %c0_i32 = arith.constant 0 : i32
    %c0_i32_0 = arith.constant 0 : i32
    %c0_i32_1 = arith.constant 0 : i32
    return %c0_i32, %c0_i32_0 : i32, i32
  }
  func.func @transform_3(%arg0: i32) -> (i32, i32, i32, i32) {
    %c0_i32 = arith.constant 0 : i32
    %c0_i32_0 = arith.constant 0 : i32
    %c0_i32_1 = arith.constant 0 : i32
    %c0_i32_2 = arith.constant 0 : i32
    return %arg0, %c0_i32, %c0_i32_0, %c0_i32_1 : i32, i32, i32, i32
  }
}

</mosaic_0001>

<bundles_post_ra>
// kernel: tpu_custom_call.1
= control target key start
LH: loop header
LB: loop body
LE: loop exit
PB: predicated region body
PF: predicated region fallthrough
CT: control target
= control target key end

     0   :  { %8 = vsyncpa [#allocation4], 0  ;;  %s11169_s0 = inlined_call_operand.vmem [shape: bf16[2,18,26,128], index: 0, kind: input, shape index: {}]   ;;  %s11170_s1 = inlined_call_operand.vmem [shape: bf16[9,128,128], index: 1, kind: input, shape index: {}]   ;;  %s11171_s2 = inlined_call_operand.vmem [shape: f32[1,128], index: 2, kind: input, shape index: {}]   ;;  %s11172_s3 = inlined_call_operand.hbm [shape: bf16[2,16,24,128], index: 3, kind: output, shape index: {}]  }
   0x1   :  { %10 = vsyncpa [#allocation4 + $0x1], 0  ;;  %s9041_s12 = smov 0   ;;  %s9043_s13 = smov 0  }
   0x2   :  { %s9045_s14 = smov 0   ;;  %s9047_s15 = smov 0  }
   0x3 LB: > { %s9062_s16 = sadd.s32 4294967295, %s9016_s15   ;;  %s7483_s17 = sadd.s32 4294967294, %s9016_s15   ;;  %s9016_s15 = sphi %s9047_s15, %s11216_s15   ;;  %s9012_s14 = sphi %s9045_s14, %s11215_s14   ;;  %s9008_s13 = sphi %s9043_s13, %s11214_s13   ;;  %s9004_s12 = sphi %s9041_s12, %s11213_s12  }
   0x4   : > { %s9066_s18 = sadd.s32 1, %s9016_s15   ;;  %s91_s19 = sadd.s32 1, %s9012_s14 }
   0x5   : > { %s88_s20 = ssub.s32 %s9016_s15, %s9066_s18  ;;  %p101_p0 = scmp.ne.s32.totalorder %s9012_s14, %s9008_s13 }
   0x6   : > { %p89_p1 = scmp.eq.s32.totalorder %s88_s20, 0  ;;  %p102_p2 = scmp.eq.s32.totalorder %s9062_s16, 1 }
   0x7   : > { %p107_p3 = scmp.ne.s32.totalorder %s9008_s13, %s9004_s12  ;;  %p108_p4 = scmp.eq.s32.totalorder %s7483_s17, 1 }
   0x8   : > { %s9077_s21 = scalar_select %p89_p1, %s9012_s14, %s91_s19  }
   0x9   : > { %p9079_p5 = por %p102_p2, %p101_p0  ;;  %p9083_p6 = por %p108_p4, %p107_p3 }
   0xa   : > { %p7486_p7 = scmp.ge.s32.totalorder %s9016_s15, 1  ;;  %p140_p8 = scmp.lt.s32.totalorder %s9016_s15, 3 }
   0xc   : > { %p141_p9 = pnand %p7486_p7, %p140_p8 }
   0xe   : > { %144 = sbr.rel (%p141_p9) target bundleno = 1047 (0x417), region = 32 }
  0x13   : > { %v8626_v0 = vld [vmem:[%s11170_s1 + $0x38] sm:$0xff]  ;;  %v8625_v1 = vld [vmem:[%s11170_s1 + $0x30] sm:$0xff]  ;;  %v8624_v2 = vld [vmem:[%s11170_s1 + $0x28] sm:$0xff]  ;;  %p164_p10 = scmp.lt.s32.totalorder %s9062_s16, 1  ;;  %vm810_vm0 = vsmask.f32 3328 }
  0x14   : > { %8882 = vmatpush.bf16.msra.mxu1 %v8626_v0  ;;  %8883 = vmatpush.bf16.msra.mxu2 %v8626_v0  ;;  %v8623_v3 = vld [vmem:[%s11170_s1 + $0x20] sm:$0xff]  ;;  %v8622_v4 = vld [vmem:[%s11170_s1 + $0x18] sm:$0xff]  ;;  %v8621_v5 = vld [vmem:[%s11170_s1 + $0x10] sm:$0xff]  ;;  %vm811_vm1 = vsmask.f32 7440  ;;  %vm1919_vm2 = vcmask 1042432  }
  0x15   : > { %8884 = vmatpush.bf16.msra.mxu3 %v8626_v0  ;;  %521 = vmatpush.bf16.msra.mxu0 %v8626_v0  ;;  %s165_s9 = scalar_select %p164_p10, %s9062_s16, 1  ;;  %v8620_v6 = vld [vmem:[%s11170_s1 + $0x8] sm:$0xff]  ;;  %v8619_v7 = vld [vmem:[%s11170_s1] sm:$0xff]  ;;  %v8642_v8 = vld [vmem:[%s11170_s1 + $0xb8] sm:$0xff]  ;;  %vm1920_vm3 = vcmask 1046532  }
  0x16   : > { %v8674_v9 = vld [vmem:[%s11170_s1 + $0xf8] sm:$0xff]  ;;  %v8641_v16 = vld [vmem:[%s11170_s1 + $0xb0] sm:$0xff]  ;;  %v8640_v20 = vld [vmem:[%s11170_s1 + $0xa8] sm:$0xff]  ;;  %s161_s11 = sand.u32 1, %s9008_s13   ;;  %s8908_s27 = smul.u32 192, %s9062_s16 }
  0x17   : > { %s8907_s17 = smul.u32 288, %s165_s9  ;;  %v8634_v14 = vld [vmem:[%s11170_s1 + $0x78] sm:$0xff]  ;;  %v8673_v17 = vld [vmem:[%s11170_s1 + $0xf0] sm:$0xff]  ;;  %v8672_v21 = vld [vmem:[%s11170_s1 + $0xe8] sm:$0xff]  ;;  %s7406_s16 = scalar_lea.sflag [#allocation4], %s161_s11 }
  0x18   : > { %8885 = vmatpush.bf16.msra.mxu1 %v8625_v1  ;;  %8886 = vmatpush.bf16.msra.mxu2 %v8625_v1  ;;  %v8682_v15 = vld [vmem:[%s11170_s1 + $0x138] sm:$0xff]  ;;  %v8633_v18 = vld [vmem:[%s11170_s1 + $0x70] sm:$0xff]  ;;  %v8632_v22 = vld [vmem:[%s11170_s1 + $0x68] sm:$0xff]  ;;  %s7417_s30 = scalar_lea.hbm %s11172_s3, %s8908_s27  ;;  %s8974_s10 = scalar_lea.hbm %s11172_s3, 384 }
  0x19   : > { %8887 = vmatpush.bf16.msra.mxu3 %v8625_v1  ;;  %522 = vmatpush.bf16.msra.mxu0 %v8625_v1  ;;  %s9118_s26 = scalar_lea.vmem %s11169_s0, %s8907_s17  ;;  %v8681_v19 = vld [vmem:[%s11170_s1 + $0x130] sm:$0xff]  ;;  %v8680_v23 = vld [vmem:[%s11170_s1 + $0x128] sm:$0xff]  ;;  %v8639_v25 = vld [vmem:[%s11170_s1 + $0xa0] sm:$0xff]  ;;  %s10638_s17 = smul.u32 192, %s161_s11 }
  0x1a   : > { %v8601_v10 = vld [vmem:[%s9118_s26 + $0x40] sm:$0xff]  ;;  %v7518_v24 = vld [vmem:[%s9118_s26 + $0x48] sm:$0xf]  ;;  %v8602_v27 = vld [vmem:[%s9118_s26 + $0x4c] sm:$0xf0]  ;;  %s7420_s5 = sshll.u32 %s7417_s30, 4  ;;  %s7421_s5 = int_to_ptr.hbm [resolvable:$true] %s7420_s5 }
  0x1b   : > { %v8607_v11 = vld [vmem:[%s9118_s26 + $0x80] sm:$0xff]  ;;  %v7542_v28 = vld [vmem:[%s9118_s26 + $0x88] sm:$0xf]  ;;  %v8608_v29 = vld [vmem:[%s9118_s26 + $0x8c] sm:$0xf0]  ;;  %v7519_v36 = vor.u32 %v8602_v27, %v7518_v24  ;;  %s10662_s19 = scalar_lea.vmem [#allocation3], %s10638_s17 }
  0x1c   : > { %8888 = vmatpush.bf16.msra.mxu1 %v8624_v2  ;;  %8889 = vmatpush.bf16.msra.mxu2 %v8624_v2  ;;  %v8613_v12 = vld [vmem:[%s9118_s26 + $0xc0] sm:$0xff]  ;;  %v7566_v30 = vld [vmem:[%s9118_s26 + $0xc8] sm:$0xf]  ;;  %v8614_v31 = vld [vmem:[%s9118_s26 + $0xcc] sm:$0xf0]  ;;  %v7543_v37 = vor.u32 %v8608_v29, %v7542_v28  ;;  %s7418_s4 = sshll.u32 %s10662_s19, 4  ;;  %s7419_s4 = int_to_ptr.vmem [resolvable:$true] %s7418_s4 }
  0x1d   : > { %8890 = vmatpush.bf16.msra.mxu3 %v8624_v2  ;;  %523 = vmatpush.bf16.msra.mxu0 %v8624_v2  ;;  %v8595_v13 = vld [vmem:[%s9118_s26] sm:$0xff]  ;;  %v7494_v32 = vld [vmem:[%s9118_s26 + $0x8] sm:$0xf]  ;;  %v8596_v33 = vld [vmem:[%s9118_s26 + $0xc] sm:$0xf0]  ;;  %v7567_v38 = vor.u32 %v8614_v31, %v7566_v30  ;;  %s8968_s6 = sshra.s32 %s7421_s5, 4  ;;  %s8969_s6 = int_to_ptr.hbm [resolvable:$true] %s8968_s6 }
  0x1e   : > { %v8671_v26 = vld [vmem:[%s11170_s1 + $0xe0] sm:$0xff]  ;;  %v7495_v39 = vor.u32 %v8596_v33, %v7494_v32  ;;  %v8638_v40 = vld [vmem:[%s11170_s1 + $0x98] sm:$0xff]  ;;  %v8637_v44 = vld [vmem:[%s11170_s1 + $0x90] sm:$0xff]  ;;  %s8970_s7 = scalar_lea.hbm %s8969_s6, 192  ;;  %p8975_p0 = scmp.lt.s32.totalorder %s8969_s6, %s11172_s3 }
  0x1f   : > { %v8631_v34 = vld [vmem:[%s11170_s1 + $0x60] sm:$0xff]  ;;  %v8670_v41 = vld [vmem:[%s11170_s1 + $0xd8] sm:$0xff]  ;;  %v8669_v45 = vld [vmem:[%s11170_s1 + $0xd0] sm:$0xff]  ;;  %p8971_p11 = scmp.ne.s32.totalorder %s8969_s6, %s8970_s7  ;;  %p8976_p1 = scmp.lt.s32.totalorder %s8974_s10, %s8970_s7 }
  0x20   : > { %8891 = vmatpush.bf16.msra.mxu1 %v8623_v3  ;;  %8892 = vmatpush.bf16.msra.mxu2 %v8623_v3  ;;  %v8679_v35 = vld [vmem:[%s11170_s1 + $0x120] sm:$0xff]  ;;  %v8630_v42 = vld [vmem:[%s11170_s1 + $0x58] sm:$0xff]  ;;  %v8629_v50 = vld [vmem:[%s11170_s1 + $0x50] sm:$0xff] }
  0x21   : > { %8893 = vmatpush.bf16.msra.mxu3 %v8623_v3  ;;  %524 = vmatpush.bf16.msra.mxu0 %v8623_v3  ;;  %v8678_v43 = vld [vmem:[%s11170_s1 + $0x118] sm:$0xff]  ;;  %v8677_v51 = vld [vmem:[%s11170_s1 + $0x110] sm:$0xff]  ;;  %v8636_v52 = vld [vmem:[%s11170_s1 + $0x88] sm:$0xff]  ;;  %p8972_p12 = pnand %p8971_p11, %p9079_p5  ;;  %p8977_p2 = por %p8976_p1, %p8975_p0 }
  0x22   : > { %v8603_v46 = vld [vmem:[%s9118_s26 + $0x54] sm:$0xff]  ;;  %v8668_v53 = vld [vmem:[%s11170_s1 + $0xc8] sm:$0xff]  ;;  %v8604_v55 = vld [vmem:[%s9118_s26 + $0x60] sm:$0xff] }
  0x23   : > { %v8609_v47 = vld [vmem:[%s9118_s26 + $0x94] sm:$0xff]  ;;  %v8628_v54 = vld [vmem:[%s11170_s1 + $0x48] sm:$0xff]  ;;  %v8610_v56 = vld [vmem:[%s9118_s26 + $0xa0] sm:$0xff]  ;;  %p8973_p13 = pneg %p8972_p12 }
  0x24   : > { %8894 = vmatpush.bf16.msra.mxu1 %v8622_v4  ;;  %8895 = vmatpush.bf16.msra.mxu2 %v8622_v4  ;;  %v8615_v48 = vld [vmem:[%s9118_s26 + $0xd4] sm:$0xff]  ;;  %v8616_v57 = vld [vmem:[%s9118_s26 + $0xe0] sm:$0xff]  ;;  %v8676_v59 = vld [vmem:[%s11170_s1 + $0x108] sm:$0xff] }
  0x25   : > { %8896 = vmatpush.bf16.msra.mxu3 %v8622_v4  ;;  %525 = vmatpush.bf16.msra.mxu0 %v8622_v4  ;;  %v8597_v49 = vld [vmem:[%s9118_s26 + $0x14] sm:$0xff]  ;;  %v8598_v58 = vld [vmem:[%s9118_s26 + $0x20] sm:$0xff]  ;;  %v7530_v0 = vld [vmem:[%s9118_s26 + $0x68] sm:$0xf]  ;;  %p8978_p3 = pnand %p8977_p2, %p8973_p13 }
  0x26   : > { %v8635_v60 = vld [vmem:[%s11170_s1 + $0x80] sm:$0xff]  ;;  %v8605_v1 = vld [vmem:[%s9118_s26 + $0x6c] sm:$0xf0]  ;;  %v7554_v2 = vld [vmem:[%s9118_s26 + $0xa8] sm:$0xf] }
  0x27   : > { %v8667_v61 = vld [vmem:[%s11170_s1 + $0xc0] sm:$0xff]  ;;  %v8611_v3 = vld [vmem:[%s9118_s26 + $0xac] sm:$0xf0]  ;;  %v7578_v4 = vld [vmem:[%s9118_s26 + $0xe8] sm:$0xf] }
  0x28   : > { %8897 = vmatpush.bf16.msra.mxu1 %v8621_v5  ;;  %8898 = vmatpush.bf16.msra.mxu2 %v8621_v5  ;;  %v8627_v62 = vld [vmem:[%s11170_s1 + $0x40] sm:$0xff]  ;;  %v748_v32 = vld [vmem:[%s9118_s26 + $0x8] sm:$0xf]  ;;  %vm9274_vm4 = vmor %vm810_vm0, %vm811_vm1 }
  0x29   : > { %8899 = vmatpush.bf16.msra.mxu3 %v8621_v5  ;;  %526 = vmatpush.bf16.msra.mxu0 %v8621_v5  ;;  %v8675_v63 = vld [vmem:[%s11170_s1 + $0x100] sm:$0xff]  ;;  %v8617_v5 = vld [vmem:[%s9118_s26 + $0xec] sm:$0xf0]  ;;  %vm9279_vm5 = vmor %vm1919_vm2, %vm1920_vm3 }
  0x2a   : > { %v1792_v33 = vld [vmem:[%s9118_s26 + $0x4] sm:$0xf] }
  0x2c   : > { %8900 = vmatpush.bf16.msra.mxu1 %v8620_v6  ;;  %8901 = vmatpush.bf16.msra.mxu2 %v8620_v6 }
  0x2d   : > { %8902 = vmatpush.bf16.msra.mxu3 %v8620_v6  ;;  %527 = vmatpush.bf16.msra.mxu0 %v8620_v6  ;;  %v7506_v6 = vld [vmem:[%s9118_s26 + $0x28] sm:$0xf] }
  0x30   : > { %8903 = vmatpush.bf16.msra.mxu1 %v8619_v7  ;;  %8904 = vmatpush.bf16.msra.mxu2 %v8619_v7 }
  0x31   : > { %8905 = vmatpush.bf16.msra.mxu3 %v8619_v7  ;;  %528 = vmatpush.bf16.msra.mxu0 %v8619_v7  ;;  %v8599_v7 = vld [vmem:[%s9118_s26 + $0x2c] sm:$0xf0] }
  0x33   : > { %559 = vmatmul.bf16.vlgmr.msra.gmra.mxu1 %v8601_v10  ;;  %589 = vmatmul.bf16.vlgmr.msra.gmra.mxu2 %v8607_v11  ;;  %v7579_v10 = vor.u32 %v8617_v5, %v7578_v4  ;;  %v7507_v11 = vor.u32 %v8599_v7, %v7506_v6  ;;  %v837_v4 = vshrl.u32 %v748_v32, 16 }
  0x34   : > { %2291 = vmatpush.bf16.msrb.mxu2 %v8642_v8  ;;  %619 = vmatmul.bf16.vlgmr.msra.gmra.mxu3 %v8613_v12  ;;  %v7531_v8 = vor.u32 %v8605_v1, %v7530_v0  ;;  %v746_v12 = vld [vmem:[%s9118_s26] sm:$0xf] }
  0x35   : > { %2822 = vmatpush.bf16.msrb.mxu3 %v8674_v9  ;;  %529 = vmatmul.bf16.vlgmr.msra.gmra.mxu0 %v8595_v13  ;;  %v7555_v9 = vor.u32 %v8611_v3, %v7554_v2  ;;  %v747_v13 = vld [vmem:[%s9118_s26 + $0x4] sm:$0xf]  ;;  %v7924_v2 = vld [vmem:[%s9118_s26 + $0x20] sm:$0xf] }
  0x36   : > { %1566 = vmatpush.bf16.msrb.mxu1 %v8634_v14  ;;  %3864 = vmatpush.bf16.msrb.mxu0 %v8682_v15  ;;  %v8722_v14 = vld [vmem:[%s11170_s1 + $0x1b8] sm:$0xff] }
  0x37   : > { %v8730_v15 = vld [vmem:[%s11170_s1 + $0x1f8] sm:$0xff] }
  0x38   : > { %2292 = vmatpush.bf16.msrb.mxu2 %v8641_v16  ;;  %v8690_v16 = vld [vmem:[%s11170_s1 + $0x178] sm:$0xff] }
  0x39   : > { %2823 = vmatpush.bf16.msrb.mxu3 %v8673_v17  ;;  %v814_v17 = vshrl.u32 %v746_v12, 16 }
  0x3a   : > { %1567 = vmatpush.bf16.msrb.mxu1 %v8633_v18  ;;  %3865 = vmatpush.bf16.msrb.mxu0 %v8681_v19  ;;  %v817_v18 = vshll.u32 %v746_v12, 16  ;;  %v8738_v19 = vld [vmem:[%s11170_s1 + $0x238] sm:$0xff]  ;;  %v3149_v12 = vshll.u32 %v7924_v2, 16 }
  0x3b   : > { %v816_v28 = vrot.slane %v814_v17, 4 }
  0x3c   : > { %2293 = vmatpush.bf16.msrb.mxu2 %v8640_v20  ;;  %v823_v20 = vshll.u32 %v747_v13, 16  ;;  %v819_v29 = vrot.slane %v817_v18, 5  ;;  %v751_v18 = vld [vmem:[%s9118_s26 + $0x14] sm:$0xf] }
  0x3d   : > { %2824 = vmatpush.bf16.msrb.mxu3 %v8672_v21  ;;  %v827_v21 = vshrl.u32 %v747_v13, 16 }
  0x3e   : > { %1568 = vmatpush.bf16.msrb.mxu1 %v8632_v22  ;;  %3866 = vmatpush.bf16.msrb.mxu0 %v8680_v23  ;;  %v7920_v22 = vld [vmem:[%s9118_s26 + $0x10] sm:$0xf]  ;;  %v7921_v23 = vld [vmem:[%s9118_s26 + $0x14] sm:$0xf]  ;;  %v825_v30 = vrot.slane %v823_v20, 5 }
  0x3f   : > { %v3112_v24 = vshrl.u32 %v7920_v22, 16  ;;  %v3125_v27 = vshrl.u32 %v7921_v23, 16  ;;  %v829_v31 = vrot.slane %v827_v21, 4 }
  0x40   : > { %2294 = vmatpush.bf16.msrb.mxu2 %v8639_v25  ;;  %v3115_v25 = vshll.u32 %v7920_v22, 16 }
  0x41   : > { %2825 = vmatpush.bf16.msrb.mxu3 %v8671_v26  ;;  %v3121_v26 = vshll.u32 %v7921_v23, 16 }
  0x42   : > { %1569 = vmatpush.bf16.msrb.mxu1 %v8631_v34  ;;  %3867 = vmatpush.bf16.msrb.mxu0 %v8679_v35  ;;  %v3114_v34 = vrot.slane %v3112_v24, 4  ;;  %v3117_v35 = vrot.slane %v3115_v25, 5  ;;  %v7923_v25 = vld [vmem:[%s9118_s26 + $0x1c] sm:$0x1] }
  0x43   : > { %564 = vmatmul.bf16.gmra.mxu1 %v7519_v36  ;;  %594 = vmatmul.bf16.gmra.mxu2 %v7543_v37  ;;  %v3123_v36 = vrot.slane %v3121_v26, 5  ;;  %v3127_v37 = vrot.slane %v3125_v27, 4  ;;  %v3151_v27 = vrot.slane %v3149_v12, 5 }
  0x44   : > { %624 = vmatmul.bf16.gmra.mxu3 %v7567_v38  ;;  %2295 = vmatpush.bf16.msrb.mxu2 %v8638_v40  ;;  %v8606_v38 = vld [vmem:[%s9118_s26 + $0x74] sm:$0xff]  ;;  %v830_v40 = vor.u32 %v829_v31, %v825_v30 }
  0x45   : > { %534 = vmatmul.bf16.gmra.mxu0 %v7495_v39  ;;  %2826 = vmatpush.bf16.msrb.mxu3 %v8670_v41  ;;  %v820_v39 = vor.u32 %v819_v29, %v816_v28  ;;  %v833_v41 = vshll.u32 %v748_v32, 16  ;;  %v857_v29 = vshll.u32 %v751_v18, 16 }
  0x46   : > { %1570 = vmatpush.bf16.msrb.mxu1 %v8630_v42  ;;  %3868 = vmatpush.bf16.msrb.mxu0 %v8678_v43  ;;  %v7922_v42 = vld [vmem:[%s9118_s26 + $0x18] sm:$0xf] }
  0x47   : > { %v8612_v43 = vld [vmem:[%s9118_s26 + $0xb4] sm:$0xff] }
  0x48   : > { %2296 = vmatpush.bf16.msrb.mxu2 %v8637_v44  ;;  %v8618_v44 = vld [vmem:[%s9118_s26 + $0xf4] sm:$0xff] }
  0x49   : > { %2827 = vmatpush.bf16.msrb.mxu3 %v8669_v45  ;;  %v8600_v45 = vld [vmem:[%s9118_s26 + $0x34] sm:$0xff] }
  0x4a   : > { %1571 = vmatpush.bf16.msrb.mxu1 %v8629_v50  ;;  %3869 = vmatpush.bf16.msrb.mxu0 %v8677_v51  ;;  %v3128_v50 = vor.u32 %v3127_v37, %v3123_v36  ;;  %v3131_v51 = vshll.u32 %v7922_v42, 16  ;;  %v1794_v37 = vld [vmem:[%s9118_s26 + $0xc] sm:$0x1] }
  0x4c   : > { %2297 = vmatpush.bf16.msrb.mxu2 %v8636_v52  ;;  %v821_v52 = vrot.slane %v820_v39, 4  ;;  %v3141_v39 = vshll.u32 %v7923_v25, 16 }
  0x4d   : > { %2828 = vmatpush.bf16.msrb.mxu3 %v8668_v53  ;;  %v831_v53 = vrot.slane %v830_v40, 4  ;;  %v1795_v40 = vld [vmem:[%s9118_s26 + $0x10] sm:$0xe] }
  0x4e   : > { %1572 = vmatpush.bf16.msrb.mxu1 %v8628_v54  ;;  %3870 = vmatpush.bf16.msrb.mxu0 %v8676_v59  ;;  %v9271_v54 = vrot.slane %v833_v41, 5  ;;  %v826_v0 = vsel %vm9274_vm4, %v821_v52, %v825_v30  ;;  %v7925_v30 = vld [vmem:[%s9118_s26 + $0x24] sm:$0xf]  ;;  %v9308_v41 = vld [vmem:[%s9118_s26 + $0x14] sm:$0xf]  ;;  %v7665_v52 = vrot.slane %v1795_v40, 9 }
  0x4f   : > { %v1422_v13 = vunpack.c.l.b16 %v826_v0 }
  0x50   : > { %2298 = vmatpush.bf16.msrb.mxu2 %v8635_v60  ;;  %v750_v60 = vld [vmem:[%s9118_s26 + $0x10] sm:$0xf]  ;;  %v836_v1 = vsel %vm9274_vm4, %v831_v53, %v9271_v54  ;;  %v1934_v53 = vrot.slane %v9308_v41, 5 }
  0x51   : > { %2829 = vmatpush.bf16.msrb.mxu3 %v8667_v61  ;;  %v848_v5 = vshrl.u32 %v750_v60, 16  ;;  %v851_v6 = vshll.u32 %v750_v60, 16 }
  0x52   : > { %1573 = vmatpush.bf16.msrb.mxu1 %v8627_v62  ;;  %3871 = vmatpush.bf16.msrb.mxu0 %v8675_v63  ;;  %v3129_v62 = vrot.slane %v3128_v50, 4  ;;  %v3133_v63 = vrot.slane %v3131_v51, 5  ;;  %v1930_v51 = vrot.slane %v1794_v37, 5  ;;  %v1936_v40 = vrot.slane %v1934_v53, 4 }
  0x53   : > { %569 = vmatmul.bf16.gmra.mxu1 %v8603_v46  ;;  %599 = vmatmul.bf16.gmra.mxu2 %v8609_v47  ;;  %v1791_v46 = vld [vmem:[%s9118_s26] sm:$0xe]  ;;  %v1924_v47 = vrot.slane %v1792_v33, 5  ;;  %v850_v20 = vrot.slane %v848_v5, 4  ;;  %v853_v21 = vrot.slane %v851_v6, 5 }
  0x54   : > { %629 = vmatmul.bf16.gmra.mxu3 %v8615_v48  ;;  %5117 = vmatpush.bf16.msra.mxu2 %v8722_v14  ;;  %v9269_v48 = vld [vmem:[%s9118_s26 + $0x8] sm:$0xf]  ;;  %v1423_v14 = vunpack.c.l.b16 %v836_v1 }
  0x55   : > { %539 = vmatmul.bf16.gmra.mxu0 %v8597_v49  ;;  %6159 = vmatpush.bf16.msra.mxu3 %v8730_v15  ;;  %v3118_v49 = vor.u32 %v3117_v35, %v3114_v34  ;;  %v1927_v59 = vrot.slane %v9269_v48, 5  ;;  %v854_v34 = vor.u32 %v853_v21, %v850_v20  ;;  %v8643_v35 = vld [vmem:[%s9118_s26 + $0x10] sm:$0xff] }
  0x56   : > { %4586 = vmatpush.bf16.msra.mxu1 %v8690_v16  ;;  %6881 = vmatpush.bf16.msra.mxu0 %v8738_v19  ;;  %v749_v16 = vld [vmem:[%s9118_s26 + $0xc] sm:$0x1]  ;;  %v839_v19 = vrot.slane %v837_v4, 4  ;;  %v1470_v31 = vpack.c.b16 %v1423_v14, %v1422_v13 }
  0x57   : > { %v3119_v61 = vrot.slane %v3118_v49, 4  ;;  %v843_v28 = vshll.u32 %v749_v16, 16  ;;  %v855_v49 = vrot.slane %v854_v34, 4  ;;  %v1929_v50 = vrot.slane %v1927_v59, 4  ;;  %v1797_v16 = vld [vmem:[%s9118_s26 + $0x18] sm:$0xf] }
  0x58   : > { %v840_v33 = vor.u32 %v839_v19, %v9271_v54 }
  0x59   : > { %v1931_v1 = vsel %vm9279_vm5, %v1929_v50, %v1930_v51 }
  0x5a   : > { %v841_v48 = vrot.slane %v840_v33, 4  ;;  %v2149_v13 = vunpack.c.l.b16 %v1931_v1 }
  0x63   : > { %574 = vmatmul.bf16.gmra.mxu1 %v8604_v55  ;;  %604 = vmatmul.bf16.gmra.mxu2 %v8610_v56  ;;  %v7664_v56 = vrot.slane %v1791_v46, 9  ;;  %v861_v46 = vshrl.u32 %v751_v18, 16 }
  0x64   : > { %634 = vmatmul.bf16.gmra.mxu3 %v8616_v57 }
  0x65   : > { %544 = vmatmul.bf16.gmra.mxu0 %v8598_v58  ;;  %v1926_v58 = vrot.slane %v1924_v47, 4  ;;  %v1925_v3 = vsel %vm9279_vm5, %v7664_v56, %v1924_v47  ;;  %v752_v47 = vld [vmem:[%s9118_s26 + $0x18] sm:$0xf]  ;;  %v3143_v56 = vrot.slane %v3141_v39, 5 }
  0x66   : > { %v2147_v15 = vunpack.c.l.b16 %v1925_v3  ;;  %v1935_v3 = vsel %vm9279_vm5, %v7665_v52, %v1934_v53 }
  0x67   : > { %v1928_v7 = vsel %vm9279_vm5, %v1926_v58, %v1927_v59  ;;  %v2150_v14 = vunpack.c.l.b16 %v1935_v3 }
  0x68   : > { %v2148_v17 = vunpack.c.l.b16 %v1928_v7 }
  0x6a   : > { %v2195_v32 = vpack.c.b16 %v2148_v17, %v2147_v15  ;;  %v753_v15 = vld [vmem:[%s9118_s26 + $0x1c] sm:$0x1] }
  0x73   : > { %579 = vmatmul.bf16.gmra.mxu1 %v7531_v8  ;;  %609 = vmatmul.bf16.gmra.mxu2 %v7555_v9  ;;  %v3135_v8 = vshrl.u32 %v7922_v42, 16  ;;  %v3124_v9 = vsel %vm9274_vm4, %v3119_v61, %v3123_v36  ;;  %v867_v61 = vshll.u32 %v752_v47, 16 }
  0x74   : > { %639 = vmatmul.bf16.gmra.mxu3 %v7579_v10  ;;  %v3134_v10 = vsel %vm9274_vm4, %v3129_v62, %v3133_v63  ;;  %v3720_v22 = vunpack.c.l.b16 %v3124_v9  ;;  %v871_v62 = vshrl.u32 %v752_v47, 16  ;;  %v755_v47 = vld [vmem:[%s9118_s26 + $0x24] sm:$0xf] }
  0x75   : > { %549 = vmatmul.bf16.gmra.mxu0 %v7507_v11  ;;  %v3146_v11 = vshrl.u32 %v7924_v2, 16  ;;  %v3721_v23 = vunpack.c.l.b16 %v3134_v10  ;;  %v3137_v24 = vrot.slane %v3135_v8, 4  ;;  %v3159_v2 = vshrl.u32 %v7925_v30, 16 }
  0x76   : > { %v863_v8 = vrot.slane %v861_v46, 4  ;;  %v9325_v9 = vrot.slane %v867_v61, 5  ;;  %v873_v10 = vrot.slane %v871_v62, 4  ;;  %v891_v61 = vshll.u32 %v755_v47, 16 }
  0x77   : > { %v3148_v26 = vrot.slane %v3146_v11, 4  ;;  %v3768_v36 = vpack.c.b16 %v3721_v23, %v3720_v22  ;;  %v3161_v17 = vrot.slane %v3159_v2, 4  ;;  %v7798_v22 = vld [vmem:[%s9118_s26 + $0x18] sm:$0xf]  ;;  %v8644_v23 = vld [vmem:[%s9118_s26 + $0x1c] sm:$0xf0] }
  0x78   : > { %v874_v25 = vor.u32 %v873_v10, %v9325_v9  ;;  %v7799_v33 = vor.u32 %v8644_v23, %v7798_v22  ;;  %v895_v62 = vshrl.u32 %v755_v47, 16  ;;  %v7930_v22 = vld [vmem:[%s9118_s26 + $0x38] sm:$0xf] }
  0x79   : > { %v3152_v42 = vor.u32 %v3151_v27, %v3148_v26  ;;  %v7927_v26 = vld [vmem:[%s9118_s26 + $0x2c] sm:$0x1]  ;;  %v877_v27 = vshll.u32 %v753_v15, 16 }
  0x7b   : > { %v3153_v58 = vrot.slane %v3152_v42, 4  ;;  %v879_v39 = vrot.slane %v877_v27, 5 }
  0x83   : > { %584 = vmatmul.bf16.gmra.mxu1 %v8606_v38  ;;  %614 = vmatmul.bf16.gmra.mxu2 %v8612_v43  ;;  %v3138_v38 = vor.u32 %v3137_v24, %v3133_v63  ;;  %v3155_v43 = vshll.u32 %v7925_v30, 16  ;;  %v7926_v63 = vld [vmem:[%s9118_s26 + $0x28] sm:$0xf]  ;;  %v2196_v30 = vpack.c.b16 %v2150_v14, %v2149_v13  ;;  %v897_v13 = vrot.slane %v895_v62, 4 }
  0x84   : > { %644 = vmatmul.bf16.gmra.mxu3 %v8618_v44  ;;  %v845_v44 = vrot.slane %v843_v28, 5  ;;  %v3165_v5 = vshll.u32 %v7926_v63, 16  ;;  %v3169_v6 = vshrl.u32 %v7926_v63, 16  ;;  %v1937_v28 = vrot.slane %v1797_v16, 5  ;;  %v8689_v63 = vld [vmem:[%s11170_s1 + $0x170] sm:$0xff] }
  0x85   : > { %554 = vmatmul.bf16.gmra.mxu0 %v8600_v45  ;;  %v859_v45 = vrot.slane %v857_v29, 5  ;;  %v3139_v54 = vrot.slane %v3138_v38, 4  ;;  %v3157_v60 = vrot.slane %v3155_v43, 5  ;;  %v875_v38 = vrot.slane %v874_v25, 4  ;;  %4587 = vmatpush.bf16.msra.mxu1 %v8689_v63  ;;  %v756_v16 = vld [vmem:[%s9118_s26 + $0x28] sm:$0xf] }
  0x86   : > { %v846_v0 = vsel %vm9274_vm4, %v841_v48, %v845_v44  ;;  %v9329_v20 = vrot.slane %v3165_v5, 5  ;;  %v3171_v21 = vrot.slane %v3169_v6, 4  ;;  %v1939_v41 = vrot.slane %v1937_v28, 4  ;;  %v754_v44 = vld [vmem:[%s9118_s26 + $0x20] sm:$0xf]  ;;  %v8721_v48 = vld [vmem:[%s11170_s1 + $0x1b0] sm:$0xff] }
  0x87   : > { %v860_v59 = vsel %vm9274_vm4, %v855_v49, %v859_v45  ;;  %v3144_v4 = vsel %vm9274_vm4, %v3139_v54, %v3143_v56  ;;  %v3158_v7 = vsel %vm9274_vm4, %v3153_v58, %v3157_v60  ;;  %v1424_v11 = vunpack.c.l.b16 %v846_v0  ;;  %v8729_v49 = vld [vmem:[%s11170_s1 + $0x1f0] sm:$0xff]  ;;  %5118 = vmatpush.bf16.msra.mxu2 %v8721_v48 }
  0x88   : > { %v1425_v12 = vunpack.c.l.b16 %v860_v59  ;;  %v3722_v18 = vunpack.c.l.b16 %v3144_v4  ;;  %v3723_v19 = vunpack.c.l.b16 %v3158_v7  ;;  %v864_v24 = vor.u32 %v863_v8, %v859_v45  ;;  %v7928_v54 = vld [vmem:[%s9118_s26 + $0x30] sm:$0xf]  ;;  %v7929_v56 = vld [vmem:[%s9118_s26 + $0x34] sm:$0xf]  ;;  %6160 = vmatpush.bf16.msra.mxu3 %v8729_v49 }
  0x89   : > { %v880_v51 = vsel %vm9274_vm4, %v875_v38, %v879_v39  ;;  %v1938_v52 = vsel %vm9279_vm5, %v1936_v40, %v1937_v28  ;;  %v882_v58 = vshrl.u32 %v754_v44, 16  ;;  %v3180_v1 = vshrl.u32 %v7928_v54, 16  ;;  %v8737_v5 = vld [vmem:[%s11170_s1 + $0x230] sm:$0xff]  ;;  %v8645_v28 = vld [vmem:[%s9118_s26 + $0x24] sm:$0xff] }
  0x8a   : > { %v1471_v29 = vpack.c.b16 %v1425_v12, %v1424_v11  ;;  %v3769_v34 = vpack.c.b16 %v3723_v19, %v3722_v18  ;;  %v865_v37 = vrot.slane %v864_v24, 4  ;;  %v3183_v2 = vshll.u32 %v7928_v54, 16  ;;  %6882 = vmatpush.bf16.msra.mxu0 %v8737_v5  ;;  %v758_v40 = vld [vmem:[%s9118_s26 + $0x30] sm:$0xf] }
  0x8b   : > { %v3189_v3 = vshll.u32 %v7929_v56, 16  ;;  %v3193_v4 = vshrl.u32 %v7929_v56, 16  ;;  %v1427_v7 = vunpack.c.l.b16 %v880_v51  ;;  %v2151_v8 = vunpack.c.l.b16 %v1938_v52  ;;  %v7932_v52 = vld [vmem:[%s9118_s26 + $0x40] sm:$0xf] }
  0x8c   : > { %v870_v50 = vsel %vm9274_vm4, %v865_v37, %v9325_v9  ;;  %v884_v10 = vrot.slane %v882_v58, 4  ;;  %v893_v12 = vrot.slane %v891_v61, 5  ;;  %v3182_v18 = vrot.slane %v3180_v1, 4 }
  0x8d   : > { %v1426_v6 = vunpack.c.l.b16 %v870_v50  ;;  %v3185_v19 = vrot.slane %v3183_v2, 5  ;;  %v3199_v37 = vshll.u32 %v7930_v22, 16  ;;  %v905_v49 = vshrl.u32 %v756_v16, 16 }
  0x8e   : > { %v916_v50 = vshrl.u32 %v758_v40, 16  ;;  %v919_v51 = vshll.u32 %v758_v40, 16  ;;  %v3203_v62 = vshrl.u32 %v7930_v22, 16  ;;  %v3214_v1 = vshrl.u32 %v7932_v52, 16  ;;  %v7933_v22 = vld [vmem:[%s9118_s26 + $0x44] sm:$0xf] }
  0x8f   : > { %v1472_v23 = vpack.c.b16 %v1427_v7, %v1426_v6  ;;  %v9381_v47 = vrot.slane %v3199_v37, 5  ;;  %v3217_v2 = vshll.u32 %v7932_v52, 16  ;;  %v9418_v37 = vld [vmem:[%s9118_s26 + $0x34] sm:$0xf] }
  0x90   : > { %v921_v5 = vrot.slane %v919_v51, 5  ;;  %v1954_v51 = vrot.slane %v9418_v37, 5 }
  0x93   : > { %1574 = vmatmul.bf16.vlgmr.msrb.gmra.mxu1 %v1470_v31  ;;  %2299 = vmatmul.bf16.vlgmr.msrb.gmra.mxu2 %v2195_v32  ;;  %v1798_v31 = vld [vmem:[%s9118_s26 + $0x1c] sm:$0x1]  ;;  %v3162_v32 = vor.u32 %v3161_v17, %v3157_v60  ;;  %v885_v60 = vshll.u32 %v754_v44, 16  ;;  %v1800_v17 = vld [vmem:[%s9118_s26 + $0x24] sm:$0xf] }
  0x94   : > { %2830 = vmatmul.bf16.vlgmr.msrb.gmra.mxu3 %v8643_v35  ;;  %v3172_v35 = vor.u32 %v3171_v21, %v9329_v20  ;;  %v1940_v42 = vrot.slane %v1798_v31, 5  ;;  %v3195_v21 = vrot.slane %v3193_v4, 4  ;;  %v1944_v31 = vrot.slane %v1800_v17, 5 }
  0x95   : > { %3872 = vmatmul.bf16.vlgmr.msrb.gmra.mxu0 %v3768_v36  ;;  %v3175_v36 = vshll.u32 %v7927_v26, 16  ;;  %v3163_v43 = vrot.slane %v3162_v32, 4  ;;  %v887_v11 = vrot.slane %v885_v60, 5  ;;  %v898_v26 = vor.u32 %v897_v13, %v893_v12  ;;  %v759_v13 = vld [vmem:[%s9118_s26 + $0x34] sm:$0xf] }
  0x96   : > { %v3173_v45 = vrot.slane %v3172_v35, 4  ;;  %v1941_v53 = vsel %vm9279_vm5, %v1939_v41, %v1940_v42  ;;  %v3186_v35 = vor.u32 %v3185_v19, %v3182_v18  ;;  %v918_v4 = vrot.slane %v916_v50, 4 }
  0x97   : > { %v3177_v46 = vrot.slane %v3175_v36, 5  ;;  %v3168_v0 = vsel %vm9274_vm4, %v3163_v43, %v9329_v20  ;;  %v2152_v9 = vunpack.c.l.b16 %v1941_v53  ;;  %v3191_v20 = vrot.slane %v3189_v3, 5 }
  0x98   : > { %v3724_v14 = vunpack.c.l.b16 %v3168_v0  ;;  %v888_v25 = vor.u32 %v887_v11, %v884_v10  ;;  %v899_v39 = vrot.slane %v898_v26, 4  ;;  %v1946_v43 = vrot.slane %v1944_v31, 4  ;;  %v757_v10 = vld [vmem:[%s9118_s26 + $0x2c] sm:$0x1] }
  0x99   : > { %v3178_v59 = vsel %vm9274_vm4, %v3173_v45, %v3177_v46  ;;  %v2197_v24 = vpack.c.b16 %v2152_v9, %v2151_v8  ;;  %v3196_v36 = vor.u32 %v3195_v21, %v3191_v20  ;;  %v3187_v45 = vrot.slane %v3186_v35, 4 }
  0x9a   : > { %v3725_v15 = vunpack.c.l.b16 %v3178_v59  ;;  %v889_v38 = vrot.slane %v888_v25, 4  ;;  %v907_v3 = vrot.slane %v905_v49, 4  ;;  %v3219_v17 = vrot.slane %v3217_v2, 5 }
  0x9b   : > { %v3197_v46 = vrot.slane %v3196_v36, 4  ;;  %v3192_v0 = vsel %vm9274_vm4, %v3187_v45, %v3191_v20  ;;  %v911_v20 = vshll.u32 %v757_v10, 16  ;;  %v922_v21 = vor.u32 %v921_v5, %v918_v4 }
  0x9c   : > { %v894_v54 = vsel %vm9274_vm4, %v889_v38, %v893_v12  ;;  %v3726_v11 = vunpack.c.l.b16 %v3192_v0  ;;  %v925_v26 = vshll.u32 %v759_v13, 16  ;;  %v7934_v0 = vld [vmem:[%s9118_s26 + $0x48] sm:$0xf]  ;;  %v3227_v4 = vshrl.u32 %v7933_v22, 16 }
  0x9d   : > { %v3202_v59 = vsel %vm9274_vm4, %v3197_v46, %v9381_v47  ;;  %v1428_v6 = vunpack.c.l.b16 %v894_v54 }
  0x9e   : > { %v3727_v12 = vunpack.c.l.b16 %v3202_v59  ;;  %v927_v45 = vrot.slane %v925_v26, 5 }
  0xa3   : > { %1579 = vmatmul.bf16.gmra.mxu1 %v1471_v29  ;;  %2304 = vmatmul.bf16.gmra.mxu2 %v2196_v30  ;;  %v3770_v29 = vpack.c.b16 %v3725_v15, %v3724_v14  ;;  %v901_v30 = vshll.u32 %v756_v16, 16  ;;  %v3205_v14 = vrot.slane %v3203_v62, 4  ;;  %v7931_v15 = vld [vmem:[%s9118_s26 + $0x3c] sm:$0x1]  ;;  %v3216_v16 = vrot.slane %v3214_v1, 4 }
  0xa4   : > { %2835 = vmatmul.bf16.gmra.mxu3 %v7799_v33  ;;  %v1799_v33 = vld [vmem:[%s9118_s26 + $0x20] sm:$0xe]  ;;  %v3209_v35 = vshll.u32 %v7931_v15, 16 }
  0xa5   : > { %3877 = vmatmul.bf16.gmra.mxu0 %v3769_v34  ;;  %v9377_v34 = vld [vmem:[%s9118_s26 + $0x28] sm:$0xf]  ;;  %v903_v41 = vrot.slane %v901_v30, 5  ;;  %v7666_v42 = vrot.slane %v1799_v33, 9  ;;  %v3771_v30 = vpack.c.b16 %v3727_v12, %v3726_v11  ;;  %v1803_v33 = vld [vmem:[%s9118_s26 + $0x30] sm:$0xe]  ;;  %v3220_v38 = vor.u32 %v3219_v17, %v3216_v16 }
  0xa6   : > { %v1947_v44 = vrot.slane %v9377_v34, 5  ;;  %v3206_v34 = vor.u32 %v3205_v14, %v9381_v47  ;;  %v7667_v50 = vrot.slane %v1803_v33, 9  ;;  %v929_v47 = vshrl.u32 %v759_v13, 16 }
  0xa7   : > { %v904_v58 = vsel %vm9274_vm4, %v899_v39, %v903_v41  ;;  %v1945_v60 = vsel %vm9279_vm5, %v7666_v42, %v1944_v31  ;;  %v908_v19 = vor.u32 %v907_v3, %v903_v41  ;;  %v1802_v31 = vld [vmem:[%s9118_s26 + $0x2c] sm:$0x1]  ;;  %v3223_v39 = vshll.u32 %v7933_v22, 16 }
  0xa8   : > { %v1948_v61 = vsel %vm9279_vm5, %v1946_v43, %v1947_v44  ;;  %v1429_v7 = vunpack.c.l.b16 %v904_v58  ;;  %v2153_v8 = vunpack.c.l.b16 %v1945_v60  ;;  %v913_v41 = vrot.slane %v911_v20, 5  ;;  %v760_v43 = vld [vmem:[%s9118_s26 + $0x38] sm:$0xf]  ;;  %v761_v20 = vld [vmem:[%s9118_s26 + $0x3c] sm:$0x1] }
  0xa9   : > { %v2154_v9 = vunpack.c.l.b16 %v1948_v61  ;;  %v909_v40 = vrot.slane %v908_v19, 4  ;;  %v923_v42 = vrot.slane %v922_v21, 4  ;;  %v1949_v46 = vrot.slane %v1947_v44, 4  ;;  %v1805_v21 = vld [vmem:[%s9118_s26 + $0x38] sm:$0xf] }
  0xaa   : > { %v1950_v49 = vrot.slane %v1802_v31, 5  ;;  %v3207_v52 = vrot.slane %v3206_v34, 4  ;;  %v3211_v54 = vrot.slane %v3209_v35, 5  ;;  %v3221_v58 = vrot.slane %v3220_v38, 4  ;;  %v7935_v34 = vld [vmem:[%s9118_s26 + $0x4c] sm:$0x1] }
  0xab   : > { %v2198_v25 = vpack.c.b16 %v2154_v9, %v2153_v8  ;;  %v3225_v60 = vrot.slane %v3223_v39, 5  ;;  %v935_v61 = vshll.u32 %v760_v43, 16  ;;  %v939_v62 = vshrl.u32 %v760_v43, 16 }
  0xac   : > { %v914_v2 = vsel %vm9274_vm4, %v909_v40, %v913_v41  ;;  %v928_v44 = vsel %vm9274_vm4, %v923_v42, %v927_v45  ;;  %v1951_v3 = vsel %vm9279_vm5, %v1949_v46, %v1950_v49  ;;  %v3233_v8 = vshll.u32 %v7934_v0, 16  ;;  %v1806_v41 = vld [vmem:[%s9118_s26 + $0x3c] sm:$0x1] }
  0xad   : > { %v3237_v9 = vshrl.u32 %v7934_v0, 16  ;;  %v3226_v11 = vsel %vm9274_vm4, %v3221_v58, %v3225_v60  ;;  %v931_v12 = vrot.slane %v929_v47, 4  ;;  %v9439_v13 = vrot.slane %v935_v61, 5 }
  0xae   : > { %v941_v14 = vrot.slane %v939_v62, 4  ;;  %v1430_v15 = vunpack.c.l.b16 %v914_v2  ;;  %v1431_v16 = vunpack.c.l.b16 %v928_v44  ;;  %v2155_v17 = vunpack.c.l.b16 %v1951_v3  ;;  %v763_v44 = vld [vmem:[%s9118_s26 + $0x44] sm:$0xf]  ;;  %v8720_v3 = vld [vmem:[%s11170_s1 + $0x1a8] sm:$0xff] }
  0xaf   : > { %v3229_v22 = vrot.slane %v3227_v4, 4  ;;  %v9443_v26 = vrot.slane %v3233_v8, 5  ;;  %v932_v31 = vor.u32 %v931_v12, %v927_v45  ;;  %v1957_v37 = vrot.slane %v1805_v21, 5  ;;  %5119 = vmatpush.bf16.msra.mxu2 %v8720_v3  ;;  %v7937_v12 = vld [vmem:[%s9118_s26 + $0x54] sm:$0xf]  ;;  %v8648_v3 = vld [vmem:[%s9118_s26 + $0x44] sm:$0xff] }
  0xb0   : > { %v9370_v27 = vpop.f32.mrf.mxu1  ;;  %v942_v33 = vor.u32 %v941_v14, %v9439_v13  ;;  %v1474_v39 = vpack.c.b16 %v1431_v16, %v1430_v15  ;;  %v1956_v61 = vrot.slane %v1954_v51, 4  ;;  %v1960_v0 = vrot.slane %v1806_v41, 5 }
  0xb1   : > { %v3230_v42 = vor.u32 %v3229_v22, %v3225_v60  ;;  %v1959_v62 = vrot.slane %v1957_v37, 4 }
  0xb2   : > { %v9373_v32 = vpop.f32.mrf.mxu0  ;;  %v1958_v8 = vsel %vm9279_vm5, %v1956_v61, %v1957_v37 }
  0xb3   : > { %1584 = vmatmul.bf16.gmra.mxu1 %v1472_v23  ;;  %2309 = vmatmul.bf16.gmra.mxu2 %v2197_v24  ;;  %v1473_v24 = vpack.c.b16 %v1429_v7, %v1428_v6  ;;  %v1955_v6 = vsel %vm9279_vm5, %v7667_v50, %v1954_v51  ;;  %v3212_v7 = vsel %vm9274_vm4, %v3207_v52, %v3211_v54  ;;  %v3243_v50 = vshll.u32 %v7935_v34, 16  ;;  %v8728_v51 = vld [vmem:[%s11170_s1 + $0x1e8] sm:$0xff] }
  0xb4   : > { %2840 = vmatmul.bf16.gmra.mxu3 %v8645_v28  ;;  %v2156_v19 = vunpack.c.l.b16 %v1955_v6  ;;  %v933_v52 = vrot.slane %v932_v31, 4  ;;  %v943_v54 = vrot.slane %v942_v33, 4  ;;  %v3231_v60 = vrot.slane %v3230_v42, 4  ;;  %v8736_v31 = vld [vmem:[%s11170_s1 + $0x228] sm:$0xff] }
  0xb5   : > { %3882 = vmatmul.bf16.gmra.mxu0 %v3770_v29  ;;  %v8646_v29 = vld [vmem:[%s9118_s26 + $0x30] sm:$0xff]  ;;  %v3245_v2 = vrot.slane %v3243_v50, 5  ;;  %6161 = vmatpush.bf16.msra.mxu3 %v8728_v51 }
  0xb6   : > { %v9383_v48 = vpop.f32.mrf.mxu2  ;;  %v2199_v40 = vpack.c.b16 %v2156_v19, %v2155_v17  ;;  %v938_v4 = vsel %vm9274_vm4, %v933_v52, %v9439_v13  ;;  %v959_v13 = vshll.u32 %v763_v44, 16  ;;  %v963_v17 = vshrl.u32 %v763_v44, 16  ;;  %v8688_v19 = vld [vmem:[%s11170_s1 + $0x168] sm:$0xff]  ;;  %6883 = vmatpush.bf16.msra.mxu0 %v8736_v31 }
  0xb7   : > { %v9386_v53 = vpop.f32.mrf.mxu3  ;;  %v3236_v21 = vsel %vm9274_vm4, %v3231_v60, %v9443_v26  ;;  %4588 = vmatpush.bf16.msra.mxu1 %v8688_v19  ;;  %v1432_v33 = vunpack.c.l.b16 %v938_v4  ;;  %v766_v19 = vld [vmem:[%s9118_s26 + $0x50] sm:$0xf] }
  0xb8   : > { %v9390_v56 = vpop.f32.mrf.mxu1  ;;  %v965_v41 = vrot.slane %v963_v17, 4  ;;  %v3730_v42 = vunpack.c.l.b16 %v3236_v21 }
  0xba   : > { %v9398_v63 = vpop.f32.mrf.mxu0 }
  0xbe   : > { %v9408_v18 = vpop.f32.mrf.mxu2 }
  0xbf   : > { %v9411_v23 = vpop.f32.mrf.mxu3 }
  0xc0   : > { %v565_v28 = vpop.f32.mrf.mxu1 }
  0xc1   : > { %v3239_v28 = vrot.slane %v3237_v9, 4  ;;  %v1961_v9 = vsel %vm9279_vm5, %v1959_v62, %v1960_v0  ;;  %v7938_v62 = vld [vmem:[%s9118_s26 + $0x58] sm:$0xf] }
  0xc2   : > { %v535_v36 = vpop.f32.mrf.mxu0 }
  0xc3   : > { %1589 = vmatmul.bf16.gmra.mxu1 %v1473_v24  ;;  %2314 = vmatmul.bf16.gmra.mxu2 %v2198_v25  ;;  %v3728_v24 = vunpack.c.l.b16 %v3212_v7  ;;  %v3729_v25 = vunpack.c.l.b16 %v3226_v11  ;;  %v945_v36 = vshll.u32 %v761_v20, 16  ;;  %v3240_v45 = vor.u32 %v3239_v28, %v9443_v26  ;;  %v7936_v11 = vld [vmem:[%s9118_s26 + $0x50] sm:$0xf] }
  0xc4   : > { %2845 = vmatmul.bf16.gmra.mxu3 %v8646_v29  ;;  %v7810_v29 = vld [vmem:[%s9118_s26 + $0x38] sm:$0xf]  ;;  %v3251_v28 = vshll.u32 %v7936_v11, 16  ;;  %v2158_v26 = vunpack.c.l.b16 %v1961_v9  ;;  %v1807_v9 = vld [vmem:[%s9118_s26 + $0x40] sm:$0xe] }
  0xc5   : > { %3887 = vmatmul.bf16.gmra.mxu0 %v3771_v30  ;;  %v8647_v30 = vld [vmem:[%s9118_s26 + $0x3c] sm:$0xf0]  ;;  %v3772_v49 = vpack.c.b16 %v3729_v25, %v3728_v24  ;;  %v947_v58 = vrot.slane %v945_v36, 5  ;;  %v3248_v25 = vshrl.u32 %v7936_v11, 16  ;;  %v2157_v36 = vunpack.c.l.b16 %v1958_v8  ;;  %v9506_v11 = vld [vmem:[%s9118_s26 + $0x48] sm:$0xf] }
  0xc6   : > { %v595_v59 = vpop.f32.mrf.mxu2  ;;  %v7811_v46 = vor.u32 %v8647_v30, %v7810_v29  ;;  %v3257_v29 = vshll.u32 %v7937_v12, 16  ;;  %v3261_v30 = vshrl.u32 %v7937_v12, 16  ;;  %v3253_v52 = vrot.slane %v3251_v28, 5 }
  0xc7   : > { %v625_v1 = vpop.f32.mrf.mxu3  ;;  %v762_v59 = vld [vmem:[%s9118_s26 + $0x40] sm:$0xf]  ;;  %v948_v7 = vsel %vm9274_vm4, %v943_v54, %v947_v58  ;;  %v3250_v50 = vrot.slane %v3248_v25, 4  ;;  %v7668_v21 = vrot.slane %v1807_v9, 9  ;;  %v7939_v9 = vld [vmem:[%s9118_s26 + $0x5c] sm:$0x1] }
  0xc8   : > { %v9429_v5 = vpop.f32.mrf.mxu1  ;;  %v3241_v1 = vrot.slane %v3240_v45, 4  ;;  %v950_v15 = vshrl.u32 %v762_v59, 16  ;;  %v953_v16 = vshll.u32 %v762_v59, 16  ;;  %v1433_v34 = vunpack.c.l.b16 %v948_v7  ;;  %v1808_v45 = vld [vmem:[%s9118_s26 + $0x44] sm:$0xf] }
  0xc9   : > { %v3259_v54 = vrot.slane %v3257_v29, 5  ;;  %v3263_v58 = vrot.slane %v3261_v30, 4  ;;  %v2200_v59 = vpack.c.b16 %v2158_v26, %v2157_v36  ;;  %v1964_v7 = vrot.slane %v1808_v45, 5  ;;  %v7940_v36 = vld [vmem:[%s9118_s26 + $0x60] sm:$0xf] }
  0xca   : > { %v9435_v10 = vpop.f32.mrf.mxu0  ;;  %v3246_v22 = vsel %vm9274_vm4, %v3241_v1, %v3245_v2  ;;  %v952_v37 = vrot.slane %v950_v15, 4  ;;  %v1475_v60 = vpack.c.b16 %v1433_v34, %v1432_v33  ;;  %v3254_v12 = vor.u32 %v3253_v52, %v3250_v50 }
  0xcb   : > { %v3264_v15 = vor.u32 %v3263_v58, %v3259_v54  ;;  %v984_v33 = vshrl.u32 %v766_v19, 16  ;;  %v987_v34 = vshll.u32 %v766_v19, 16  ;;  %v3282_v52 = vshrl.u32 %v7940_v36, 16 }
  0xcc   : > { %v3255_v25 = vrot.slane %v3254_v12, 4  ;;  %v3285_v58 = vshll.u32 %v7940_v36, 16  ;;  %v1810_v36 = vld [vmem:[%s9118_s26 + $0x4c] sm:$0x1] }
  0xcd   : > { %v3265_v28 = vrot.slane %v3264_v15, 4 }
  0xce   : > { %v9449_v35 = vpop.f32.mrf.mxu2  ;;  %v3260_v50 = vsel %vm9274_vm4, %v3255_v25, %v3259_v54  ;;  %v3287_v12 = vrot.slane %v3285_v58, 5 }
  0xcf   : > { %v9451_v38 = vpop.f32.mrf.mxu3 }
  0xd0   : > { %11184 = vst [vmem:[#allocation6_spill] sm:$0xff] %v9451_v38  ;;  %v9454_v43 = vpop.f32.mrf.mxu1 }
  0xd2   : > { %v9457_v47 = vpop.f32.mrf.mxu0 }
  0xd3   : > { %1594 = vmatmul.bf16.gmra.mxu1 %v1474_v39  ;;  %2319 = vmatmul.bf16.gmra.mxu2 %v2199_v40  ;;  %v955_v39 = vrot.slane %v953_v16, 5  ;;  %v9493_v40 = vrot.slane %v959_v13, 5  ;;  %v3267_v16 = vshll.u32 %v7938_v62, 16 }
  0xd4   : > { %2850 = vmatmul.bf16.gmra.mxu3 %v7811_v46  ;;  %v3731_v46 = vunpack.c.l.b16 %v3246_v22  ;;  %v1966_v22 = vrot.slane %v1964_v7, 4 }
  0xd5   : > { %3892 = vmatmul.bf16.gmra.mxu0 %v3772_v49  ;;  %v764_v49 = vld [vmem:[%s9118_s26 + $0x48] sm:$0xf]  ;;  %v956_v1 = vor.u32 %v955_v39, %v952_v37  ;;  %v966_v2 = vor.u32 %v965_v41, %v9493_v40  ;;  %v9510_v29 = vrot.slane %v3267_v16, 5 }
  0xd6   : > { %v9470_v6 = vpop.f32.mrf.mxu2  ;;  %v3773_v51 = vpack.c.b16 %v3731_v46, %v3730_v42  ;;  %v969_v4 = vshll.u32 %v764_v49, 16  ;;  %v973_v31 = vshrl.u32 %v764_v49, 16  ;;  %v1965_v42 = vsel %vm9279_vm5, %v7668_v21, %v1964_v7  ;;  %v7941_v21 = vld [vmem:[%s9118_s26 + $0x64] sm:$0xf] }
  0xd7   : > { %v9480_v14 = vpop.f32.mrf.mxu3  ;;  %v957_v13 = vrot.slane %v956_v1, 4  ;;  %v967_v17 = vrot.slane %v966_v2, 4  ;;  %v3271_v49 = vshrl.u32 %v7938_v62, 16  ;;  %v2159_v2 = vunpack.c.l.b16 %v1965_v42 }
  0xd8   : > { %11185 = vst [vmem:[#allocation7_spill] sm:$0xff] %v9480_v14  ;;  %v572_v20 = vpop.f32.mrf.mxu1 }
  0xd9   : > { %v971_v20 = vrot.slane %v969_v4, 5  ;;  %v962_v37 = vsel %vm9274_vm4, %v957_v13, %v9493_v40  ;;  %v3270_v40 = vsel %vm9274_vm4, %v3265_v28, %v9510_v29  ;;  %v3732_v4 = vunpack.c.l.b16 %v3260_v50 }
  0xda   : > { %v542_v24 = vpop.f32.mrf.mxu0  ;;  %v3733_v54 = vunpack.c.l.b16 %v3270_v40  ;;  %v3273_v7 = vrot.slane %v3271_v49, 4  ;;  %v3291_v50 = vshll.u32 %v7941_v21, 16 }
  0xdb   : > { %v1967_v24 = vrot.slane %v9506_v11, 5  ;;  %v972_v41 = vsel %vm9274_vm4, %v967_v17, %v971_v20  ;;  %v3284_v11 = vrot.slane %v3282_v52, 4 }
  0xdc   : > { %v1435_v1 = vunpack.c.l.b16 %v972_v41  ;;  %v3277_v41 = vshll.u32 %v7939_v9, 16  ;;  %v7942_v9 = vld [vmem:[%s9118_s26 + $0x68] sm:$0xf] }
  0xdd   : > { %v1968_v46 = vsel %vm9279_vm5, %v1966_v22, %v1967_v24  ;;  %v3288_v49 = vor.u32 %v3287_v12, %v3284_v11 }
  0xde   : > { %v602_v61 = vpop.f32.mrf.mxu2  ;;  %v2160_v62 = vunpack.c.l.b16 %v1968_v46  ;;  %v1811_v46 = vld [vmem:[%s9118_s26 + $0x50] sm:$0xe] }
  0xdf   : > { %v632_v0 = vpop.f32.mrf.mxu3  ;;  %v975_v61 = vrot.slane %v973_v31, 4 }
  0xe0   : > { %v9499_v44 = vpop.f32.mrf.mxu1  ;;  %v986_v0 = vrot.slane %v984_v33, 4  ;;  %v2201_v28 = vpack.c.b16 %v2160_v62, %v2159_v2  ;;  %v8649_v33 = vld [vmem:[%s9118_s26 + $0x50] sm:$0xff]  ;;  %v3279_v2 = vrot.slane %v3277_v41, 5  ;;  %v768_v62 = vld [vmem:[%s9118_s26 + $0x58] sm:$0xf] }
  0xe1   : > { %v976_v16 = vor.u32 %v975_v61, %v971_v20  ;;  %v9551_v20 = vld [vmem:[%s9118_s26 + $0x54] sm:$0xf] }
  0xe2   : > { %v9502_v8 = vpop.f32.mrf.mxu0 }
  0xe3   : > { %1599 = vmatmul.bf16.gmra.mxu1 %v1475_v60  ;;  %2324 = vmatmul.bf16.gmra.mxu2 %v2200_v59  ;;  %v989_v60 = vrot.slane %v987_v34, 5  ;;  %v1434_v59 = vunpack.c.l.b16 %v962_v37  ;;  %v3774_v34 = vpack.c.b16 %v3733_v54, %v3732_v4  ;;  %v3274_v37 = vor.u32 %v3273_v7, %v9510_v29 }
  0xe4   : > { %2855 = vmatmul.bf16.gmra.mxu3 %v8648_v3  ;;  %v765_v3 = vld [vmem:[%s9118_s26 + $0x4c] sm:$0x1]  ;;  %v977_v40 = vrot.slane %v976_v16, 4  ;;  %v7669_v29 = vrot.slane %v1811_v46, 9  ;;  %v9557_v4 = vrot.slane %v3291_v50, 5 }
  0xe5   : > { %3897 = vmatmul.bf16.gmra.mxu0 %v3773_v51  ;;  %v9537_v51 = vld [vmem:[%s9118_s26 + $0x54] sm:$0xf]  ;;  %v979_v13 = vshll.u32 %v765_v3, 16  ;;  %v990_v17 = vor.u32 %v989_v60, %v986_v0  ;;  %v1476_v25 = vpack.c.b16 %v1435_v1, %v1434_v59  ;;  %v1969_v0 = vrot.slane %v1967_v24, 4 }
  0xe6   : > { %v9512_v30 = vpop.f32.mrf.mxu2  ;;  %v993_v19 = vshll.u32 %v9537_v51, 16  ;;  %v1970_v60 = vrot.slane %v1810_v36, 5  ;;  %v1974_v59 = vrot.slane %v9551_v20, 5  ;;  %v3275_v1 = vrot.slane %v3274_v37, 4 }
  0xe7   : > { %v9515_v26 = vpop.f32.mrf.mxu3  ;;  %v981_v52 = vrot.slane %v979_v13, 5  ;;  %v991_v58 = vrot.slane %v990_v17, 4  ;;  %v3289_v3 = vrot.slane %v3288_v49, 4  ;;  %v997_v12 = vshrl.u32 %v9537_v51, 16 }
  0xe8   : > { %11186 = vst [vmem:[#allocation8_spill] sm:$0xff] %v9515_v26  ;;  %v9520_v39 = vpop.f32.mrf.mxu1  ;;  %v9553_v61 = vrot.slane %v993_v19, 5  ;;  %v1971_v16 = vsel %vm9279_vm5, %v1969_v0, %v1970_v60  ;;  %v1003_v13 = vshll.u32 %v768_v62, 16  ;;  %v1007_v17 = vshrl.u32 %v768_v62, 16  ;;  %v769_v60 = vld [vmem:[%s9118_s26 + $0x5c] sm:$0x1] }
  0xe9   : > { %v982_v7 = vsel %vm9274_vm4, %v977_v40, %v981_v52  ;;  %v3294_v51 = vsel %vm9274_vm4, %v3289_v3, %v9557_v4  ;;  %v3305_v36 = vshrl.u32 %v7942_v9, 16  ;;  %v999_v20 = vrot.slane %v997_v12, 4  ;;  %v7822_v40 = vld [vmem:[%s9118_s26 + $0x58] sm:$0xf]  ;;  %v8650_v52 = vld [vmem:[%s9118_s26 + $0x5c] sm:$0xf0] }
  0xea   : > { %v9528_v45 = vpop.f32.mrf.mxu0  ;;  %v996_v24 = vsel %vm9274_vm4, %v991_v58, %v9553_v61  ;;  %v1436_v37 = vunpack.c.l.b16 %v982_v7  ;;  %v9579_v49 = vrot.slane %v1003_v13, 5  ;;  %v1009_v50 = vrot.slane %v1007_v17, 4 }
  0xeb   : > { %v1437_v41 = vunpack.c.l.b16 %v996_v24  ;;  %v3735_v0 = vunpack.c.l.b16 %v3294_v51  ;;  %v1013_v12 = vshll.u32 %v769_v60, 16  ;;  %v7823_v13 = vor.u32 %v8650_v52, %v7822_v40  ;;  %v1814_v51 = vld [vmem:[%s9118_s26 + $0x5c] sm:$0x1]  ;;  %v771_v40 = vld [vmem:[%s9118_s26 + $0x64] sm:$0xf] }
  0xec   : > { %v8727_v52 = vld [vmem:[%s11170_s1 + $0x1e0] sm:$0xff] }
  0xed   : > { %v1477_v3 = vpack.c.b16 %v1437_v41, %v1436_v37  ;;  %v1015_v41 = vrot.slane %v1013_v12, 5  ;;  %6162 = vmatpush.bf16.msra.mxu3 %v8727_v52  ;;  %v1031_v12 = vshrl.u32 %v771_v40, 16 }
  0xee   : > { %v9540_v15 = vpop.f32.mrf.mxu2 }
  0xef   : > { %v9544_v22 = vpop.f32.mrf.mxu3 }
  0xf0   : > { %11187 = vst [vmem:[#allocation9_spill] sm:$0xff] %v9544_v22  ;;  %v580_v31 = vpop.f32.mrf.mxu1 }
  0xf2   : > { %v550_v42 = vpop.f32.mrf.mxu0 }
  0xf3   : > { %1604 = vmatmul.bf16.gmra.mxu1 %v1476_v25  ;;  %2329 = vmatmul.bf16.gmra.mxu2 %v2201_v28  ;;  %v1975_v25 = vsel %vm9279_vm5, %v7669_v29, %v1974_v59  ;;  %v3280_v28 = vsel %vm9274_vm4, %v3275_v1, %v3279_v2  ;;  %v2161_v42 = vunpack.c.l.b16 %v1971_v16  ;;  %v1813_v29 = vld [vmem:[%s9118_s26 + $0x58] sm:$0xf]  ;;  %v3307_v2 = vrot.slane %v3305_v36, 4 }
  0xf4   : > { %2860 = vmatmul.bf16.gmra.mxu3 %v8649_v33  ;;  %v3295_v33 = vshrl.u32 %v7941_v21, 16  ;;  %v2162_v46 = vunpack.c.l.b16 %v1975_v25  ;;  %v3734_v58 = vunpack.c.l.b16 %v3280_v28  ;;  %v1977_v25 = vrot.slane %v1813_v29, 5  ;;  %v7944_v29 = vld [vmem:[%s9118_s26 + $0x70] sm:$0xf] }
  0xf5   : > { %3902 = vmatmul.bf16.gmra.mxu0 %v3774_v34  ;;  %v3301_v34 = vshll.u32 %v7942_v9, 16  ;;  %v1000_v9 = vor.u32 %v999_v20, %v9553_v61 }
  0xf6   : > { %v610_v54 = vpop.f32.mrf.mxu2  ;;  %v3297_v1 = vrot.slane %v3295_v33, 4  ;;  %v2202_v24 = vpack.c.b16 %v2162_v46, %v2161_v42  ;;  %v3775_v17 = vpack.c.b16 %v3735_v0, %v3734_v58  ;;  %v1976_v42 = vrot.slane %v1974_v59, 4  ;;  %v770_v46 = vld [vmem:[%s9118_s26 + $0x60] sm:$0xf] }
  0xf7   : > { %v640_v11 = vpop.f32.mrf.mxu3  ;;  %v9585_v21 = vrot.slane %v3301_v34, 5  ;;  %v7943_v54 = vld [vmem:[%s9118_s26 + $0x6c] sm:$0x1]  ;;  %v1001_v61 = vrot.slane %v1000_v9, 4  ;;  %v1979_v20 = vrot.slane %v1977_v25, 4 }
  0xf8   : > { %v9568_v19 = vpop.f32.mrf.mxu1  ;;  %v1010_v11 = vor.u32 %v1009_v50, %v9579_v49  ;;  %v3298_v33 = vor.u32 %v3297_v1, %v9557_v4  ;;  %v3311_v36 = vshll.u32 %v7943_v54, 16  ;;  %v1980_v50 = vrot.slane %v1814_v51, 5  ;;  %v8719_v4 = vld [vmem:[%s11170_s1 + $0x1a0] sm:$0xff] }
  0xf9   : > { %v3308_v34 = vor.u32 %v3307_v2, %v9585_v21  ;;  %v1018_v1 = vshrl.u32 %v770_v46, 16  ;;  %v1021_v2 = vshll.u32 %v770_v46, 16  ;;  %5120 = vmatpush.bf16.msra.mxu2 %v8719_v4  ;;  %v1978_v51 = vsel %vm9279_vm5, %v1976_v42, %v1977_v25  ;;  %v8735_v25 = vld [vmem:[%s11170_s1 + $0x220] sm:$0xff] }
  0xfa   : > { %v9574_v31 = vpop.f32.mrf.mxu0  ;;  %v1011_v37 = vrot.slane %v1010_v11, 4  ;;  %v3299_v58 = vrot.slane %v3298_v33, 4  ;;  %v3313_v60 = vrot.slane %v3311_v36, 5  ;;  %v1027_v11 = vshll.u32 %v771_v40, 16  ;;  %6884 = vmatpush.bf16.msra.mxu0 %v8735_v25 }
  0xfb   : > { %v3309_v0 = vrot.slane %v3308_v34, 4  ;;  %v1981_v33 = vsel %vm9279_vm5, %v1979_v20, %v1980_v50  ;;  %v3316_v34 = vshrl.u32 %v7944_v29, 16  ;;  %v3319_v36 = vshll.u32 %v7944_v29, 16  ;;  %v772_v29 = vld [vmem:[%s9118_s26 + $0x68] sm:$0xf] }
  0xfc   : > { %v1016_v9 = vsel %vm9274_vm4, %v1011_v37, %v1015_v41  ;;  %v1020_v50 = vrot.slane %v1018_v1, 4  ;;  %v1023_v40 = vrot.slane %v1021_v2, 5  ;;  %v2163_v4 = vunpack.c.l.b16 %v1978_v51 }
  0xfd   : > { %v1439_v20 = vunpack.c.l.b16 %v1016_v9  ;;  %v2164_v52 = vunpack.c.l.b16 %v1981_v33  ;;  %v7946_v9 = vld [vmem:[%s9118_s26 + $0x78] sm:$0xf]  ;;  %v1037_v25 = vshll.u32 %v772_v29, 16 }
  0xfe   : > { %v9587_v62 = vpop.f32.mrf.mxu2  ;;  %v1024_v2 = vor.u32 %v1023_v40, %v1020_v50  ;;  %v3335_v50 = vshll.u32 %v7946_v9, 16 }
  0xff   : > { %v9590_v7 = vpop.f32.mrf.mxu3 }
 0x100   : > { %11188 = vst [vmem:[#allocation10_spill] sm:$0xff] %v9590_v7  ;;  %v9594_v16 = vpop.f32.mrf.mxu1  ;;  %v1025_v40 = vrot.slane %v1024_v2, 4 }
 0x102   : > { %v9596_v28 = vpop.f32.mrf.mxu0 }
 0x103   : > { %1609 = vmatmul.bf16.gmra.mxu1 %v1477_v3  ;;  %2334 = vmatmul.bf16.gmra.mxu2 %v2202_v24  ;;  %v7945_v3 = vld [vmem:[%s9118_s26 + $0x74] sm:$0xf]  ;;  %v1006_v24 = vsel %vm9274_vm4, %v1001_v61, %v9579_v49  ;;  %v3304_v49 = vsel %vm9274_vm4, %v3299_v58, %v9585_v21  ;;  %v3314_v61 = vsel %vm9274_vm4, %v3309_v0, %v3313_v60  ;;  %v9635_v21 = vrot.slane %v1027_v11, 5 }
 0x104   : > { %2865 = vmatmul.bf16.gmra.mxu3 %v7823_v13  ;;  %v8687_v13 = vld [vmem:[%s11170_s1 + $0x160] sm:$0xff]  ;;  %v3325_v37 = vshll.u32 %v7945_v3, 16  ;;  %v3329_v41 = vshrl.u32 %v7945_v3, 16  ;;  %v1438_v42 = vunpack.c.l.b16 %v1006_v24  ;;  %v1033_v58 = vrot.slane %v1031_v12, 4 }
 0x105   : > { %3907 = vmatmul.bf16.gmra.mxu0 %v3775_v17  ;;  %4589 = vmatpush.bf16.msra.mxu1 %v8687_v13  ;;  %v3736_v0 = vunpack.c.l.b16 %v3304_v49  ;;  %v3737_v60 = vunpack.c.l.b16 %v3314_v61  ;;  %v3318_v3 = vrot.slane %v3316_v34, 4  ;;  %v3321_v13 = vrot.slane %v3319_v36, 5  ;;  %v8651_v61 = vld [vmem:[%s9118_s26 + $0x64] sm:$0xff] }
 0x106   : > { %v9610_v59 = vpop.f32.mrf.mxu2  ;;  %v3331_v24 = vrot.slane %v3329_v41, 4  ;;  %v1478_v33 = vpack.c.b16 %v1439_v20, %v1438_v42  ;;  %v2203_v11 = vpack.c.b16 %v2164_v52, %v2163_v4  ;;  %v1034_v12 = vor.u32 %v1033_v58, %v9635_v21  ;;  %v9646_v41 = vld [vmem:[%s9118_s26 + $0x68] sm:$0xf] }
 0x107   : > { %v9613_v54 = vpop.f32.mrf.mxu3  ;;  %v3322_v34 = vor.u32 %v3321_v13, %v3318_v3  ;;  %v9648_v20 = vrot.slane %v1037_v25, 5  ;;  %v11173_v58 = vrot.slane %v9646_v41, 5  ;;  %v1030_v2 = vsel %vm9274_vm4, %v1025_v40, %v9635_v21 }
 0x108   : > { %11189 = vst [vmem:[#allocation11_spill] sm:$0xff] %v9613_v54  ;;  %v587_v17 = vpop.f32.mrf.mxu1  ;;  %v3776_v54 = vpack.c.b16 %v3737_v60, %v3736_v0  ;;  %v1035_v42 = vrot.slane %v1034_v12, 4  ;;  %v774_v60 = vld [vmem:[%s9118_s26 + $0x70] sm:$0xf] }
 0x109   : > { %v1816_v17 = vld [vmem:[%s9118_s26 + $0x64] sm:$0xf]  ;;  %v3323_v0 = vrot.slane %v3322_v34, 4  ;;  %v1052_v25 = vshrl.u32 %v774_v60, 16  ;;  %v3339_v34 = vshrl.u32 %v7946_v9, 16 }
 0x10a   : > { %v557_v46 = vpop.f32.mrf.mxu0  ;;  %v1984_v7 = vrot.slane %v1816_v17, 5  ;;  %v9653_v17 = vrot.slane %v3335_v50, 5  ;;  %v1040_v12 = vsel %vm9274_vm4, %v1035_v42, %v9648_v20 }
 0x10b   : > { %v3327_v46 = vrot.slane %v3325_v37, 5  ;;  %v1815_v37 = vld [vmem:[%s9118_s26 + $0x60] sm:$0xe] }
 0x10c   : > { %v7670_v4 = vrot.slane %v1815_v37, 9  ;;  %v1986_v52 = vrot.slane %v1984_v7, 4 }
 0x10e   : > { %v617_v1 = vpop.f32.mrf.mxu2  ;;  %v1988_v21 = vsel %vm9279_vm5, %v1986_v52, %v11173_v58  ;;  %v773_v52 = vld [vmem:[%s9118_s26 + $0x6c] sm:$0x1]  ;;  %v1054_v58 = vrot.slane %v1052_v25, 4  ;;  %v9679_v25 = vld [vmem:[%s9118_s26 + $0x84] sm:$0xf] }
 0x10f   : > { %v647_v51 = vpop.f32.mrf.mxu3  ;;  %v3332_v1 = vor.u32 %v3331_v24, %v3327_v46 }
 0x110   : > { %v1575_v49 = vpop.f32.mrf.mxu1  ;;  %v1041_v51 = vshrl.u32 %v772_v29, 16  ;;  %v3328_v29 = vsel %vm9274_vm4, %v3323_v0, %v3327_v46 }
 0x111   : > { %v1695_v3 = vadd.f32 %v1575_v49, %v9373_v32  ;;  %v3333_v13 = vrot.slane %v3332_v1, 4  ;;  %v1985_v49 = vsel %vm9279_vm5, %v7670_v4, %v1984_v7  ;;  %v1441_v7 = vunpack.c.l.b16 %v1040_v12 }
 0x112   : > { %v9642_v36 = vpop.f32.mrf.mxu0  ;;  %v1043_v4 = vrot.slane %v1041_v51, 4  ;;  %v3738_v9 = vunpack.c.l.b16 %v3328_v29 }
 0x113   : > { %1614 = vmatmul.bf16.gmra.mxu1 %v1478_v33  ;;  %2339 = vmatmul.bf16.gmra.mxu2 %v2203_v11  ;;  %v7948_v33 = vld [vmem:[%s9118_s26 + $0x80] sm:$0xf]  ;;  %v3338_v50 = vsel %vm9274_vm4, %v3333_v13, %v9653_v17 }
 0x114   : > { %2870 = vmatmul.bf16.gmra.mxu3 %v8651_v61  ;;  %v1055_v61 = vshll.u32 %v774_v60, 16  ;;  %v3350_v40 = vshrl.u32 %v7948_v33, 16  ;;  %v3353_v42 = vshll.u32 %v7948_v33, 16  ;;  %v1440_v60 = vunpack.c.l.b16 %v1030_v2 }
 0x115   : > { %3912 = vmatmul.bf16.gmra.mxu0 %v3776_v54  ;;  %v3739_v0 = vunpack.c.l.b16 %v3338_v50  ;;  %v1044_v51 = vor.u32 %v1043_v4, %v9648_v20  ;;  %v9686_v4 = vld [vmem:[%s9118_s26 + $0x74] sm:$0xf] }
 0x116   : > { %v2300_v24 = vpop.f32.mrf.mxu2  ;;  %v1057_v46 = vrot.slane %v1055_v61, 5  ;;  %v3352_v13 = vrot.slane %v3350_v40, 4  ;;  %v3355_v33 = vrot.slane %v3353_v42, 5  ;;  %v1479_v12 = vpack.c.b16 %v1441_v7, %v1440_v60  ;;  %v1818_v40 = vld [vmem:[%s9118_s26 + $0x6c] sm:$0x1] }
 0x117   : > { %v2420_v11 = vadd.f32 %v2300_v24, %v1695_v3  ;;  %v2831_v54 = vpop.f32.mrf.mxu3  ;;  %v2165_v3 = vunpack.c.l.b16 %v1985_v49  ;;  %v2166_v24 = vunpack.c.l.b16 %v1988_v21  ;;  %v1047_v49 = vshll.u32 %v773_v52, 16  ;;  %v7947_v21 = vld [vmem:[%s9118_s26 + $0x7c] sm:$0x1]  ;;  %v1819_v7 = vld [vmem:[%s9118_s26 + $0x70] sm:$0xe] }
 0x118   : > { %v1577_v32 = vpop.f32.mrf.mxu1  ;;  %v3345_v52 = vshll.u32 %v7947_v21, 16  ;;  %v3356_v38 = vor.u32 %v3355_v33, %v3352_v13  ;;  %v7671_v13 = vrot.slane %v1819_v7, 9  ;;  %v1994_v33 = vrot.slane %v9686_v4, 5 }
 0x119   : > { %v2951_v37 = vadd.f32 %v2831_v54, %v2420_v11  ;;  %v775_v11 = vld [vmem:[%s9118_s26 + $0x74] sm:$0xf]  ;;  %v3341_v54 = vrot.slane %v3339_v34, 4  ;;  %v1696_v22 = vadd.f32 %v1577_v32, %v9398_v63  ;;  %v2204_v50 = vpack.c.b16 %v2166_v24, %v2165_v3 }
 0x11a   : > { %v3875_v1 = vpop.f32.mrf.mxu0  ;;  %v1058_v34 = vor.u32 %v1057_v46, %v1054_v58  ;;  %v1061_v26 = vshll.u32 %v775_v11, 16  ;;  %v8652_v63 = vld [vmem:[%s9118_s26 + $0x70] sm:$0xff]  ;;  %v3777_v32 = vpack.c.b16 %v3739_v0, %v3738_v9  ;;  %v1049_v3 = vrot.slane %v1047_v49, 5  ;;  %v776_v0 = vld [vmem:[%s9118_s26 + $0x78] sm:$0xf] }
 0x11b   : > { %v3342_v42 = vor.u32 %v3341_v54, %v9653_v17  ;;  %v9690_v58 = vadd.f32 %v9642_v36, %v2951_v37  ;;  %v11190_v17 = vrot.slane %v9646_v41, 5  ;;  %v1990_v9 = vrot.slane %v1818_v40, 5 }
 0x11c   : > { %v1063_v24 = vrot.slane %v1061_v26, 5  ;;  %v1065_v54 = vshrl.u32 %v775_v11, 16  ;;  %v3347_v37 = vrot.slane %v3345_v52, 5  ;;  %v1071_v21 = vshll.u32 %v776_v0, 16 }
 0x11d   : > { %v1989_v46 = vrot.slane %v11190_v17, 4  ;;  %v3343_v36 = vrot.slane %v3342_v42, 4  ;;  %v1075_v41 = vshrl.u32 %v776_v0, 16  ;;  %v1821_v0 = vld [vmem:[%s9118_s26 + $0x78] sm:$0xf] }
 0x11e   : > { %v2302_v2 = vpop.f32.mrf.mxu2  ;;  %v9715_v4 = vrot.slane %v1071_v21, 5 }
 0x11f   : > { %v2421_v61 = vadd.f32 %v2302_v2, %v1696_v22  ;;  %v2833_v29 = vpop.f32.mrf.mxu3  ;;  %v3359_v22 = vshll.u32 %v9679_v25, 16  ;;  %v1045_v2 = vrot.slane %v1044_v51, 4  ;;  %v3348_v42 = vsel %vm9274_vm4, %v3343_v36, %v3347_v37  ;;  %v7834_v36 = vld [vmem:[%s9118_s26 + $0x78] sm:$0xf]  ;;  %v8653_v37 = vld [vmem:[%s9118_s26 + $0x7c] sm:$0xf0] }
 0x120   : > { %v1580_v14 = vpop.f32.mrf.mxu1  ;;  %v1077_v52 = vrot.slane %v1075_v41, 4  ;;  %v3740_v17 = vunpack.c.l.b16 %v3348_v42 }
 0x121   : > { %v2952_v60 = vadd.f32 %v2833_v29, %v2421_v61  ;;  %v1059_v14 = vrot.slane %v1058_v34, 4  ;;  %v9698_v49 = vrot.slane %v3359_v22, 5  ;;  %v7950_v61 = vld [vmem:[%s9118_s26 + $0x88] sm:$0xf] }
 0x122   : > { %v3878_v20 = vpop.f32.mrf.mxu0  ;;  %v3373_v7 = vshrl.u32 %v7950_v61, 16  ;;  %v1078_v41 = vor.u32 %v1077_v52, %v9715_v4 }
 0x123   : > { %1619 = vmatmul.bf16.gmra.mxu1 %v1479_v12  ;;  %2344 = vmatmul.bf16.gmra.mxu2 %v2204_v50  ;;  %v9696_v51 = vadd.f32 %v3875_v1, %v2952_v60  ;;  %v3357_v12 = vrot.slane %v3356_v38, 4  ;;  %v1050_v50 = vsel %vm9274_vm4, %v1045_v2, %v1049_v3  ;;  %v1064_v11 = vsel %vm9274_vm4, %v1059_v14, %v1063_v24  ;;  %v777_v14 = vld [vmem:[%s9118_s26 + $0x7c] sm:$0x1] }
 0x124   : > { %2875 = vmatmul.bf16.gmra.mxu3 %v8652_v63  ;;  %v1991_v1 = vsel %vm9279_vm5, %v1989_v46, %v1990_v9  ;;  %v1995_v38 = vsel %vm9279_vm5, %v7671_v13, %v1994_v33  ;;  %v3363_v63 = vshrl.u32 %v9679_v25, 16  ;;  %v3369_v20 = vshll.u32 %v7950_v61, 16 }
 0x125   : > { %3917 = vmatmul.bf16.gmra.mxu0 %v3777_v32  ;;  %v1067_v32 = vrot.slane %v1065_v54, 4  ;;  %v3362_v60 = vsel %vm9274_vm4, %v3357_v12, %v9698_v49  ;;  %v1442_v22 = vunpack.c.l.b16 %v1050_v50  ;;  %v1443_v2 = vunpack.c.l.b16 %v1064_v11 }
 0x126   : > { %v2305_v26 = vpop.f32.mrf.mxu2  ;;  %v2167_v25 = vunpack.c.l.b16 %v1991_v1  ;;  %v2168_v3 = vunpack.c.l.b16 %v1995_v38  ;;  %v3741_v46 = vunpack.c.l.b16 %v3362_v60  ;;  %v3365_v54 = vrot.slane %v3363_v63, 4 }
 0x127   : > { %v2836_v29 = vpop.f32.mrf.mxu3  ;;  %v1068_v9 = vor.u32 %v1067_v32, %v1063_v24  ;;  %v9722_v12 = vrot.slane %v3369_v20, 5  ;;  %v3375_v26 = vrot.slane %v3373_v7, 4  ;;  %v1081_v61 = vshll.u32 %v777_v14, 16  ;;  %v1822_v7 = vld [vmem:[%s9118_s26 + $0x7c] sm:$0x1] }
 0x128   : > { %v1582_v34 = vpop.f32.mrf.mxu1  ;;  %v7951_v29 = vld [vmem:[%s9118_s26 + $0x8c] sm:$0x1]  ;;  %v1480_v1 = vpack.c.b16 %v1443_v2, %v1442_v22  ;;  %v2205_v38 = vpack.c.b16 %v2168_v3, %v2167_v25  ;;  %v1997_v24 = vrot.slane %v1821_v0, 5  ;;  %v7835_v63 = vor.u32 %v8653_v37, %v7834_v36  ;;  %v778_v25 = vld [vmem:[%s9118_s26 + $0x80] sm:$0xf]  ;;  %v8726_v0 = vld [vmem:[%s11170_s1 + $0x1d8] sm:$0xff] }
 0x129   : > { %v1698_v13 = vadd.f32 %v1582_v34, %v9435_v10  ;;  %v3778_v10 = vpack.c.b16 %v3741_v46, %v3740_v17  ;;  %v1069_v34 = vrot.slane %v1068_v9, 4  ;;  %v3366_v42 = vor.u32 %v3365_v54, %v9698_v49  ;;  %v779_v9 = vld [vmem:[%s9118_s26 + $0x84] sm:$0xf]  ;;  %v7952_v37 = vld [vmem:[%s9118_s26 + $0x90] sm:$0xf]  ;;  %6163 = vmatpush.bf16.msra.mxu3 %v8726_v0 }
 0x12a   : > { %v3880_v40 = vpop.f32.mrf.mxu0  ;;  %v3376_v52 = vor.u32 %v3375_v26, %v9722_v12  ;;  %v3379_v14 = vshll.u32 %v7951_v29, 16  ;;  %v1996_v22 = vrot.slane %v1994_v33, 4  ;;  %v1999_v2 = vrot.slane %v1997_v24, 4  ;;  %v8718_v33 = vld [vmem:[%s11170_s1 + $0x198] sm:$0xff] }
 0x12b   : > { %v1074_v49 = vsel %vm9274_vm4, %v1069_v34, %v9715_v4  ;;  %v2000_v17 = vrot.slane %v1822_v7, 5  ;;  %v3367_v46 = vrot.slane %v3366_v42, 4  ;;  %v1089_v29 = vshll.u32 %v778_v25, 16  ;;  %5121 = vmatpush.bf16.msra.mxu2 %v8718_v33 }
 0x12c   : > { %v3377_v54 = vrot.slane %v3376_v52, 4  ;;  %v3381_v36 = vrot.slane %v3379_v14, 5  ;;  %v3384_v42 = vshrl.u32 %v7952_v37, 16 }
 0x12d   : > { %v2001_v34 = vsel %vm9279_vm5, %v1999_v2, %v2000_v17 }
 0x12e   : > { %v2307_v21 = vpop.f32.mrf.mxu2  ;;  %v3382_v14 = vsel %vm9274_vm4, %v3377_v54, %v3381_v36  ;;  %v2170_v17 = vunpack.c.l.b16 %v2001_v34  ;;  %v3386_v54 = vrot.slane %v3384_v42, 4  ;;  %v8654_v34 = vld [vmem:[%s9118_s26 + $0x84] sm:$0xff] }
 0x12f   : > { %v2423_v50 = vadd.f32 %v2307_v21, %v1698_v13  ;;  %v2838_v11 = vpop.f32.mrf.mxu3  ;;  %v1079_v13 = vrot.slane %v1078_v41, 4  ;;  %v1083_v21 = vrot.slane %v1081_v61, 5  ;;  %v1998_v41 = vsel %vm9279_vm5, %v1996_v22, %v1997_v24  ;;  %v8734_v22 = vld [vmem:[%s11170_s1 + $0x218] sm:$0xff] }
 0x130   : > { %v1585_v32 = vpop.f32.mrf.mxu1  ;;  %v1086_v61 = vshrl.u32 %v778_v25, 16  ;;  %v3372_v24 = vsel %vm9274_vm4, %v3367_v46, %v9722_v12  ;;  %v2169_v25 = vunpack.c.l.b16 %v1998_v41  ;;  %v1091_v12 = vrot.slane %v1089_v29, 5  ;;  %6885 = vmatpush.bf16.msra.mxu0 %v8734_v22 }
 0x131   : > { %v2954_v60 = vadd.f32 %v2838_v11, %v2423_v50  ;;  %v1084_v4 = vsel %vm9274_vm4, %v1079_v13, %v1083_v21  ;;  %v7953_v50 = vld [vmem:[%s9118_s26 + $0x94] sm:$0xf]  ;;  %v3742_v46 = vunpack.c.l.b16 %v3372_v24  ;;  %v3743_v0 = vunpack.c.l.b16 %v3382_v14 }
 0x132   : > { %v9727_v20 = vpop.f32.mrf.mxu0  ;;  %v3393_v13 = vshll.u32 %v7953_v50, 16  ;;  %v3397_v21 = vshrl.u32 %v7953_v50, 16  ;;  %v1445_v2 = vunpack.c.l.b16 %v1084_v4  ;;  %v9772_v50 = vld [vmem:[%s9118_s26 + $0x98] sm:$0xf] }
 0x133   : > { %1624 = vmatmul.bf16.gmra.mxu1 %v1480_v1  ;;  %2349 = vmatmul.bf16.gmra.mxu2 %v2205_v38  ;;  %v9732_v3 = vadd.f32 %v3880_v40, %v2954_v60  ;;  %v1699_v40 = vadd.f32 %v1585_v32, %v9457_v47  ;;  %v1444_v38 = vunpack.c.l.b16 %v1074_v49  ;;  %v1099_v47 = vshrl.u32 %v779_v9, 16  ;;  %v8686_v32 = vld [vmem:[%s11170_s1 + $0x158] sm:$0xff] }
 0x134   : > { %2880 = vmatmul.bf16.gmra.mxu3 %v7835_v63  ;;  %v1095_v63 = vshll.u32 %v779_v9, 16  ;;  %v3387_v60 = vshll.u32 %v7952_v37, 16  ;;  %4590 = vmatpush.bf16.msra.mxu1 %v8686_v32  ;;  %v1088_v49 = vrot.slane %v1086_v61, 4  ;;  %v3395_v4 = vrot.slane %v3393_v13, 5 }
 0x135   : > { %3922 = vmatmul.bf16.gmra.mxu0 %v3778_v10  ;;  %v1101_v33 = vrot.slane %v1099_v47, 4  ;;  %v3399_v41 = vrot.slane %v3397_v21, 4  ;;  %v3779_v24 = vpack.c.b16 %v3743_v0, %v3742_v46  ;;  %v3403_v13 = vshll.u32 %v9772_v50, 16 }
 0x136   : > { %v2310_v26 = vpop.f32.mrf.mxu2  ;;  %v9764_v9 = vrot.slane %v1095_v63, 5  ;;  %v3389_v36 = vrot.slane %v3387_v60, 5  ;;  %v1092_v29 = vor.u32 %v1091_v12, %v1088_v49  ;;  %v2206_v63 = vpack.c.b16 %v2170_v17, %v2169_v25  ;;  %v782_v17 = vld [vmem:[%s9118_s26 + $0x90] sm:$0xf] }
 0x137   : > { %v2424_v11 = vadd.f32 %v2310_v26, %v1699_v40  ;;  %v2841_v1 = vpop.f32.mrf.mxu3  ;;  %v780_v40 = vld [vmem:[%s9118_s26 + $0x88] sm:$0xf]  ;;  %v1824_v26 = vld [vmem:[%s9118_s26 + $0x84] sm:$0xf]  ;;  %v3400_v14 = vor.u32 %v3399_v41, %v3395_v4  ;;  %v9788_v0 = vrot.slane %v3403_v13, 5 }
 0x138   : > { %v1587_v10 = vpop.f32.mrf.mxu1  ;;  %v1102_v47 = vor.u32 %v1101_v33, %v9764_v9  ;;  %v1105_v32 = vshll.u32 %v780_v40, 16  ;;  %v3390_v42 = vor.u32 %v3389_v36, %v3386_v54  ;;  %v1093_v21 = vrot.slane %v1092_v29, 4  ;;  %v7956_v41 = vld [vmem:[%s9118_s26 + $0xa0] sm:$0xf] }
 0x139   : > { %v2955_v7 = vadd.f32 %v2841_v1, %v2424_v11  ;;  %v1481_v1 = vpack.c.b16 %v1445_v2, %v1444_v38  ;;  %v3401_v33 = vrot.slane %v3400_v14, 4 }
 0x13a   : > { %v3885_v52 = vpop.f32.mrf.mxu0  ;;  %v1103_v38 = vrot.slane %v1102_v47, 4  ;;  %v9783_v22 = vrot.slane %v1105_v32, 5  ;;  %v3391_v12 = vrot.slane %v3390_v42, 4  ;;  %v1098_v36 = vsel %vm9274_vm4, %v1093_v21, %v9764_v9 }
 0x13b   : > { %v9768_v37 = vadd.f32 %v9727_v20, %v2955_v7  ;;  %v2004_v20 = vrot.slane %v1824_v26, 5  ;;  %v1823_v7 = vld [vmem:[%s9118_s26 + $0x80] sm:$0xe]  ;;  %v9780_v52 = vld [vmem:[%s9118_s26 + $0x88] sm:$0xf]  ;;  %v1109_v26 = vshrl.u32 %v780_v40, 16 }
 0x13c   : > { %v7672_v2 = vrot.slane %v1823_v7, 9  ;;  %v11174_v49 = vrot.slane %v9780_v52, 5  ;;  %v3396_v40 = vsel %vm9274_vm4, %v3391_v12, %v3395_v4  ;;  %v3407_v32 = vshrl.u32 %v9772_v50, 16 }
 0x13d   : > { %11191 = vst [vmem:[#allocation12_spill] sm:$0xff] %v9768_v37  ;;  %v2006_v25 = vrot.slane %v2004_v20, 4  ;;  %v3418_v42 = vshrl.u32 %v7956_v41, 16  ;;  %v1446_v7 = vunpack.c.l.b16 %v1098_v36  ;;  %v1111_v13 = vrot.slane %v1109_v26, 4  ;;  %v9821_v37 = vld [vmem:[%s9118_s26 + $0x94] sm:$0xf] }
 0x13e   : > { %v2312_v61 = vpop.f32.mrf.mxu2  ;;  %v2005_v47 = vsel %vm9279_vm5, %v7672_v2, %v2004_v20  ;;  %v3421_v20 = vshll.u32 %v7956_v41, 16  ;;  %v781_v2 = vld [vmem:[%s9118_s26 + $0x8c] sm:$0x1]  ;;  %v3744_v50 = vunpack.c.l.b16 %v3396_v40 }
 0x13f   : > { %v2843_v11 = vpop.f32.mrf.mxu3  ;;  %v2008_v9 = vsel %vm9279_vm5, %v2006_v25, %v11174_v49  ;;  %v2171_v21 = vunpack.c.l.b16 %v2005_v47  ;;  %v1112_v26 = vor.u32 %v1111_v13, %v9783_v22  ;;  %v1826_v49 = vld [vmem:[%s9118_s26 + $0x8c] sm:$0x1] }
 0x140   : > { %v1590_v10 = vpop.f32.mrf.mxu1  ;;  %v1108_v11 = vsel %vm9274_vm4, %v1103_v38, %v9783_v22  ;;  %v2172_v38 = vunpack.c.l.b16 %v2008_v9  ;;  %v3423_v41 = vrot.slane %v3421_v20, 5 }
 0x141   : > { %v1701_v46 = vadd.f32 %v1590_v10, %v9502_v8  ;;  %v1447_v14 = vunpack.c.l.b16 %v1108_v11  ;;  %v1115_v11 = vshll.u32 %v781_v2, 16 }
 0x142   : > { %v9776_v60 = vpop.f32.mrf.mxu0  ;;  %v2207_v9 = vpack.c.b16 %v2172_v38, %v2171_v21 }
 0x143   : > { %1629 = vmatmul.bf16.gmra.mxu1 %v1481_v1  ;;  %2354 = vmatmul.bf16.gmra.mxu2 %v2206_v63  ;;  %v1120_v1 = vshrl.u32 %v782_v17, 16  ;;  %v1123_v63 = vshll.u32 %v782_v17, 16  ;;  %v783_v17 = vld [vmem:[%s9118_s26 + $0x94] sm:$0xf]  ;;  %v1117_v21 = vrot.slane %v1115_v11, 5 }
 0x144   : > { %2885 = vmatmul.bf16.gmra.mxu3 %v8654_v34 }
 0x145   : > { %3927 = vmatmul.bf16.gmra.mxu0 %v3779_v24  ;;  %v3406_v24 = vsel %vm9274_vm4, %v3401_v33, %v9788_v0  ;;  %v1122_v4 = vrot.slane %v1120_v1, 4  ;;  %v1125_v25 = vrot.slane %v1123_v63, 5  ;;  %v3420_v33 = vrot.slane %v3418_v42, 4  ;;  %v9815_v1 = vld [vmem:[%s9118_s26 + $0xa4] sm:$0xf] }
 0x146   : > { %v2315_v54 = vpop.f32.mrf.mxu2  ;;  %v3745_v12 = vunpack.c.l.b16 %v3406_v24  ;;  %v8655_v24 = vld [vmem:[%s9118_s26 + $0x90] sm:$0xff]  ;;  %v3427_v2 = vshll.u32 %v9815_v1, 16 }
 0x147   : > { %v2426_v61 = vadd.f32 %v2315_v54, %v1701_v46  ;;  %v2846_v29 = vpop.f32.mrf.mxu3  ;;  %v7955_v54 = vld [vmem:[%s9118_s26 + $0x9c] sm:$0x1]  ;;  %v1126_v40 = vor.u32 %v1125_v25, %v1122_v4  ;;  %v3424_v13 = vor.u32 %v3423_v41, %v3420_v33  ;;  %v2014_v33 = vrot.slane %v9821_v37, 5 }
 0x148   : > { %v1592_v8 = vpop.f32.mrf.mxu1  ;;  %v3413_v42 = vshll.u32 %v7955_v54, 16  ;;  %v2010_v54 = vrot.slane %v1826_v49, 5 }
 0x149   : > { %v2957_v10 = vadd.f32 %v2846_v29, %v2426_v61  ;;  %v1702_v46 = vadd.f32 %v1592_v8, %v9528_v45  ;;  %v3409_v61 = vrot.slane %v3407_v32, 4  ;;  %v1482_v29 = vpack.c.b16 %v1447_v14, %v1446_v7  ;;  %v1827_v14 = vld [vmem:[%s9118_s26 + $0x90] sm:$0xe] }
 0x14a   : > { %v3890_v34 = vpop.f32.mrf.mxu0  ;;  %v1129_v45 = vshll.u32 %v783_v17, 16  ;;  %v3780_v32 = vpack.c.b16 %v3745_v12, %v3744_v50  ;;  %v1127_v4 = vrot.slane %v1126_v40, 4  ;;  %v11192_v50 = vrot.slane %v9780_v52, 5 }
 0x14b   : > { %v3410_v22 = vor.u32 %v3409_v61, %v9788_v0  ;;  %v9826_v38 = vadd.f32 %v9776_v60, %v2957_v10  ;;  %v1133_v0 = vshrl.u32 %v783_v17, 16  ;;  %v7673_v61 = vrot.slane %v1827_v14, 9 }
 0x14c   : > { %v1131_v25 = vrot.slane %v1129_v45, 5  ;;  %v2009_v12 = vrot.slane %v11192_v50, 4  ;;  %v3415_v10 = vrot.slane %v3413_v42, 5  ;;  %v3431_v45 = vshrl.u32 %v9815_v1, 16 }
 0x14d   : > { %v3411_v60 = vrot.slane %v3410_v22, 4 }
 0x14e   : > { %v2317_v36 = vpop.f32.mrf.mxu2  ;;  %v1132_v17 = vsel %vm9274_vm4, %v1127_v4, %v1131_v25  ;;  %v2011_v37 = vsel %vm9279_vm5, %v2009_v12, %v2010_v54  ;;  %v1829_v54 = vld [vmem:[%s9118_s26 + $0x98] sm:$0xf] }
 0x14f   : > { %v2427_v63 = vadd.f32 %v2317_v36, %v1702_v46  ;;  %v2848_v47 = vpop.f32.mrf.mxu3  ;;  %v1113_v46 = vrot.slane %v1112_v26, 4  ;;  %v784_v36 = vld [vmem:[%s9118_s26 + $0x98] sm:$0xf]  ;;  %v9834_v26 = vrot.slane %v3427_v2, 5  ;;  %v1449_v2 = vunpack.c.l.b16 %v1132_v17 }
 0x150   : > { %v1595_v8 = vpop.f32.mrf.mxu1  ;;  %v1143_v52 = vshrl.u32 %v784_v36, 16  ;;  %v2173_v1 = vunpack.c.l.b16 %v2011_v37 }
 0x151   : > { %v2958_v20 = vadd.f32 %v2848_v47, %v2427_v63  ;;  %v1139_v63 = vshll.u32 %v784_v36, 16  ;;  %v7958_v47 = vld [vmem:[%s9118_s26 + $0xa8] sm:$0xf]  ;;  %v1118_v49 = vsel %vm9274_vm4, %v1113_v46, %v1117_v21  ;;  %v1135_v8 = vrot.slane %v1133_v0, 4  ;;  %v785_v21 = vld [vmem:[%s9118_s26 + $0x9c] sm:$0x1] }
 0x152   : > { %v3893_v7 = vpop.f32.mrf.mxu0  ;;  %v1145_v22 = vrot.slane %v1143_v52, 4  ;;  %v3433_v36 = vrot.slane %v3431_v45, 4  ;;  %v1149_v52 = vshll.u32 %v785_v21, 16 }
 0x153   : > { %1634 = vmatmul.bf16.gmra.mxu1 %v1482_v29  ;;  %2359 = vmatmul.bf16.gmra.mxu2 %v2207_v9  ;;  %v9832_v41 = vadd.f32 %v3890_v34, %v2958_v20  ;;  %v3425_v29 = vrot.slane %v3424_v13, 4  ;;  %v2015_v34 = vsel %vm9279_vm5, %v7673_v61, %v2014_v33  ;;  %v3437_v20 = vshll.u32 %v7958_v47, 16  ;;  %v7846_v61 = vld [vmem:[%s9118_s26 + $0x98] sm:$0xf] }
 0x154   : > { %2890 = vmatmul.bf16.gmra.mxu3 %v8655_v24  ;;  %v3441_v7 = vshrl.u32 %v7958_v47, 16  ;;  %v9851_v14 = vrot.slane %v1139_v63, 5  ;;  %v1448_v13 = vunpack.c.l.b16 %v1118_v49  ;;  %v2174_v46 = vunpack.c.l.b16 %v2015_v34  ;;  %v7959_v47 = vld [vmem:[%s9118_s26 + $0xac] sm:$0x1] }
 0x155   : > { %3932 = vmatmul.bf16.gmra.mxu0 %v3780_v32  ;;  %v3416_v32 = vsel %vm9274_vm4, %v3411_v60, %v3415_v10  ;;  %v3430_v42 = vsel %vm9274_vm4, %v3425_v29, %v9834_v26  ;;  %v1136_v12 = vor.u32 %v1135_v8, %v1131_v25  ;;  %v8656_v60 = vld [vmem:[%s9118_s26 + $0x9c] sm:$0xf0]  ;;  %v9858_v10 = vrot.slane %v3437_v20, 5  ;;  %v1830_v20 = vld [vmem:[%s9118_s26 + $0x9c] sm:$0x1] }
 0x156   : > { %v2320_v11 = vpop.f32.mrf.mxu2  ;;  %v3746_v4 = vunpack.c.l.b16 %v3416_v32  ;;  %v3747_v50 = vunpack.c.l.b16 %v3430_v42  ;;  %v3443_v29 = vrot.slane %v3441_v7, 4  ;;  %v1146_v63 = vor.u32 %v1145_v22, %v9851_v14 }
 0x157   : > { %v2851_v9 = vpop.f32.mrf.mxu3  ;;  %v1483_v17 = vpack.c.b16 %v1449_v2, %v1448_v13  ;;  %v2208_v37 = vpack.c.b16 %v2174_v46, %v2173_v1  ;;  %v2017_v25 = vrot.slane %v1829_v54, 5  ;;  %v7847_v45 = vor.u32 %v8656_v60, %v7846_v61  ;;  %v786_v1 = vld [vmem:[%s9118_s26 + $0xa0] sm:$0xf]  ;;  %v8725_v54 = vld [vmem:[%s11170_s1 + $0x1d0] sm:$0xff] }
 0x158   : > { %v1597_v40 = vpop.f32.mrf.mxu1  ;;  %v3434_v8 = vor.u32 %v3433_v36, %v9834_v26  ;;  %v3444_v7 = vor.u32 %v3443_v29, %v9858_v10  ;;  %v3447_v22 = vshll.u32 %v7959_v47, 16  ;;  %v1147_v21 = vrot.slane %v1146_v63, 4  ;;  %v7960_v60 = vld [vmem:[%s9118_s26 + $0xb0] sm:$0xf]  ;;  %v7961_v47 = vld [vmem:[%s9118_s26 + $0xb4] sm:$0xf]  ;;  %6164 = vmatpush.bf16.msra.mxu3 %v8725_v54 }
 0x159   : > { %v1704_v0 = vadd.f32 %v1597_v40, %v9574_v31  ;;  %v3781_v31 = vpack.c.b16 %v3747_v50, %v3746_v4  ;;  %v1137_v40 = vrot.slane %v1136_v12, 4  ;;  %v2016_v13 = vrot.slane %v2014_v33, 4  ;;  %v787_v12 = vld [vmem:[%s9118_s26 + $0xa4] sm:$0xf]  ;;  %v8717_v33 = vld [vmem:[%s11170_s1 + $0x190] sm:$0xff] }
 0x15a   : > { %v3895_v24 = vpop.f32.mrf.mxu0  ;;  %v2019_v2 = vrot.slane %v2017_v25, 4  ;;  %v2020_v4 = vrot.slane %v1830_v20, 5  ;;  %v3435_v50 = vrot.slane %v3434_v8, 4  ;;  %v3445_v36 = vrot.slane %v3444_v7, 4  ;;  %5122 = vmatpush.bf16.msra.mxu2 %v8717_v33  ;;  %v788_v54 = vld [vmem:[%s9118_s26 + $0xa8] sm:$0xf] }
 0x15b   : > { %v1142_v26 = vsel %vm9274_vm4, %v1137_v40, %v9851_v14  ;;  %v3449_v61 = vrot.slane %v3447_v22, 5  ;;  %v1154_v63 = vshrl.u32 %v786_v1, 16  ;;  %v3452_v40 = vshrl.u32 %v7960_v60, 16 }
 0x15c   : > { %v3455_v8 = vshll.u32 %v7960_v60, 16  ;;  %v3461_v22 = vshll.u32 %v7961_v47, 16  ;;  %v1832_v60 = vld [vmem:[%s9118_s26 + $0xa4] sm:$0xf] }
 0x15d   : > { %v3450_v7 = vsel %vm9274_vm4, %v3445_v36, %v3449_v61 }
 0x15e   : > { %v2322_v11 = vpop.f32.mrf.mxu2  ;;  %v3749_v33 = vunpack.c.l.b16 %v3450_v7  ;;  %v3457_v36 = vrot.slane %v3455_v8, 5  ;;  %v1831_v8 = vld [vmem:[%s9118_s26 + $0xa0] sm:$0xe] }
 0x15f   : > { %v2429_v9 = vadd.f32 %v2322_v11, %v1704_v0  ;;  %v2853_v49 = vpop.f32.mrf.mxu3  ;;  %v1151_v0 = vrot.slane %v1149_v52, 5  ;;  %v2018_v11 = vsel %vm9279_vm5, %v2016_v13, %v2017_v25  ;;  %v1157_v52 = vshll.u32 %v786_v1, 16 }
 0x160   : > { %v1600_v34 = vpop.f32.mrf.mxu1  ;;  %v3440_v25 = vsel %vm9274_vm4, %v3435_v50, %v9858_v10  ;;  %v1156_v1 = vrot.slane %v1154_v63, 4 }
 0x161   : > { %v2960_v32 = vadd.f32 %v2853_v49, %v2429_v9  ;;  %v1152_v14 = vsel %vm9274_vm4, %v1147_v21, %v1151_v0  ;;  %v3465_v21 = vshrl.u32 %v7961_v47, 16  ;;  %v8733_v0 = vld [vmem:[%s11170_s1 + $0x210] sm:$0xff]  ;;  %v1159_v10 = vrot.slane %v1157_v52, 5  ;;  %v9908_v52 = vld [vmem:[%s9118_s26 + $0xb8] sm:$0xf] }
 0x162   : > { %v9863_v42 = vpop.f32.mrf.mxu0  ;;  %v1451_v13 = vunpack.c.l.b16 %v1152_v14  ;;  %6886 = vmatpush.bf16.msra.mxu0 %v8733_v0  ;;  %v3471_v7 = vshll.u32 %v9908_v52, 16  ;;  %v7674_v0 = vrot.slane %v1831_v8, 9 }
 0x163   : > { %1639 = vmatmul.bf16.gmra.mxu1 %v1483_v17  ;;  %2364 = vmatmul.bf16.gmra.mxu2 %v2208_v37  ;;  %v9868_v46 = vadd.f32 %v3895_v24, %v2960_v32  ;;  %v1705_v24 = vadd.f32 %v1600_v34, %v9596_v28  ;;  %v1450_v17 = vunpack.c.l.b16 %v1142_v26  ;;  %v1163_v37 = vshll.u32 %v787_v12, 16  ;;  %v8685_v34 = vld [vmem:[%s11170_s1 + $0x150] sm:$0xff] }
 0x164   : > { %2895 = vmatmul.bf16.gmra.mxu3 %v7847_v45  ;;  %v1167_v28 = vshrl.u32 %v787_v12, 16  ;;  %4591 = vmatpush.bf16.msra.mxu1 %v8685_v34  ;;  %v3467_v14 = vrot.slane %v3465_v21, 4  ;;  %v1160_v63 = vor.u32 %v1159_v10, %v1156_v1  ;;  %v790_v10 = vld [vmem:[%s9118_s26 + $0xb0] sm:$0xf] }
 0x165   : > { %3937 = vmatmul.bf16.gmra.mxu0 %v3781_v31  ;;  %v2021_v31 = vsel %vm9279_vm5, %v2019_v2, %v2020_v4  ;;  %v2175_v2 = vunpack.c.l.b16 %v2018_v11  ;;  %v3748_v4 = vunpack.c.l.b16 %v3440_v25  ;;  %v9900_v50 = vrot.slane %v1163_v37, 5 }
 0x166   : > { %v2325_v29 = vpop.f32.mrf.mxu2  ;;  %v2176_v26 = vunpack.c.l.b16 %v2021_v31  ;;  %v1169_v12 = vrot.slane %v1167_v28, 4  ;;  %v1173_v28 = vshll.u32 %v788_v54, 16 }
 0x167   : > { %v2430_v9 = vadd.f32 %v2325_v29, %v1705_v24  ;;  %v2856_v49 = vpop.f32.mrf.mxu3  ;;  %v3454_v24 = vrot.slane %v3452_v40, 4  ;;  %v3463_v29 = vrot.slane %v3461_v22, 5  ;;  %v3782_v31 = vpack.c.b16 %v3749_v33, %v3748_v4 }
 0x168   : > { %v1602_v45 = vpop.f32.mrf.mxu1  ;;  %v1170_v37 = vor.u32 %v1169_v12, %v9900_v50  ;;  %v1161_v22 = vrot.slane %v1160_v63, 4  ;;  %v9919_v21 = vrot.slane %v1173_v28, 5  ;;  %v9924_v12 = vrot.slane %v3471_v7, 5 }
 0x169   : > { %v2961_v32 = vadd.f32 %v2856_v49, %v2430_v9  ;;  %v1484_v9 = vpack.c.b16 %v1451_v13, %v1450_v17  ;;  %v2209_v49 = vpack.c.b16 %v2176_v26, %v2175_v2  ;;  %v8657_v45 = vld [vmem:[%s9118_s26 + $0xa4] sm:$0xff]  ;;  %v3458_v25 = vor.u32 %v3457_v36, %v3454_v24 }
 0x16a   : > { %v3900_v20 = vpop.f32.mrf.mxu0  ;;  %v1171_v17 = vrot.slane %v1170_v37, 4  ;;  %v1166_v24 = vsel %vm9274_vm4, %v1161_v22, %v9900_v50  ;;  %v1177_v36 = vshrl.u32 %v788_v54, 16  ;;  %v3475_v37 = vshrl.u32 %v9908_v52, 16 }
 0x16b   : > { %v9904_v61 = vadd.f32 %v9863_v42, %v2961_v32  ;;  %v2024_v42 = vrot.slane %v1832_v60, 5  ;;  %v9916_v32 = vld [vmem:[%s9118_s26 + $0xa8] sm:$0xf]  ;;  %v3468_v20 = vor.u32 %v3467_v14, %v3463_v29  ;;  %v3459_v1 = vrot.slane %v3458_v25, 4  ;;  %v7964_v60 = vld [vmem:[%s9118_s26 + $0xc0] sm:$0xf] }
 0x16c   : > { %v11175_v2 = vrot.slane %v9916_v32, 5  ;;  %v1176_v63 = vsel %vm9274_vm4, %v1171_v17, %v9919_v21  ;;  %v1452_v25 = vunpack.c.l.b16 %v1166_v24  ;;  %v789_v17 = vld [vmem:[%s9118_s26 + $0xac] sm:$0x1] }
 0x16d   : > { %v2026_v13 = vrot.slane %v2024_v42, 4  ;;  %v3469_v4 = vrot.slane %v3468_v20, 4  ;;  %v3464_v54 = vsel %vm9274_vm4, %v3459_v1, %v3463_v29  ;;  %v1453_v8 = vunpack.c.l.b16 %v1176_v63  ;;  %v791_v1 = vld [vmem:[%s9118_s26 + $0xb4] sm:$0xf]  ;;  %v7965_v63 = vld [vmem:[%s9118_s26 + $0xc4] sm:$0xf] }
 0x16e   : > { %v2327_v11 = vpop.f32.mrf.mxu2  ;;  %v1179_v20 = vrot.slane %v1177_v36, 4  ;;  %v3750_v52 = vunpack.c.l.b16 %v3464_v54  ;;  %v1197_v54 = vshll.u32 %v791_v1, 16 }
 0x16f   : > { %v2858_v47 = vpop.f32.mrf.mxu3  ;;  %v2028_v50 = vsel %vm9279_vm5, %v2026_v13, %v11175_v2 }
 0x170   : > { %v1605_v34 = vpop.f32.mrf.mxu1  ;;  %v1188_v47 = vshrl.u32 %v790_v10, 16  ;;  %v2178_v22 = vunpack.c.l.b16 %v2028_v50  ;;  %v1180_v36 = vor.u32 %v1179_v20, %v9919_v21 }
 0x171   : > { %v1707_v26 = vadd.f32 %v1605_v34, %v9370_v27 }
 0x172   : > { %v9912_v40 = vpop.f32.mrf.mxu0  ;;  %v1190_v29 = vrot.slane %v1188_v47, 4 }
 0x173   : > { %1644 = vmatmul.bf16.gmra.mxu1 %v1484_v9  ;;  %2369 = vmatmul.bf16.gmra.mxu2 %v2209_v49  ;;  %v1191_v9 = vshll.u32 %v790_v10, 16  ;;  %v2025_v49 = vsel %vm9279_vm5, %v7674_v0, %v2024_v42  ;;  %v3489_v42 = vshll.u32 %v7964_v60, 16 }
 0x174   : > { %2900 = vmatmul.bf16.gmra.mxu3 %v8657_v45  ;;  %v3474_v45 = vsel %vm9274_vm4, %v3469_v4, %v9924_v12  ;;  %v2177_v7 = vunpack.c.l.b16 %v2025_v49 }
 0x175   : > { %3942 = vmatmul.bf16.gmra.mxu0 %v3782_v31  ;;  %v3486_v31 = vshrl.u32 %v7964_v60, 16  ;;  %v1193_v0 = vrot.slane %v1191_v9, 5  ;;  %v3751_v13 = vunpack.c.l.b16 %v3474_v45  ;;  %v3491_v60 = vrot.slane %v3489_v42, 5 }
 0x176   : > { %v2330_v33 = vpop.f32.mrf.mxu2  ;;  %v2210_v49 = vpack.c.b16 %v2178_v22, %v2177_v7 }
 0x177   : > { %v2432_v14 = vadd.f32 %v2330_v33, %v1707_v26  ;;  %v2861_v11 = vpop.f32.mrf.mxu3  ;;  %v7963_v26 = vld [vmem:[%s9118_s26 + $0xbc] sm:$0x1]  ;;  %v3477_v33 = vrot.slane %v3475_v37, 4  ;;  %v3488_v4 = vrot.slane %v3486_v31, 4  ;;  %v1194_v50 = vor.u32 %v1193_v0, %v1190_v29  ;;  %v1834_v37 = vld [vmem:[%s9118_s26 + $0xac] sm:$0x1] }
 0x178   : > { %v1607_v27 = vpop.f32.mrf.mxu1  ;;  %v3783_v45 = vpack.c.b16 %v3751_v13, %v3750_v52  ;;  %v3481_v2 = vshll.u32 %v7963_v26, 16  ;;  %v1199_v29 = vrot.slane %v1197_v54, 5  ;;  %v11193_v0 = vrot.slane %v9916_v32, 5  ;;  %v792_v26 = vld [vmem:[%s9118_s26 + $0xb8] sm:$0xf] }
 0x179   : > { %v2963_v28 = vadd.f32 %v2861_v11, %v2432_v14  ;;  %v1708_v10 = vadd.f32 %v1607_v27, %v9390_v56  ;;  %v1485_v14 = vpack.c.b16 %v1453_v8, %v1452_v25  ;;  %v1183_v11 = vshll.u32 %v789_v17, 16  ;;  %v8658_v27 = vld [vmem:[%s9118_s26 + $0xb0] sm:$0xff] }
 0x17a   : > { %v3905_v34 = vpop.f32.mrf.mxu0  ;;  %v1835_v25 = vld [vmem:[%s9118_s26 + $0xb0] sm:$0xe]  ;;  %v9955_v8 = vld [vmem:[%s9118_s26 + $0xb4] sm:$0xf]  ;;  %v3478_v21 = vor.u32 %v3477_v33, %v9924_v12  ;;  %v3492_v20 = vor.u32 %v3491_v60, %v3488_v4  ;;  %v3495_v17 = vshll.u32 %v7965_v63, 16  ;;  %v1195_v22 = vrot.slane %v1194_v50, 4 }
 0x17b   : > { %v9959_v7 = vadd.f32 %v9912_v40, %v2963_v28  ;;  %v2029_v52 = vrot.slane %v11193_v0, 4  ;;  %v2030_v13 = vrot.slane %v1834_v37, 5  ;;  %v1201_v12 = vshrl.u32 %v791_v1, 16  ;;  %v1837_v0 = vld [vmem:[%s9118_s26 + $0xb8] sm:$0xf] }
 0x17c   : > { %v7675_v33 = vrot.slane %v1835_v25, 9  ;;  %v2034_v4 = vrot.slane %v9955_v8, 5  ;;  %v3479_v40 = vrot.slane %v3478_v21, 4  ;;  %v3483_v28 = vrot.slane %v3481_v2, 5 }
 0x17d   : > { %v1207_v32 = vshll.u32 %v792_v26, 16 }
 0x17e   : > { %v2332_v24 = vpop.f32.mrf.mxu2  ;;  %v2035_v2 = vsel %vm9279_vm5, %v7675_v33, %v2034_v4 }
 0x17f   : > { %v2433_v47 = vadd.f32 %v2332_v24, %v1708_v10  ;;  %v2863_v9 = vpop.f32.mrf.mxu3  ;;  %v1181_v10 = vrot.slane %v1180_v36, 4  ;;  %v1185_v24 = vrot.slane %v1183_v11, 5  ;;  %v3497_v36 = vrot.slane %v3495_v17, 5 }
 0x180   : > { %v1610_v56 = vpop.f32.mrf.mxu1  ;;  %v9981_v8 = vrot.slane %v1207_v32, 5 }
 0x181   : > { %v2964_v31 = vadd.f32 %v2863_v9, %v2433_v47  ;;  %v3499_v47 = vshrl.u32 %v7965_v63, 16  ;;  %v1211_v9 = vshrl.u32 %v792_v26, 16  ;;  %v1186_v54 = vsel %vm9274_vm4, %v1181_v10, %v1185_v24 }
 0x182   : > { %v3908_v42 = vpop.f32.mrf.mxu0  ;;  %v1200_v56 = vsel %vm9274_vm4, %v1195_v22, %v1199_v29  ;;  %v1454_v17 = vunpack.c.l.b16 %v1186_v54  ;;  %v2180_v22 = vunpack.c.l.b16 %v2035_v2 }
 0x183   : > { %1649 = vmatmul.bf16.gmra.mxu1 %v1485_v14  ;;  %2374 = vmatmul.bf16.gmra.mxu2 %v2210_v49  ;;  %v9965_v60 = vadd.f32 %v3905_v34, %v2964_v31  ;;  %v3493_v14 = vrot.slane %v3492_v20, 4  ;;  %v7966_v49 = vld [vmem:[%s9118_s26 + $0xc8] sm:$0xf]  ;;  %v2031_v34 = vsel %vm9279_vm5, %v2029_v52, %v2030_v13  ;;  %v793_v31 = vld [vmem:[%s9118_s26 + $0xbc] sm:$0x1]  ;;  %v1213_v21 = vrot.slane %v1211_v9, 4 }
 0x184   : > { %2905 = vmatmul.bf16.gmra.mxu3 %v8658_v27  ;;  %v1203_v27 = vrot.slane %v1201_v12, 4  ;;  %v3505_v42 = vshll.u32 %v7966_v49, 16  ;;  %v3509_v25 = vshrl.u32 %v7966_v49, 16  ;;  %v3501_v20 = vrot.slane %v3499_v47, 4  ;;  %v7967_v49 = vld [vmem:[%s9118_s26 + $0xcc] sm:$0x1] }
 0x185   : > { %3947 = vmatmul.bf16.gmra.mxu0 %v3783_v45  ;;  %11194 = vst [vmem:[#allocation13_spill] sm:$0xff] %v9965_v60  ;;  %v3484_v45 = vsel %vm9274_vm4, %v3479_v40, %v3483_v28  ;;  %v3498_v37 = vsel %vm9274_vm4, %v3493_v14, %v3497_v36  ;;  %v1455_v10 = vunpack.c.l.b16 %v1200_v56  ;;  %v2179_v24 = vunpack.c.l.b16 %v2031_v34  ;;  %v7858_v40 = vld [vmem:[%s9118_s26 + $0xb8] sm:$0xf]  ;;  %v8659_v28 = vld [vmem:[%s9118_s26 + $0xbc] sm:$0xf0] }
 0x186   : > { %v2335_v11 = vpop.f32.mrf.mxu2  ;;  %v3752_v52 = vunpack.c.l.b16 %v3484_v45  ;;  %v3753_v13 = vunpack.c.l.b16 %v3498_v37  ;;  %v1204_v26 = vor.u32 %v1203_v27, %v1199_v29  ;;  %v1217_v12 = vshll.u32 %v793_v31, 16  ;;  %v1838_v29 = vld [vmem:[%s9118_s26 + $0xbc] sm:$0x1] }
 0x187   : > { %v2866_v50 = vpop.f32.mrf.mxu3  ;;  %v9987_v14 = vrot.slane %v3505_v42, 5  ;;  %v3511_v11 = vrot.slane %v3509_v25, 4  ;;  %v1214_v47 = vor.u32 %v1213_v21, %v9981_v8  ;;  %v2037_v9 = vrot.slane %v1837_v0, 5 }
 0x188   : > { %v1612_v1 = vpop.f32.mrf.mxu1  ;;  %v3502_v50 = vor.u32 %v3501_v20, %v3497_v36  ;;  %v1486_v34 = vpack.c.b16 %v1455_v10, %v1454_v17  ;;  %v2211_v2 = vpack.c.b16 %v2180_v22, %v2179_v24  ;;  %v7859_v45 = vor.u32 %v8659_v28, %v7858_v40  ;;  %v794_v10 = vld [vmem:[%s9118_s26 + $0xc0] sm:$0xf]  ;;  %v795_v22 = vld [vmem:[%s9118_s26 + $0xc4] sm:$0xf]  ;;  %v7968_v40 = vld [vmem:[%s9118_s26 + $0xd0] sm:$0xf] }
 0x189   : > { %v1710_v33 = vadd.f32 %v1612_v1, %v9429_v5  ;;  %v3784_v5 = vpack.c.b16 %v3753_v13, %v3752_v52  ;;  %v1205_v1 = vrot.slane %v1204_v26, 4  ;;  %v1219_v37 = vrot.slane %v1217_v12, 5  ;;  %v8716_v52 = vld [vmem:[%s11170_s1 + $0x188] sm:$0xff] }
 0x18a   : > { %v3910_v63 = vpop.f32.mrf.mxu0  ;;  %v2036_v25 = vrot.slane %v2034_v4, 4  ;;  %v3512_v21 = vor.u32 %v3511_v11, %v9987_v14  ;;  %v3515_v0 = vshll.u32 %v7967_v49, 16  ;;  %v1215_v60 = vrot.slane %v1214_v47, 4  ;;  %v8724_v13 = vld [vmem:[%s11170_s1 + $0x1c8] sm:$0xff]  ;;  %5123 = vmatpush.bf16.msra.mxu2 %v8716_v52 }
 0x18b   : > { %v2039_v36 = vrot.slane %v2037_v9, 4  ;;  %v2040_v20 = vrot.slane %v1838_v29, 5  ;;  %v3503_v17 = vrot.slane %v3502_v50, 4  ;;  %v1210_v4 = vsel %vm9274_vm4, %v1205_v1, %v9981_v8  ;;  %6165 = vmatpush.bf16.msra.mxu3 %v8724_v13  ;;  %v796_v52 = vld [vmem:[%s9118_s26 + $0xc8] sm:$0xf] }
 0x18c   : > { %v3513_v12 = vrot.slane %v3512_v21, 4  ;;  %v1220_v8 = vsel %vm9274_vm4, %v1215_v60, %v1219_v37  ;;  %v1222_v47 = vshrl.u32 %v794_v10, 16  ;;  %v1225_v50 = vshll.u32 %v794_v10, 16  ;;  %v8684_v60 = vld [vmem:[%s11170_s1 + $0x148] sm:$0xff] }
 0x18d   : > { %v2041_v11 = vsel %vm9279_vm5, %v2039_v36, %v2040_v20  ;;  %v3520_v29 = vshrl.u32 %v7968_v40, 16  ;;  %4592 = vmatpush.bf16.msra.mxu1 %v8684_v60 }
 0x18e   : > { %v2337_v32 = vpop.f32.mrf.mxu2  ;;  %v1224_v20 = vrot.slane %v1222_v47, 4 }
 0x18f   : > { %v2435_v54 = vadd.f32 %v2337_v32, %v1710_v33  ;;  %v2868_v56 = vpop.f32.mrf.mxu3  ;;  %v3517_v33 = vrot.slane %v3515_v0, 5  ;;  %v3508_v32 = vsel %vm9274_vm4, %v3503_v17, %v9987_v14  ;;  %v2182_v0 = vunpack.c.l.b16 %v2041_v11  ;;  %v10035_v11 = vld [vmem:[%s9118_s26 + $0xd8] sm:$0xf] }
 0x190   : > { %v1615_v27 = vpop.f32.mrf.mxu1  ;;  %v3754_v36 = vunpack.c.l.b16 %v3508_v32  ;;  %v1227_v17 = vrot.slane %v1225_v50, 5  ;;  %v3522_v13 = vrot.slane %v3520_v29, 4 }
 0x191   : > { %v2966_v31 = vadd.f32 %v2868_v56, %v2435_v54  ;;  %v1711_v26 = vadd.f32 %v1615_v27, %v9454_v43  ;;  %v7969_v43 = vld [vmem:[%s9118_s26 + $0xd4] sm:$0xf]  ;;  %v1231_v54 = vshll.u32 %v795_v22, 16  ;;  %v1235_v56 = vshrl.u32 %v795_v22, 16 }
 0x192   : > { %v3913_v42 = vpop.f32.mrf.mxu0  ;;  %v3523_v27 = vshll.u32 %v7968_v40, 16  ;;  %v3518_v14 = vsel %vm9274_vm4, %v3513_v12, %v3517_v33  ;;  %v3529_v1 = vshll.u32 %v7969_v43, 16  ;;  %v3533_v37 = vshrl.u32 %v7969_v43, 16  ;;  %v1840_v33 = vld [vmem:[%s9118_s26 + $0xc4] sm:$0xf] }
 0x193   : > { %1654 = vmatmul.bf16.gmra.mxu1 %v1486_v34  ;;  %2379 = vmatmul.bf16.gmra.mxu2 %v2211_v2  ;;  %v9994_v24 = vadd.f32 %v3910_v63, %v2966_v31  ;;  %v2038_v63 = vsel %vm9279_vm5, %v2036_v25, %v2037_v9  ;;  %v1456_v2 = vunpack.c.l.b16 %v1210_v4  ;;  %v8732_v31 = vld [vmem:[%s11170_s1 + $0x208] sm:$0xff]  ;;  %v1457_v25 = vunpack.c.l.b16 %v1220_v8 }
 0x194   : > { %2910 = vmatmul.bf16.gmra.mxu3 %v7859_v45  ;;  %v2181_v21 = vunpack.c.l.b16 %v2038_v63  ;;  %v10026_v10 = vrot.slane %v1231_v54, 5  ;;  %v1237_v4 = vrot.slane %v1235_v56, 4  ;;  %6887 = vmatpush.bf16.msra.mxu0 %v8732_v31  ;;  %v3755_v22 = vunpack.c.l.b16 %v3518_v14  ;;  %v8660_v54 = vld [vmem:[%s9118_s26 + $0xc4] sm:$0xff]  ;;  %v1839_v56 = vld [vmem:[%s9118_s26 + $0xc0] sm:$0xe] }
 0x195   : > { %3952 = vmatmul.bf16.gmra.mxu0 %v3784_v5  ;;  %v10032_v40 = vrot.slane %v3529_v1, 5  ;;  %v3535_v63 = vrot.slane %v3533_v37, 4  ;;  %v1487_v8 = vpack.c.b16 %v1457_v25, %v1456_v2  ;;  %v1228_v43 = vor.u32 %v1227_v17, %v1224_v20  ;;  %v798_v31 = vld [vmem:[%s9118_s26 + $0xd0] sm:$0xf] }
 0x196   : > { %v2340_v28 = vpop.f32.mrf.mxu2  ;;  %v2212_v47 = vpack.c.b16 %v2182_v0, %v2181_v21  ;;  %v2044_v60 = vrot.slane %v1840_v33, 5  ;;  %v7676_v37 = vrot.slane %v1839_v56, 9  ;;  %v1245_v25 = vshrl.u32 %v796_v52, 16  ;;  %v7972_v33 = vld [vmem:[%s9118_s26 + $0xe0] sm:$0xf] }
 0x197   : > { %v2436_v49 = vadd.f32 %v2340_v28, %v1711_v26  ;;  %v2871_v9 = vpop.f32.mrf.mxu3  ;;  %v3525_v26 = vrot.slane %v3523_v27, 5  ;;  %v10043_v27 = vld [vmem:[%s9118_s26 + $0xc8] sm:$0xf]  ;;  %v3536_v2 = vor.u32 %v3535_v63, %v10032_v40  ;;  %v3557_v56 = vshll.u32 %v7972_v33, 16 }
 0x198   : > { %v1617_v34 = vpop.f32.mrf.mxu1  ;;  %v2046_v21 = vrot.slane %v2044_v60, 4  ;;  %v11176_v0 = vrot.slane %v10043_v27, 5 }
 0x199   : > { %v2967_v45 = vadd.f32 %v2871_v9, %v2436_v49  ;;  %v1238_v49 = vor.u32 %v1237_v4, %v10026_v10  ;;  %v1241_v9 = vshll.u32 %v796_v52, 16  ;;  %v3526_v34 = vor.u32 %v3525_v26, %v3522_v13 }
 0x19a   : > { %v3915_v5 = vpop.f32.mrf.mxu0  ;;  %v3537_v17 = vrot.slane %v3536_v2, 4  ;;  %v1256_v13 = vshrl.u32 %v798_v31, 16  ;;  %v1259_v26 = vshll.u32 %v798_v31, 16 }
 0x19b   : > { %v10029_v12 = vadd.f32 %v3913_v42, %v2967_v45  ;;  %v3785_v42 = vpack.c.b16 %v3755_v22, %v3754_v36  ;;  %v3539_v45 = vshll.u32 %v10035_v11, 16  ;;  %v1229_v5 = vrot.slane %v1228_v43, 4 }
 0x19c   : > { %v1239_v14 = vrot.slane %v1238_v49, 4  ;;  %v1243_v1 = vrot.slane %v1241_v9, 5  ;;  %v3527_v36 = vrot.slane %v3526_v34, 4  ;;  %v1247_v49 = vrot.slane %v1245_v25, 4 }
 0x19d   : > { %v10050_v4 = vrot.slane %v3539_v45, 5  ;;  %v1261_v34 = vrot.slane %v1259_v26, 5 }
 0x19e   : > { %v2342_v28 = vpop.f32.mrf.mxu2  ;;  %v1244_v52 = vsel %vm9274_vm4, %v1239_v14, %v1243_v1  ;;  %v3532_v43 = vsel %vm9274_vm4, %v3527_v36, %v10032_v40  ;;  %v797_v40 = vld [vmem:[%s9118_s26 + $0xcc] sm:$0x1]  ;;  %v1248_v25 = vor.u32 %v1247_v49, %v1243_v1  ;;  %v7971_v36 = vld [vmem:[%s9118_s26 + $0xdc] sm:$0x1] }
 0x19f   : > { %v2873_v32 = vpop.f32.mrf.mxu3  ;;  %v1459_v45 = vunpack.c.l.b16 %v1244_v52  ;;  %v1251_v26 = vshll.u32 %v797_v40, 16  ;;  %v3549_v49 = vshll.u32 %v7971_v36, 16  ;;  %v10083_v40 = vld [vmem:[%s9118_s26 + $0xd4] sm:$0xf] }
 0x1a0   : > { %v1620_v50 = vpop.f32.mrf.mxu1  ;;  %v2045_v32 = vsel %vm9279_vm5, %v7676_v37, %v2044_v60  ;;  %v1258_v60 = vrot.slane %v1256_v13, 4  ;;  %v10073_v37 = vld [vmem:[%s9118_s26 + $0xd4] sm:$0xf] }
 0x1a1   : > { %v1713_v20 = vadd.f32 %v1620_v50, %v9499_v44 }
 0x1a2   : > { %v10040_v29 = vpop.f32.mrf.mxu0 }
 0x1a3   : > { %1659 = vmatmul.bf16.gmra.mxu1 %v1487_v8  ;;  %2384 = vmatmul.bf16.gmra.mxu2 %v2212_v47  ;;  %v1234_v8 = vsel %vm9274_vm4, %v1229_v5, %v10026_v10  ;;  %v2048_v47 = vsel %vm9279_vm5, %v2046_v21, %v11176_v0  ;;  %v3543_v10 = vshrl.u32 %v10035_v11, 16  ;;  %v2183_v5 = vunpack.c.l.b16 %v2045_v32 }
 0x1a4   : > { %2915 = vmatmul.bf16.gmra.mxu3 %v8660_v54  ;;  %v3542_v54 = vsel %vm9274_vm4, %v3537_v17, %v10050_v4  ;;  %v1458_v2 = vunpack.c.l.b16 %v1234_v8  ;;  %v2184_v14 = vunpack.c.l.b16 %v2048_v47  ;;  %v3756_v11 = vunpack.c.l.b16 %v3532_v43  ;;  %v8661_v43 = vld [vmem:[%s9118_s26 + $0xd0] sm:$0xff] }
 0x1a5   : > { %3957 = vmatmul.bf16.gmra.mxu0 %v3785_v42  ;;  %v3554_v42 = vshrl.u32 %v7972_v33, 16  ;;  %v3757_v31 = vunpack.c.l.b16 %v3542_v54  ;;  %v1262_v33 = vor.u32 %v1261_v34, %v1258_v60 }
 0x1a6   : > { %v2345_v22 = vpop.f32.mrf.mxu2  ;;  %v1488_v32 = vpack.c.b16 %v1459_v45, %v1458_v2  ;;  %v2213_v1 = vpack.c.b16 %v2184_v14, %v2183_v5  ;;  %v11195_v5 = vrot.slane %v10043_v27, 5 }
 0x1a7   : > { %v2438_v63 = vadd.f32 %v2345_v22, %v1713_v20  ;;  %v2876_v28 = vpop.f32.mrf.mxu3  ;;  %v3545_v20 = vrot.slane %v3543_v10, 4  ;;  %v3556_v17 = vrot.slane %v3554_v42, 4  ;;  %v3559_v22 = vrot.slane %v3557_v56, 5  ;;  %v1842_v10 = vld [vmem:[%s9118_s26 + $0xcc] sm:$0x1] }
 0x1a8   : > { %v1622_v44 = vpop.f32.mrf.mxu1  ;;  %v1843_v56 = vld [vmem:[%s9118_s26 + $0xd0] sm:$0xe]  ;;  %v2049_v14 = vrot.slane %v11195_v5, 4 }
 0x1a9   : > { %v2969_v9 = vadd.f32 %v2876_v28, %v2438_v63  ;;  %v1714_v21 = vadd.f32 %v1622_v44, %v9520_v39  ;;  %v1265_v63 = vshll.u32 %v10073_v37, 16  ;;  %v7973_v28 = vld [vmem:[%s9118_s26 + $0xe4] sm:$0xf]  ;;  %v3786_v39 = vpack.c.b16 %v3757_v31, %v3756_v11 }
 0x1aa   : > { %v3920_v50 = vpop.f32.mrf.mxu0  ;;  %v1249_v44 = vrot.slane %v1248_v25, 4  ;;  %v3546_v60 = vor.u32 %v3545_v20, %v10050_v4  ;;  %v3560_v34 = vor.u32 %v3559_v22, %v3556_v17  ;;  %v3563_v0 = vshll.u32 %v7973_v28, 16  ;;  %v800_v25 = vld [vmem:[%s9118_s26 + $0xd8] sm:$0xf] }
 0x1ab   : > { %v10086_v2 = vrot.slane %v1265_v63, 5  ;;  %v10089_v45 = vadd.f32 %v10040_v29, %v2969_v9  ;;  %v2050_v11 = vrot.slane %v1842_v10, 5  ;;  %v7677_v31 = vrot.slane %v1843_v56, 9  ;;  %v7974_v63 = vld [vmem:[%s9118_s26 + $0xe8] sm:$0xf] }
 0x1ac   : > { %v2054_v4 = vrot.slane %v10083_v40, 5  ;;  %v3547_v20 = vrot.slane %v3546_v60, 4  ;;  %v3551_v17 = vrot.slane %v3549_v49, 5  ;;  %v3561_v22 = vrot.slane %v3560_v34, 4 }
 0x1ad   : > { %v10097_v29 = vrot.slane %v3563_v0, 5  ;;  %v1279_v0 = vshrl.u32 %v800_v25, 16  ;;  %v3577_v10 = vshrl.u32 %v7974_v63, 16 }
 0x1ae   : > { %v2347_v13 = vpop.f32.mrf.mxu2 }
 0x1af   : > { %v2439_v8 = vadd.f32 %v2347_v13, %v1714_v21  ;;  %v2878_v52 = vpop.f32.mrf.mxu3  ;;  %v1253_v21 = vrot.slane %v1251_v26, 5  ;;  %v1263_v13 = vrot.slane %v1262_v33, 4  ;;  %v1269_v33 = vshrl.u32 %v10073_v37, 16 }
 0x1b0   : > { %v1625_v47 = vpop.f32.mrf.mxu1  ;;  %v3566_v37 = vsel %vm9274_vm4, %v3561_v22, %v10097_v29  ;;  %v1281_v34 = vrot.slane %v1279_v0, 4 }
 0x1b1   : > { %v2970_v54 = vadd.f32 %v2878_v52, %v2439_v8  ;;  %v1254_v27 = vsel %vm9274_vm4, %v1249_v44, %v1253_v21  ;;  %v1268_v26 = vsel %vm9274_vm4, %v1263_v13, %v10086_v2  ;;  %v3567_v52 = vshrl.u32 %v7973_v28, 16  ;;  %v1845_v21 = vld [vmem:[%s9118_s26 + $0xd8] sm:$0xf] }
 0x1b2   : > { %v3923_v42 = vpop.f32.mrf.mxu0  ;;  %v2055_v47 = vsel %vm9279_vm5, %v7677_v31, %v2054_v4  ;;  %v3573_v44 = vshll.u32 %v7974_v63, 16  ;;  %v1460_v28 = vunpack.c.l.b16 %v1254_v27  ;;  %v1461_v49 = vunpack.c.l.b16 %v1268_v26  ;;  %v7870_v31 = vld [vmem:[%s9118_s26 + $0xd8] sm:$0xf]  ;;  %v7975_v63 = vld [vmem:[%s9118_s26 + $0xec] sm:$0x1] }
 0x1b3   : > { %1664 = vmatmul.bf16.gmra.mxu1 %v1488_v32  ;;  %2389 = vmatmul.bf16.gmra.mxu2 %v2213_v1  ;;  %v10095_v36 = vadd.f32 %v3920_v50, %v2970_v54  ;;  %v2051_v50 = vsel %vm9279_vm5, %v2049_v14, %v2050_v11  ;;  %v1275_v32 = vshll.u32 %v800_v25, 16  ;;  %v801_v42 = vld [vmem:[%s9118_s26 + $0xdc] sm:$0x1]  ;;  %v1271_v56 = vrot.slane %v1269_v33, 4  ;;  %v8662_v25 = vld [vmem:[%s9118_s26 + $0xdc] sm:$0xf0] }
 0x1b4   : > { %2920 = vmatmul.bf16.gmra.mxu3 %v8661_v43  ;;  %v2185_v54 = vunpack.c.l.b16 %v2051_v50  ;;  %v2186_v40 = vunpack.c.l.b16 %v2055_v47  ;;  %v3569_v13 = vrot.slane %v3567_v52, 4  ;;  %v3759_v14 = vunpack.c.l.b16 %v3566_v37 }
 0x1b5   : > { %3962 = vmatmul.bf16.gmra.mxu0 %v3786_v39  ;;  %v3552_v39 = vsel %vm9274_vm4, %v3547_v20, %v3551_v17  ;;  %v10116_v60 = vrot.slane %v1275_v32, 5  ;;  %v10122_v20 = vrot.slane %v3573_v44, 5  ;;  %v3579_v17 = vrot.slane %v3577_v10, 4 }
 0x1b6   : > { %v2350_v9 = vpop.f32.mrf.mxu2  ;;  %v3758_v5 = vunpack.c.l.b16 %v3552_v39  ;;  %v1272_v27 = vor.u32 %v1271_v56, %v10086_v2  ;;  %v1285_v26 = vshll.u32 %v801_v42, 16  ;;  %v2057_v33 = vrot.slane %v1845_v21, 5  ;;  %v1846_v39 = vld [vmem:[%s9118_s26 + $0xdc] sm:$0x1]  ;;  %v803_v21 = vld [vmem:[%s9118_s26 + $0xe4] sm:$0xf] }
 0x1b7   : > { %v2881_v8 = vpop.f32.mrf.mxu3  ;;  %v1489_v9 = vpack.c.b16 %v1461_v49, %v1460_v28  ;;  %v2214_v52 = vpack.c.b16 %v2186_v40, %v2185_v54  ;;  %v1282_v32 = vor.u32 %v1281_v34, %v10116_v60  ;;  %v3580_v2 = vor.u32 %v3579_v17, %v10122_v20  ;;  %v802_v28 = vld [vmem:[%s9118_s26 + $0xe0] sm:$0xf] }
 0x1b8   : > { %v1627_v1 = vpop.f32.mrf.mxu1  ;;  %v3787_v47 = vpack.c.b16 %v3759_v14, %v3758_v5  ;;  %v3583_v10 = vshll.u32 %v7975_v63, 16  ;;  %v1273_v49 = vrot.slane %v1272_v27, 4  ;;  %v1287_v42 = vrot.slane %v1285_v26, 5 }
 0x1b9   : > { %v1716_v11 = vadd.f32 %v1627_v1, %v9568_v19  ;;  %v3570_v19 = vor.u32 %v3569_v13, %v10097_v29  ;;  %v7871_v1 = vor.u32 %v8662_v25, %v7870_v31  ;;  %v2056_v56 = vrot.slane %v2054_v4, 4  ;;  %v8723_v4 = vld [vmem:[%s11170_s1 + $0x1c0] sm:$0xff] }
 0x1ba   : > { %v3925_v43 = vpop.f32.mrf.mxu0  ;;  %v2059_v54 = vrot.slane %v2057_v33, 4  ;;  %v1283_v29 = vrot.slane %v1282_v32, 4  ;;  %v2060_v40 = vrot.slane %v1846_v39, 5  ;;  %v1290_v5 = vshrl.u32 %v802_v28, 16  ;;  %6166 = vmatpush.bf16.msra.mxu3 %v8723_v4 }
 0x1bb   : > { %v3571_v34 = vrot.slane %v3570_v19, 4  ;;  %v1293_v14 = vshll.u32 %v802_v28, 16  ;;  %v3581_v25 = vrot.slane %v3580_v2, 4  ;;  %v3585_v17 = vrot.slane %v3583_v10, 5 }
 0x1bc   : > { %v2058_v27 = vsel %vm9279_vm5, %v2056_v56, %v2057_v33  ;;  %v1299_v26 = vshll.u32 %v803_v21, 16  ;;  %v1303_v63 = vshrl.u32 %v803_v21, 16  ;;  %v2061_v32 = vsel %vm9279_vm5, %v2059_v54, %v2060_v40  ;;  %v8683_v33 = vld [vmem:[%s11170_s1 + $0x140] sm:$0xff] }
 0x1bd   : > { %v3586_v10 = vsel %vm9274_vm4, %v3581_v25, %v3585_v17  ;;  %4593 = vmatpush.bf16.msra.mxu1 %v8683_v33  ;;  %v2187_v40 = vunpack.c.l.b16 %v2058_v27  ;;  %v8663_v33 = vld [vmem:[%s9118_s26 + $0xe4] sm:$0xff] }
 0x1be   : > { %v2352_v22 = vpop.f32.mrf.mxu2  ;;  %v1301_v56 = vrot.slane %v1299_v26, 5  ;;  %v1305_v54 = vrot.slane %v1303_v63, 4  ;;  %v7978_v63 = vld [vmem:[%s9118_s26 + $0xf8] sm:$0xf] }
 0x1bf   : > { %v2441_v8 = vadd.f32 %v2352_v22, %v1716_v11  ;;  %v2883_v50 = vpop.f32.mrf.mxu3  ;;  %v8715_v11 = vld [vmem:[%s11170_s1 + $0x180] sm:$0xff]  ;;  %v7976_v22 = vld [vmem:[%s9118_s26 + $0xf0] sm:$0xf] }
 0x1c0   : > { %v1630_v0 = vpop.f32.mrf.mxu1  ;;  %5124 = vmatpush.bf16.msra.mxu2 %v8715_v11  ;;  %v3591_v39 = vshll.u32 %v7976_v22, 16  ;;  %v1848_v11 = vld [vmem:[%s9118_s26 + $0xe4] sm:$0xf]  ;;  %v1306_v27 = vor.u32 %v1305_v54, %v1301_v56  ;;  %v806_v54 = vld [vmem:[%s9118_s26 + $0xf0] sm:$0xf] }
 0x1c1   : > { %v2972_v37 = vadd.f32 %v2883_v50, %v2441_v8  ;;  %v1717_v31 = vadd.f32 %v1630_v0, %v9594_v16  ;;  %v7977_v8 = vld [vmem:[%s9118_s26 + $0xf4] sm:$0xf]  ;;  %v1288_v16 = vsel %vm9274_vm4, %v1283_v29, %v1287_v42  ;;  %v1292_v0 = vrot.slane %v1290_v5, 4  ;;  %v10166_v5 = vld [vmem:[%s9118_s26 + $0xe8] sm:$0xf] }
 0x1c2   : > { %v10129_v44 = vpop.f32.mrf.mxu0  ;;  %v3597_v28 = vshll.u32 %v7977_v8, 16  ;;  %v1463_v29 = vunpack.c.l.b16 %v1288_v16  ;;  %v1309_v26 = vshll.u32 %v10166_v5, 16  ;;  %v1847_v16 = vld [vmem:[%s9118_s26 + $0xe0] sm:$0xe] }
 0x1c3   : > { %1669 = vmatmul.bf16.gmra.mxu1 %v1489_v9  ;;  %2394 = vmatmul.bf16.gmra.mxu2 %v2214_v52  ;;  %v10134_v13 = vadd.f32 %v3925_v43, %v2972_v37  ;;  %v1278_v9 = vsel %vm9274_vm4, %v1273_v49, %v10116_v60  ;;  %v3576_v60 = vsel %vm9274_vm4, %v3571_v34, %v10122_v20  ;;  %v3601_v49 = vshrl.u32 %v7977_v8, 16  ;;  %v8731_v20 = vld [vmem:[%s11170_s1 + $0x200] sm:$0xff] }
 0x1c4   : > { %2925 = vmatmul.bf16.gmra.mxu3 %v7871_v1  ;;  %v1295_v1 = vrot.slane %v1293_v14, 5  ;;  %v1462_v42 = vunpack.c.l.b16 %v1278_v9  ;;  %v2188_v34 = vunpack.c.l.b16 %v2061_v32  ;;  %v3760_v21 = vunpack.c.l.b16 %v3576_v60  ;;  %6888 = vmatpush.bf16.msra.mxu0 %v8731_v20 }
 0x1c5   : > { %3967 = vmatmul.bf16.gmra.mxu0 %v3787_v47  ;;  %v3588_v47 = vshrl.u32 %v7976_v22, 16  ;;  %v3761_v14 = vunpack.c.l.b16 %v3586_v10  ;;  %v3599_v22 = vrot.slane %v3597_v28, 5  ;;  %v2064_v32 = vrot.slane %v1848_v11, 5 }
 0x1c6   : > { %v2355_v43 = vpop.f32.mrf.mxu2  ;;  %v1296_v17 = vor.u32 %v1295_v1, %v1292_v0  ;;  %v10181_v10 = vrot.slane %v1309_v26, 5  ;;  %v7678_v28 = vrot.slane %v1847_v16, 9 }
 0x1c7   : > { %v2442_v50 = vadd.f32 %v2355_v43, %v1717_v31  ;;  %v2886_v52 = vpop.f32.mrf.mxu3  ;;  %v3590_v4 = vrot.slane %v3588_v47, 4  ;;  %v3593_v31 = vrot.slane %v3591_v39, 5  ;;  %v3603_v43 = vrot.slane %v3601_v49, 4  ;;  %v10177_v47 = vld [vmem:[%s9118_s26 + $0xe8] sm:$0xf] }
 0x1c8   : > { %v1632_v19 = vpop.f32.mrf.mxu1  ;;  %v1297_v1 = vrot.slane %v1296_v17, 4  ;;  %v2066_v49 = vrot.slane %v2064_v32, 4  ;;  %v2067_v20 = vrot.slane %v10177_v47, 5  ;;  %v7980_v17 = vld [vmem:[%s9118_s26 + $0x100] sm:$0xf] }
 0x1c9   : > { %v2973_v37 = vadd.f32 %v2886_v52, %v2442_v50  ;;  %v1490_v50 = vpack.c.b16 %v1463_v29, %v1462_v42  ;;  %v2215_v52 = vpack.c.b16 %v2188_v34, %v2187_v40  ;;  %v3788_v19 = vpack.c.b16 %v3761_v14, %v3760_v21 }
 0x1ca   : > { %v3930_v2 = vpop.f32.mrf.mxu0  ;;  %v3604_v39 = vor.u32 %v3603_v43, %v3599_v22  ;;  %v1302_v40 = vsel %vm9274_vm4, %v1297_v1, %v1301_v56  ;;  %v1324_v56 = vshrl.u32 %v806_v54, 16 }
 0x1cb   : > { %v10170_v25 = vadd.f32 %v10129_v44, %v2973_v37  ;;  %v3594_v44 = vor.u32 %v3593_v31, %v3590_v4  ;;  %v3607_v37 = vshll.u32 %v7978_v63, 16  ;;  %v1307_v2 = vrot.slane %v1306_v27, 4 }
 0x1cc   : > { %v3605_v34 = vrot.slane %v3604_v39, 4  ;;  %v1313_v4 = vshrl.u32 %v10166_v5, 16  ;;  %v2065_v31 = vsel %vm9279_vm5, %v7678_v28, %v2064_v32  ;;  %v1327_v27 = vshll.u32 %v806_v54, 16  ;;  %v7979_v54 = vld [vmem:[%s9118_s26 + $0xfc] sm:$0x1] }
 0x1cd   : > { %v3595_v42 = vrot.slane %v3594_v44, 4  ;;  %v10188_v21 = vrot.slane %v3607_v37, 5  ;;  %v1312_v11 = vsel %vm9274_vm4, %v1307_v2, %v10181_v10  ;;  %v3611_v5 = vshrl.u32 %v7978_v63, 16  ;;  %v10208_v63 = vld [vmem:[%s9118_s26 + $0xf4] sm:$0xf] }
 0x1ce   : > { %v2357_v9 = vpop.f32.mrf.mxu2  ;;  %v2189_v44 = vunpack.c.l.b16 %v2065_v31  ;;  %v1315_v39 = vrot.slane %v1313_v4, 4  ;;  %v1326_v37 = vrot.slane %v1324_v56, 4  ;;  %v1329_v2 = vrot.slane %v1327_v27, 5 }
 0x1cf   : > { %v2888_v8 = vpop.f32.mrf.mxu3  ;;  %v3610_v32 = vsel %vm9274_vm4, %v3605_v34, %v10188_v21 }
 0x1d0   : > { %v1635_v60 = vpop.f32.mrf.mxu1  ;;  %v1464_v8 = vunpack.c.l.b16 %v1302_v40  ;;  %v1316_v31 = vor.u32 %v1315_v39, %v10181_v10  ;;  %v1330_v56 = vor.u32 %v1329_v2, %v1326_v37 }
 0x1d1   : > { %v1719_v29 = vadd.f32 %v1635_v60, %v9383_v48  ;;  %v2068_v48 = vsel %vm9279_vm5, %v2066_v49, %v2067_v20  ;;  %v3622_v60 = vshrl.u32 %v7980_v17, 16  ;;  %v805_v49 = vld [vmem:[%s9118_s26 + $0xec] sm:$0x1] }
 0x1d2   : > { %v10179_v0 = vpop.f32.mrf.mxu0  ;;  %v2190_v1 = vunpack.c.l.b16 %v2068_v48  ;;  %v1319_v48 = vshll.u32 %v805_v49, 16  ;;  %v1317_v39 = vrot.slane %v1316_v31, 4  ;;  %v2069_v49 = vrot.slane %v2067_v20, 4  ;;  %v7982_v31 = vld [vmem:[%s9118_s26 + $0x108] sm:$0xf] }
 0x1d3   : > { %1674 = vmatmul.bf16.gmra.mxu1 %v1490_v50  ;;  %2399 = vmatmul.bf16.gmra.mxu2 %v2215_v52  ;;  %v3600_v50 = vsel %vm9274_vm4, %v3595_v42, %v3599_v22  ;;  %v3763_v22 = vunpack.c.l.b16 %v3610_v32  ;;  %v3624_v40 = vrot.slane %v3622_v60, 4  ;;  %v3617_v32 = vshll.u32 %v7979_v54, 16 }
 0x1d4   : > { %2930 = vmatmul.bf16.gmra.mxu3 %v8663_v33  ;;  %v3625_v33 = vshll.u32 %v7980_v17, 16  ;;  %v3762_v28 = vunpack.c.l.b16 %v3600_v50  ;;  %v2216_v4 = vpack.c.b16 %v2190_v1, %v2189_v44  ;;  %v10214_v17 = vld [vmem:[%s9118_s26 + $0x104] sm:$0xf]  ;;  %v1321_v2 = vrot.slane %v1319_v48, 5 }
 0x1d5   : > { %3972 = vmatmul.bf16.gmra.mxu0 %v3788_v19  ;;  %v1465_v19 = vunpack.c.l.b16 %v1312_v11  ;;  %v3631_v1 = vshll.u32 %v10214_v17, 16 }
 0x1d6   : > { %v2360_v14 = vpop.f32.mrf.mxu2  ;;  %v3627_v34 = vrot.slane %v3625_v33, 5  ;;  %v3789_v50 = vpack.c.b16 %v3763_v22, %v3762_v28  ;;  %v1851_v33 = vld [vmem:[%s9118_s26 + $0xf0] sm:$0xe]  ;;  %v1331_v28 = vrot.slane %v1330_v56, 4  ;;  %v1322_v20 = vsel %vm9274_vm4, %v1317_v39, %v1321_v2 }
 0x1d7   : > { %v2444_v43 = vadd.f32 %v2360_v14, %v1719_v29  ;;  %v2891_v9 = vpop.f32.mrf.mxu3  ;;  %v3613_v29 = vrot.slane %v3611_v5, 4  ;;  %v1491_v11 = vpack.c.b16 %v1465_v19, %v1464_v8  ;;  %v1850_v5 = vld [vmem:[%s9118_s26 + $0xec] sm:$0x1]  ;;  %v10221_v19 = vld [vmem:[%s9118_s26 + $0xf4] sm:$0xf] }
 0x1d8   : > { %v1637_v26 = vpop.f32.mrf.mxu1  ;;  %v3628_v44 = vor.u32 %v3627_v34, %v3624_v40  ;;  %v2074_v54 = vrot.slane %v10221_v19, 5 }
 0x1d9   : > { %v2975_v52 = vadd.f32 %v2891_v9, %v2444_v43  ;;  %v1720_v42 = vadd.f32 %v1637_v26, %v9408_v18  ;;  %v1333_v18 = vshll.u32 %v10208_v63, 16  ;;  %v8664_v26 = vld [vmem:[%s9118_s26 + $0xf0] sm:$0xff]  ;;  %v3614_v10 = vor.u32 %v3613_v29, %v10188_v21  ;;  %v808_v29 = vld [vmem:[%s9118_s26 + $0xf8] sm:$0xf] }
 0x1da   : > { %v3935_v16 = vpop.f32.mrf.mxu0  ;;  %v2070_v21 = vrot.slane %v1850_v5, 5  ;;  %v3629_v34 = vrot.slane %v3628_v44, 4  ;;  %v3641_v5 = vshll.u32 %v7982_v31, 16  ;;  %v809_v44 = vld [vmem:[%s9118_s26 + $0xfc] sm:$0x1] }
 0x1db   : > { %v10226_v37 = vadd.f32 %v10179_v0, %v2975_v52  ;;  %v10228_v22 = vrot.slane %v1333_v18, 5  ;;  %v3615_v0 = vrot.slane %v3614_v10, 4  ;;  %v3619_v52 = vrot.slane %v3617_v32, 5 }
 0x1dc   : > { %v2071_v56 = vsel %vm9279_vm5, %v2069_v49, %v2070_v21  ;;  %v3645_v32 = vshrl.u32 %v7982_v31, 16  ;;  %v1353_v31 = vshll.u32 %v809_v44, 16 }
 0x1dd   : > { %v2191_v19 = vunpack.c.l.b16 %v2071_v56 }
 0x1de   : > { %v2362_v14 = vpop.f32.mrf.mxu2 }
 0x1df   : > { %v2445_v43 = vadd.f32 %v2362_v14, %v1720_v42  ;;  %v2893_v9 = vpop.f32.mrf.mxu3  ;;  %v7679_v42 = vrot.slane %v1851_v33, 9  ;;  %v10236_v14 = vrot.slane %v3631_v1, 5 }
 0x1e0   : > { %v1640_v27 = vpop.f32.mrf.mxu1 }
 0x1e1   : > { %v2976_v60 = vadd.f32 %v2893_v9, %v2445_v43  ;;  %v1336_v43 = vsel %vm9274_vm4, %v1331_v28, %v10228_v22  ;;  %v1343_v9 = vshll.u32 %v808_v29, 16  ;;  %v2075_v18 = vsel %vm9279_vm5, %v7679_v42, %v2074_v54  ;;  %v1853_v28 = vld [vmem:[%s9118_s26 + $0xf8] sm:$0xf] }
 0x1e2   : > { %v3938_v8 = vpop.f32.mrf.mxu0  ;;  %v2192_v10 = vunpack.c.l.b16 %v2075_v18  ;;  %v7882_v42 = vld [vmem:[%s9118_s26 + $0xf8] sm:$0xf]  ;;  %v2077_v56 = vrot.slane %v1853_v28, 5 }
 0x1e3   : > { %1679 = vmatmul.bf16.gmra.mxu1 %v1491_v11  ;;  %2404 = vmatmul.bf16.gmra.mxu2 %v2216_v4  ;;  %v10234_v40 = vadd.f32 %v3935_v16, %v2976_v60  ;;  %v1337_v4 = vshrl.u32 %v10208_v63, 16  ;;  %v1347_v16 = vshrl.u32 %v808_v29, 16  ;;  %v3635_v63 = vshrl.u32 %v10214_v17, 16  ;;  %v8665_v29 = vld [vmem:[%s9118_s26 + $0xfc] sm:$0xf0] }
 0x1e4   : > { %2935 = vmatmul.bf16.gmra.mxu3 %v8664_v26  ;;  %v3620_v26 = vsel %vm9274_vm4, %v3615_v0, %v3619_v52  ;;  %v1466_v60 = vunpack.c.l.b16 %v1322_v20  ;;  %v1467_v8 = vunpack.c.l.b16 %v1336_v43  ;;  %v10256_v17 = vrot.slane %v1343_v9, 5 }
 0x1e5   : > { %3977 = vmatmul.bf16.gmra.mxu0 %v3789_v50  ;;  %v3634_v50 = vsel %vm9274_vm4, %v3629_v34, %v10236_v14  ;;  %v1339_v33 = vrot.slane %v1337_v4, 4  ;;  %v1349_v1 = vrot.slane %v1347_v16, 4  ;;  %v3764_v39 = vunpack.c.l.b16 %v3620_v26 }
 0x1e6   : > { %v2365_v11 = vpop.f32.mrf.mxu2  ;;  %v3765_v2 = vunpack.c.l.b16 %v3634_v50  ;;  %v3637_v49 = vrot.slane %v3635_v63, 4  ;;  %v3643_v0 = vrot.slane %v3641_v5, 5  ;;  %v3647_v52 = vrot.slane %v3645_v32, 4 }
 0x1e7   : > { %v2896_v47 = vpop.f32.mrf.mxu3  ;;  %v1492_v11 = vpack.c.b16 %v1467_v8, %v1466_v60  ;;  %v1340_v4 = vor.u32 %v1339_v33, %v10228_v22  ;;  %v2217_v9 = vpack.c.b16 %v2192_v10, %v2191_v19  ;;  %v1350_v16 = vor.u32 %v1349_v1, %v10256_v17 }
 0x1e8   : > { %v1642_v48 = vpop.f32.mrf.mxu1  ;;  %v7983_v47 = vld [vmem:[%s9118_s26 + $0x10c] sm:$0x1]  ;;  %v7883_v63 = vor.u32 %v8665_v29, %v7882_v42  ;;  %v3638_v26 = vor.u32 %v3637_v49, %v10236_v14  ;;  %v3648_v32 = vor.u32 %v3647_v52, %v3643_v0  ;;  %v1355_v8 = vrot.slane %v1353_v31, 5  ;;  %v8352_v14 = vld [vmem:[%s9118_s26 + $0x20] sm:$0xf] }
 0x1e9   : > { %v1722_v21 = vadd.f32 %v1642_v48, %v9449_v35  ;;  %v3790_v35 = vpack.c.b16 %v3765_v2, %v3764_v39  ;;  %v1854_v48 = vld [vmem:[%s9118_s26 + $0xfc] sm:$0x1]  ;;  %v3651_v60 = vshll.u32 %v7983_v47, 16  ;;  %v1341_v22 = vrot.slane %v1340_v4, 4 }
 0x1ea   : > { %v3940_v27 = vpop.f32.mrf.mxu0  ;;  %v2076_v33 = vrot.slane %v2074_v54, 4  ;;  %v1351_v19 = vrot.slane %v1350_v16, 4  ;;  %v2079_v10 = vrot.slane %v2077_v56, 4  ;;  %v2080_v44 = vrot.slane %v1854_v48, 5 }
 0x1eb   : > { %v3639_v39 = vrot.slane %v3638_v26, 4  ;;  %v3649_v28 = vrot.slane %v3648_v32, 4  ;;  %v3653_v49 = vrot.slane %v3651_v60, 5  ;;  %v1346_v54 = vsel %vm9274_vm4, %v1341_v22, %v10256_v17  ;;  %v8033_v32 = vld [vmem:[%s9118_s26 + $0x14] sm:$0xf] }
 0x1ec   : > { %v2078_v29 = vsel %vm9279_vm5, %v2076_v33, %v2077_v56  ;;  %v5410_v47 = vshll.u32 %v8352_v14, 16  ;;  %v1468_v56 = vunpack.c.l.b16 %v1346_v54  ;;  %v8354_v33 = vld [vmem:[%s9118_s26 + $0x28] sm:$0xf] }
 0x1ed   : > { %v3644_v31 = vsel %vm9274_vm4, %v3639_v39, %v3643_v0  ;;  %v3654_v16 = vsel %vm9274_vm4, %v3649_v28, %v3653_v49  ;;  %v8666_v49 = vld [vmem:[%s9118_s26 + $0x104] sm:$0xff] }
 0x1ee   : > { %v2367_v34 = vpop.f32.mrf.mxu2  ;;  %v3766_v48 = vunpack.c.l.b16 %v3644_v31  ;;  %v3767_v0 = vunpack.c.l.b16 %v3654_v16  ;;  %v5412_v60 = vrot.slane %v5410_v47, 5 }
 0x1ef   : > { %v2447_v20 = vadd.f32 %v2367_v34, %v1722_v21  ;;  %v2898_v43 = vpop.f32.mrf.mxu3  ;;  %v8353_v21 = vld [vmem:[%s9118_s26 + $0x24] sm:$0xf]  ;;  %v1356_v34 = vsel %vm9274_vm4, %v1351_v19, %v1355_v8 }
 0x1f0   : > { %v1645_v18 = vpop.f32.mrf.mxu1  ;;  %v5420_v17 = vshrl.u32 %v8353_v21, 16 }
 0x1f1   : > { %v2978_v50 = vadd.f32 %v2898_v43, %v2447_v20  ;;  %v1723_v2 = vadd.f32 %v1645_v18, %v9470_v6  ;;  %v5407_v6 = vshrl.u32 %v8352_v14, 16  ;;  %v5416_v20 = vshll.u32 %v8353_v21, 16  ;;  %v8032_v21 = vld [vmem:[%s9118_s26 + $0x10] sm:$0xe] }
 0x1f2   : > { %v3943_v5 = vpop.f32.mrf.mxu0  ;;  %v1469_v18 = vunpack.c.l.b16 %v1356_v34  ;;  %v5422_v8 = vrot.slane %v5420_v17, 4 }
 0x1f3   : > { %1684 = vmatmul.bf16.gmra.mxu1 %v1492_v11  ;;  %2409 = vmatmul.bf16.gmra.mxu2 %v2217_v9  ;;  %v10267_v1 = vadd.f32 %v3940_v27, %v2978_v50  ;;  %v2081_v11 = vsel %vm9279_vm5, %v2079_v10, %v2080_v44  ;;  %v5409_v26 = vrot.slane %v5407_v6, 4  ;;  %v5418_v22 = vrot.slane %v5416_v20, 5  ;;  %v8465_v10 = vld [vmem:[%s9118_s26 + $0x24] sm:$0xf]  ;;  %v10297_v6 = vld [vmem:[%s9118_s26 + $0x28] sm:$0xf] }
 0x1f4   : > { %2940 = vmatmul.bf16.gmra.mxu3 %v7883_v63  ;;  %v2193_v63 = vunpack.c.l.b16 %v2078_v29  ;;  %v1493_v39 = vpack.c.b16 %v1469_v18, %v1468_v56  ;;  %v6514_v34 = vrot.slane %v8465_v10, 5  ;;  %v6517_v18 = vrot.slane %v10297_v6, 5 }
 0x1f5   : > { %3982 = vmatmul.bf16.gmra.mxu0 %v3790_v35  ;;  %v2194_v35 = vunpack.c.l.b16 %v2081_v11  ;;  %v5413_v54 = vor.u32 %v5412_v60, %v5409_v26  ;;  %v5423_v29 = vor.u32 %v5422_v8, %v5418_v22  ;;  %v8464_v11 = vld [vmem:[%s9118_s26 + $0x20] sm:$0xe]  ;;  %v5430_v60 = vshrl.u32 %v8354_v33, 16 }
 0x1f6   : > { %v2370_v42 = vpop.f32.mrf.mxu2  ;;  %v8528_v16 = vrot.slane %v8464_v11, 9  ;;  %v6516_v56 = vrot.slane %v6514_v34, 4  ;;  %v8357_v11 = vld [vmem:[%s9118_s26 + $0x34] sm:$0xf] }
 0x1f7   : > { %v2448_v52 = vadd.f32 %v2370_v42, %v1723_v2  ;;  %v2901_v27 = vpop.f32.mrf.mxu3  ;;  %v2218_v14 = vpack.c.b16 %v2194_v35, %v2193_v63  ;;  %v4219_v2 = vrot.slane %v8033_v32, 5  ;;  %v10293_v42 = vld [vmem:[%s9118_s26 + $0x18] sm:$0xf]  ;;  %v5414_v20 = vrot.slane %v5413_v54, 4  ;;  %v8356_v63 = vld [vmem:[%s9118_s26 + $0x30] sm:$0xf] }
 0x1f8   : > { %v1647_v4 = vpop.f32.mrf.mxu1  ;;  %v4222_v47 = vrot.slane %v10293_v42, 5  ;;  %v5424_v17 = vrot.slane %v5423_v29, 4  ;;  %v5441_v10 = vshrl.u32 %v8356_v63, 16 }
 0x1f9   : > { %v2979_v43 = vadd.f32 %v2901_v27, %v2448_v52  ;;  %v5426_v52 = vshll.u32 %v8354_v33, 16  ;;  %v8096_v4 = vrot.slane %v8032_v21, 9  ;;  %v4221_v31 = vrot.slane %v4219_v2, 4 }
 0x1fa   : > { %v3945_v9 = vpop.f32.mrf.mxu0  ;;  %v6518_v33 = vsel %vm9279_vm5, %v6516_v56, %v6517_v18  ;;  %v5432_v21 = vrot.slane %v5430_v60, 4  ;;  %v8691_v56 = vld [vmem:[%s9118_s26 + $0x20] sm:$0xff] }
 0x1fb   : > { %v10285_v50 = vadd.f32 %v3943_v5, %v2979_v43  ;;  %v3791_v5 = vpack.c.b16 %v3767_v0, %v3766_v48  ;;  %v10300_v43 = vrot.slane %v5426_v52, 5  ;;  %v4220_v0 = vsel %vm9279_vm5, %v8096_v4, %v4219_v2  ;;  %v8355_v52 = vld [vmem:[%s9118_s26 + $0x2c] sm:$0x1]  ;;  %v10329_v60 = vld [vmem:[%s9118_s26 + $0x24] sm:$0xf] }
 0x1fc   : > { %v4223_v32 = vsel %vm9279_vm5, %v4221_v31, %v4222_v47  ;;  %v6515_v2 = vsel %vm9279_vm5, %v8528_v16, %v6514_v34  ;;  %v6738_v29 = vunpack.c.l.b16 %v6518_v33  ;;  %v5443_v34 = vrot.slane %v5441_v10, 4 }
 0x1fd   : > { %v6737_v54 = vunpack.c.l.b16 %v6515_v2  ;;  %v4224_v10 = vrot.slane %v4222_v47, 4  ;;  %v10335_v2 = vld [vmem:[%s9118_s26 + $0x34] sm:$0xf]  ;;  %v6519_v47 = vrot.slane %v6517_v18, 4 }
 0x1fe   : > { %v2372_v19 = vpop.f32.mrf.mxu2 }
 0x1ff   : > { %v2903_v44 = vpop.f32.mrf.mxu3  ;;  %v5419_v19 = vsel %vm9274_vm4, %v5414_v20, %v5418_v22  ;;  %v4443_v22 = vunpack.c.l.b16 %v4223_v32  ;;  %v8036_v32 = vld [vmem:[%s9118_s26 + $0x20] sm:$0xe] }
 0x200   : > { %v1650_v28 = vpop.f32.mrf.mxu1  ;;  %v5444_v44 = vshll.u32 %v8356_v63, 16  ;;  %v5450_v63 = vshll.u32 %v8357_v11, 16 }
 0x201   : > { %v1725_v9 = vadd.f32 %v1650_v28, %v9512_v30  ;;  %v5429_v30 = vsel %vm9274_vm4, %v5424_v17, %v10300_v43  ;;  %v4442_v28 = vunpack.c.l.b16 %v4220_v0  ;;  %v8035_v0 = vld [vmem:[%s9118_s26 + $0x1c] sm:$0x1] }
 0x202   : > { %v3948_v27 = vpop.f32.mrf.mxu0  ;;  %v5446_v4 = vrot.slane %v5444_v44, 5  ;;  %v8467_v44 = vld [vmem:[%s9118_s26 + $0x2c] sm:$0x1]  ;;  %v4225_v33 = vrot.slane %v8035_v0, 5 }
 0x203   : > { %1689 = vmatmul.bf16.gmra.mxu1 %v1493_v39  ;;  %2414 = vmatmul.bf16.gmra.mxu2 %v2218_v14  ;;  %v4490_v16 = vpack.c.b16 %v4443_v22, %v4442_v28  ;;  %v8097_v28 = vrot.slane %v8036_v32, 9  ;;  %v4229_v22 = vrot.slane %v10329_v60, 5 }
 0x204   : > { %2945 = vmatmul.bf16.gmra.mxu3 %v8666_v49  ;;  %v6015_v49 = vunpack.c.l.b16 %v5419_v19 }
 0x205   : > { %3987 = vmatmul.bf16.gmra.mxu0 %v3791_v5  ;;  %v6016_v5 = vunpack.c.l.b16 %v5429_v30  ;;  %v4230_v6 = vsel %vm9279_vm5, %v8097_v28, %v4229_v22 }
 0x206   : > { %v2375_v35 = vpop.f32.mrf.mxu2 }
 0x207   : > { %v2450_v48 = vadd.f32 %v2375_v35, %v1725_v9  ;;  %v2906_v26 = vpop.f32.mrf.mxu3 }
 0x208   : > { %v1652_v8 = vpop.f32.mrf.mxu1 }
 0x209   : > { %v2981_v39 = vadd.f32 %v2906_v26, %v2450_v48  ;;  %v1726_v31 = vadd.f32 %v1652_v8, %v9540_v15  ;;  %v6063_v48 = vpack.c.b16 %v6016_v5, %v6015_v49  ;;  %v6785_v26 = vpack.c.b16 %v6738_v29, %v6737_v54  ;;  %v8358_v49 = vld [vmem:[%s9118_s26 + $0x38] sm:$0xf] }
 0x20a   : > { %v3950_v14 = vpop.f32.mrf.mxu0  ;;  %v5433_v15 = vor.u32 %v5432_v21, %v10300_v43  ;;  %v5447_v8 = vor.u32 %v5446_v4, %v5443_v34  ;;  %v5452_v29 = vrot.slane %v5450_v63, 5  ;;  %v6524_v4 = vrot.slane %v10335_v2, 5 }
 0x20b   : > { %v10320_v42 = vadd.f32 %v3948_v27, %v2981_v39  ;;  %v5436_v27 = vshll.u32 %v8355_v52, 16  ;;  %v8468_v39 = vld [vmem:[%s9118_s26 + $0x30] sm:$0xe]  ;;  %v6520_v52 = vrot.slane %v8467_v44, 5 }
 0x20c   : > { %v5434_v43 = vrot.slane %v5433_v15, 4  ;;  %v5448_v54 = vrot.slane %v5447_v8, 4  ;;  %v8529_v34 = vrot.slane %v8468_v39, 9  ;;  %v4445_v15 = vunpack.c.l.b16 %v4230_v6  ;;  %v8359_v8 = vld [vmem:[%s9118_s26 + $0x3c] sm:$0x1] }
 0x20d   : > { %v5438_v21 = vrot.slane %v5436_v27, 5  ;;  %v6521_v63 = vsel %vm9279_vm5, %v6519_v47, %v6520_v52  ;;  %v5470_v47 = vshll.u32 %v8359_v8, 16 }
 0x20e   : > { %v2377_v20 = vpop.f32.mrf.mxu2  ;;  %v6739_v39 = vunpack.c.l.b16 %v6521_v63 }
 0x20f   : > { %v2451_v17 = vadd.f32 %v2377_v20, %v1726_v31  ;;  %v2908_v9 = vpop.f32.mrf.mxu3  ;;  %v5454_v20 = vshrl.u32 %v8357_v11, 16  ;;  %v5439_v27 = vsel %vm9274_vm4, %v5434_v43, %v5438_v21  ;;  %v5453_v11 = vsel %vm9274_vm4, %v5448_v54, %v5452_v29 }
 0x210   : > { %v1655_v35 = vpop.f32.mrf.mxu1  ;;  %v6018_v44 = vunpack.c.l.b16 %v5453_v11 }
 0x211   : > { %v2982_v19 = vadd.f32 %v2908_v9, %v2451_v17  ;;  %v5460_v17 = vshll.u32 %v8358_v49, 16  ;;  %v5464_v9 = vshrl.u32 %v8358_v49, 16  ;;  %v6525_v35 = vsel %vm9279_vm5, %v8529_v34, %v6524_v4 }
 0x212   : > { %v3953_v30 = vpop.f32.mrf.mxu0  ;;  %v6740_v2 = vunpack.c.l.b16 %v6525_v35 }
 0x213   : > { %4594 = vmatmul.bf16.vlgmr.msra.gmra.mxu1 %v4490_v16  ;;  %5125 = vmatmul.bf16.vlgmr.msra.gmra.mxu2 %v8691_v56  ;;  %v10339_v5 = vadd.f32 %v3950_v14, %v2982_v19  ;;  %v4226_v56 = vsel %vm9279_vm5, %v4224_v10, %v4225_v33  ;;  %v10357_v0 = vrot.slane %v5460_v17, 5  ;;  %v5466_v32 = vrot.slane %v5464_v9, 4  ;;  %v8230_v19 = vld [vmem:[%s9118_s26 + $0x28] sm:$0xf]  ;;  %v8692_v30 = vld [vmem:[%s9118_s26 + $0x2c] sm:$0xf0] }
 0x214   : > { %6167 = vmatmul.bf16.vlgmr.msra.gmra.mxu3 %v6063_v48  ;;  %v8038_v48 = vld [vmem:[%s9118_s26 + $0x28] sm:$0xf]  ;;  %v4444_v60 = vunpack.c.l.b16 %v4226_v56  ;;  %v6017_v10 = vunpack.c.l.b16 %v5439_v27  ;;  %v8470_v33 = vld [vmem:[%s9118_s26 + $0x38] sm:$0xf]  ;;  %v8039_v17 = vld [vmem:[%s9118_s26 + $0x2c] sm:$0x1]  ;;  %v6786_v6 = vpack.c.b16 %v6740_v2, %v6739_v39 }
 0x215   : > { %6889 = vmatmul.bf16.vlgmr.msra.gmra.mxu0 %v6785_v26  ;;  %v5456_v26 = vrot.slane %v5454_v20, 4  ;;  %v4232_v49 = vrot.slane %v8038_v48, 5  ;;  %v5467_v54 = vor.u32 %v5466_v32, %v10357_v0  ;;  %v8231_v20 = vor.u32 %v8692_v30, %v8230_v19  ;;  %v8471_v27 = vld [vmem:[%s9118_s26 + $0x3c] sm:$0x1]  ;;  %v8360_v30 = vld [vmem:[%s9118_s26 + $0x40] sm:$0xf] }
 0x216   : > { %v2380_v31 = vpop.f32.mrf.mxu2  ;;  %v6527_v9 = vrot.slane %v8470_v33, 5  ;;  %v6064_v56 = vpack.c.b16 %v6018_v44, %v6017_v10  ;;  %v6526_v32 = vrot.slane %v6524_v4, 4  ;;  %v8361_v10 = vld [vmem:[%s9118_s26 + $0x44] sm:$0xf] }
 0x217   : > { %v2911_v14 = vpop.f32.mrf.mxu3  ;;  %v5457_v21 = vor.u32 %v5456_v26, %v5452_v29  ;;  %v4491_v31 = vpack.c.b16 %v4445_v15, %v4444_v60  ;;  %v4235_v29 = vrot.slane %v8039_v17, 5  ;;  %v5468_v48 = vrot.slane %v5467_v54, 4 }
 0x218   : > { %v1657_v16 = vpop.f32.mrf.mxu1  ;;  %v5472_v26 = vrot.slane %v5470_v47, 5  ;;  %v6529_v60 = vrot.slane %v6527_v9, 4  ;;  %v6530_v15 = vrot.slane %v8471_v27, 5  ;;  %v5484_v54 = vshll.u32 %v8361_v10, 16 }
 0x219   : > { %v1728_v28 = vadd.f32 %v1657_v16, %v9587_v62  ;;  %v4231_v62 = vrot.slane %v4229_v22, 4  ;;  %v4234_v16 = vrot.slane %v4232_v49, 4  ;;  %v5458_v35 = vrot.slane %v5457_v21, 4 }
 0x21a   : > { %v3955_v18 = vpop.f32.mrf.mxu0  ;;  %v5473_v33 = vsel %vm9274_vm4, %v5468_v48, %v5472_v26  ;;  %v5478_v21 = vshll.u32 %v8360_v30, 16  ;;  %v5488_v47 = vshrl.u32 %v8361_v10, 16  ;;  %v8473_v48 = vld [vmem:[%s9118_s26 + $0x44] sm:$0xf] }
 0x21b   : > { %v4233_v44 = vsel %vm9279_vm5, %v4231_v62, %v4232_v49  ;;  %v4236_v39 = vsel %vm9279_vm5, %v4234_v16, %v4235_v29  ;;  %v5463_v4 = vsel %vm9274_vm4, %v5458_v35, %v10357_v0  ;;  %v6020_v17 = vunpack.c.l.b16 %v5473_v33  ;;  %v8362_v29 = vld [vmem:[%s9118_s26 + $0x48] sm:$0xf] }
 0x21c   : > { %v5486_v62 = vrot.slane %v5484_v54, 5  ;;  %v5490_v16 = vrot.slane %v5488_v47, 4 }
 0x21e   : > { %v2382_v43 = vpop.f32.mrf.mxu2 }
 0x21f   : > { %v2453_v52 = vadd.f32 %v2382_v43, %v1728_v28  ;;  %v2913_v34 = vpop.f32.mrf.mxu3  ;;  %v6531_v28 = vsel %vm9279_vm5, %v6529_v60, %v6530_v15  ;;  %v5475_v43 = vshrl.u32 %v8360_v30, 16  ;;  %v8693_v60 = vld [vmem:[%s9118_s26 + $0x34] sm:$0xff] }
 0x220   : > { %v1660_v14 = vpop.f32.mrf.mxu1 }
 0x221   : > { %v2984_v11 = vadd.f32 %v2913_v34, %v2453_v52  ;;  %v1729_v19 = vadd.f32 %v1660_v14, %v9610_v59  ;;  %v6528_v59 = vsel %vm9279_vm5, %v6526_v32, %v6527_v9  ;;  %v4446_v34 = vunpack.c.l.b16 %v4233_v44 }
 0x222   : > { %v3958_v63 = vpop.f32.mrf.mxu0  ;;  %v6741_v9 = vunpack.c.l.b16 %v6528_v59  ;;  %v6742_v14 = vunpack.c.l.b16 %v6531_v28  ;;  %v5477_v27 = vrot.slane %v5475_v43, 4  ;;  %v8472_v59 = vld [vmem:[%s9118_s26 + $0x40] sm:$0xe]  ;;  %v10397_v28 = vld [vmem:[%s9118_s26 + $0x48] sm:$0xf] }
 0x223   : > { %4599 = vmatmul.bf16.gmra.mxu1 %v4491_v31  ;;  %5130 = vmatmul.bf16.gmra.mxu2 %v8231_v20  ;;  %v10367_v8 = vadd.f32 %v3955_v18, %v2984_v11  ;;  %v4447_v31 = vunpack.c.l.b16 %v4236_v39  ;;  %v6019_v20 = vunpack.c.l.b16 %v5463_v4  ;;  %v5480_v11 = vrot.slane %v5478_v21, 5 }
 0x224   : > { %6172 = vmatmul.bf16.gmra.mxu3 %v6064_v56  ;;  %v5491_v39 = vor.u32 %v5490_v16, %v5486_v62  ;;  %v5494_v4 = vshll.u32 %v8362_v29, 16 }
 0x225   : > { %6894 = vmatmul.bf16.gmra.mxu0 %v6786_v6  ;;  %v8041_v6 = vld [vmem:[%s9118_s26 + $0x34] sm:$0xf]  ;;  %v4492_v32 = vpack.c.b16 %v4447_v31, %v4446_v34  ;;  %v6065_v15 = vpack.c.b16 %v6020_v17, %v6019_v20  ;;  %v5481_v44 = vor.u32 %v5480_v11, %v5477_v27  ;;  %v8530_v34 = vrot.slane %v8472_v59, 9  ;;  %v8363_v59 = vld [vmem:[%s9118_s26 + $0x4c] sm:$0x1] }
 0x226   : > { %v2385_v22 = vpop.f32.mrf.mxu2  ;;  %v4239_v30 = vrot.slane %v8041_v6, 5  ;;  %v5492_v54 = vrot.slane %v5491_v39, 4  ;;  %v5496_v47 = vrot.slane %v5494_v4, 5  ;;  %v6537_v20 = vrot.slane %v10397_v28, 5 }
 0x227   : > { %v2454_v2 = vadd.f32 %v2385_v22, %v1729_v19  ;;  %v2916_v18 = vpop.f32.mrf.mxu3  ;;  %v8040_v19 = vld [vmem:[%s9118_s26 + $0x30] sm:$0xe]  ;;  %v10393_v22 = vld [vmem:[%s9118_s26 + $0x38] sm:$0xf]  ;;  %v5482_v21 = vrot.slane %v5481_v44, 4 }
 0x228   : > { %v1662_v49 = vpop.f32.mrf.mxu1  ;;  %v8098_v33 = vrot.slane %v8040_v19, 9  ;;  %v4242_v43 = vrot.slane %v10393_v22, 5 }
 0x229   : > { %v2985_v52 = vadd.f32 %v2916_v18, %v2454_v2  ;;  %v6534_v18 = vrot.slane %v8473_v48, 5  ;;  %v4241_v49 = vrot.slane %v4239_v30, 4 }
 0x22a   : > { %v3960_v0 = vpop.f32.mrf.mxu0 }
 0x22b   : > { %v10385_v56 = vadd.f32 %v3958_v63, %v2985_v52  ;;  %v6787_v63 = vpack.c.b16 %v6742_v14, %v6741_v9  ;;  %v8364_v52 = vld [vmem:[%s9118_s26 + $0x50] sm:$0xf]  ;;  %v6536_v31 = vrot.slane %v6534_v18, 4  ;;  %v4240_v9 = vsel %vm9279_vm5, %v8098_v33, %v4239_v30 }
 0x22c   : > { %v5498_v14 = vshrl.u32 %v8362_v29, 16  ;;  %v4243_v11 = vsel %vm9279_vm5, %v4241_v49, %v4242_v43  ;;  %v5509_v16 = vshrl.u32 %v8364_v52, 16  ;;  %v6535_v29 = vsel %vm9279_vm5, %v8530_v34, %v6534_v18  ;;  %v8365_v18 = vld [vmem:[%s9118_s26 + $0x54] sm:$0xf] }
 0x22d   : > { %v4448_v19 = vunpack.c.l.b16 %v4240_v9  ;;  %v4449_v30 = vunpack.c.l.b16 %v4243_v11  ;;  %v6743_v4 = vunpack.c.l.b16 %v6535_v29  ;;  %v5504_v9 = vshll.u32 %v8363_v59, 16 }
 0x22e   : > { %v2387_v35 = vpop.f32.mrf.mxu2 }
 0x22f   : > { %v2918_v26 = vpop.f32.mrf.mxu3  ;;  %v5512_v35 = vshll.u32 %v8364_v52, 16  ;;  %v8044_v52 = vld [vmem:[%s9118_s26 + $0x40] sm:$0xe] }
 0x230   : > { %v1665_v10 = vpop.f32.mrf.mxu1 }
 0x231   : > { %v1731_v0 = vadd.f32 %v1665_v10, %v9386_v53  ;;  %v5487_v53 = vsel %vm9274_vm4, %v5482_v21, %v5486_v62  ;;  %v5500_v10 = vrot.slane %v5498_v14, 4  ;;  %v5514_v62 = vrot.slane %v5512_v35, 5 }
 0x232   : > { %v3963_v2 = vpop.f32.mrf.mxu0  ;;  %v6021_v44 = vunpack.c.l.b16 %v5487_v53  ;;  %v4493_v21 = vpack.c.b16 %v4449_v30, %v4448_v19  ;;  %v10430_v19 = vld [vmem:[%s9118_s26 + $0x54] sm:$0xf]  ;;  %v5506_v30 = vrot.slane %v5504_v9, 5 }
 0x233   : > { %4604 = vmatmul.bf16.gmra.mxu1 %v4492_v32  ;;  %5135 = vmatmul.bf16.gmra.mxu2 %v8693_v60  ;;  %v5497_v60 = vsel %vm9274_vm4, %v5492_v54, %v5496_v47  ;;  %v8043_v54 = vld [vmem:[%s9118_s26 + $0x3c] sm:$0x1] }
 0x234   : > { %6177 = vmatmul.bf16.gmra.mxu3 %v6065_v15  ;;  %v6538_v15 = vsel %vm9279_vm5, %v6536_v31, %v6537_v20  ;;  %v6022_v39 = vunpack.c.l.b16 %v5497_v60  ;;  %v4245_v53 = vrot.slane %v8043_v54, 5 }
 0x235   : > { %6899 = vmatmul.bf16.gmra.mxu0 %v6787_v63  ;;  %v5511_v63 = vrot.slane %v5509_v16, 4  ;;  %v6744_v33 = vunpack.c.l.b16 %v6538_v15  ;;  %v8476_v15 = vld [vmem:[%s9118_s26 + $0x50] sm:$0xe] }
 0x236   : > { %v2390_v17 = vpop.f32.mrf.mxu2  ;;  %v6066_v11 = vpack.c.b16 %v6022_v39, %v6021_v44  ;;  %v8531_v39 = vrot.slane %v8476_v15, 9  ;;  %v8367_v15 = vld [vmem:[%s9118_s26 + $0x5c] sm:$0x1] }
 0x237   : > { %v2456_v6 = vadd.f32 %v2390_v17, %v1731_v0  ;;  %v2921_v27 = vpop.f32.mrf.mxu3  ;;  %v5501_v0 = vor.u32 %v5500_v10, %v5496_v47  ;;  %v8694_v17 = vld [vmem:[%s9118_s26 + $0x40] sm:$0xff]  ;;  %v5515_v14 = vor.u32 %v5514_v62, %v5511_v63  ;;  %v6788_v16 = vpack.c.b16 %v6744_v33, %v6743_v4  ;;  %v8475_v47 = vld [vmem:[%s9118_s26 + $0x4c] sm:$0x1]  ;;  %v8366_v33 = vld [vmem:[%s9118_s26 + $0x58] sm:$0xf] }
 0x238   : > { %v1667_v48 = vpop.f32.mrf.mxu1  ;;  %v6540_v44 = vrot.slane %v8475_v47, 5  ;;  %v6544_v4 = vrot.slane %v10430_v19, 5  ;;  %v11196_v47 = vld [vmem:[#allocation6_spill] sm:$0xff] }
 0x239   : > { %v2987_v26 = vadd.f32 %v2921_v27, %v2456_v6  ;;  %v1732_v28 = vadd.f32 %v1667_v48, %v9411_v23  ;;  %v5518_v6 = vshll.u32 %v8365_v18, 16  ;;  %v4244_v48 = vrot.slane %v4242_v43, 4 }
 0x23a   : > { %v3965_v32 = vpop.f32.mrf.mxu0  ;;  %v5502_v29 = vrot.slane %v5501_v0, 4  ;;  %v5516_v10 = vrot.slane %v5515_v14, 4  ;;  %v6539_v43 = vrot.slane %v6537_v20, 4 }
 0x23b   : > { %v10415_v22 = vadd.f32 %v3963_v2, %v2987_v26  ;;  %v10424_v2 = vld [vmem:[%s9118_s26 + $0x44] sm:$0xf]  ;;  %v8099_v26 = vrot.slane %v8044_v52, 9  ;;  %v10432_v63 = vrot.slane %v5518_v6, 5  ;;  %v5522_v52 = vshrl.u32 %v8365_v18, 16 }
 0x23c   : > { %v4249_v60 = vrot.slane %v10424_v2, 5  ;;  %v6541_v0 = vsel %vm9279_vm5, %v6539_v43, %v6540_v44  ;;  %v6545_v2 = vsel %vm9279_vm5, %v8531_v39, %v6544_v4  ;;  %v8242_v6 = vld [vmem:[%s9118_s26 + $0x48] sm:$0xf]  ;;  %v8695_v18 = vld [vmem:[%s9118_s26 + $0x4c] sm:$0xf0] }
 0x23d   : > { %v5521_v20 = vsel %vm9274_vm4, %v5516_v10, %v10432_v63  ;;  %v8478_v10 = vld [vmem:[%s9118_s26 + $0x58] sm:$0xf] }
 0x23e   : > { %v2392_v49 = vpop.f32.mrf.mxu2 }
 0x23f   : > { %v2457_v34 = vadd.f32 %v2392_v49, %v1732_v28  ;;  %v2923_v31 = vpop.f32.mrf.mxu3  ;;  %v4246_v49 = vsel %vm9279_vm5, %v4244_v48, %v4245_v53  ;;  %v5524_v48 = vrot.slane %v5522_v52, 4  ;;  %v5538_v52 = vshll.u32 %v8367_v15, 16 }
 0x240   : > { %v1670_v27 = vpop.f32.mrf.mxu1  ;;  %v4450_v9 = vunpack.c.l.b16 %v4246_v49 }
 0x241   : > { %v2988_v23 = vadd.f32 %v2923_v31, %v2457_v34  ;;  %v5528_v34 = vshll.u32 %v8366_v33, 16  ;;  %v5532_v31 = vshrl.u32 %v8366_v33, 16  ;;  %v8243_v33 = vor.u32 %v8695_v18, %v8242_v6 }
 0x242   : > { %v3968_v35 = vpop.f32.mrf.mxu0 }
 0x243   : > { %4609 = vmatmul.bf16.gmra.mxu1 %v4493_v21  ;;  %5140 = vmatmul.bf16.gmra.mxu2 %v8694_v17  ;;  %v10434_v62 = vadd.f32 %v3965_v32, %v2988_v23  ;;  %v4250_v21 = vsel %vm9279_vm5, %v8099_v26, %v4249_v60  ;;  %v5507_v32 = vsel %vm9274_vm4, %v5502_v29, %v5506_v30  ;;  %v8046_v23 = vld [vmem:[%s9118_s26 + $0x48] sm:$0xf]  ;;  %v6746_v35 = vunpack.c.l.b16 %v6545_v2 }
 0x244   : > { %6182 = vmatmul.bf16.gmra.mxu3 %v6066_v11  ;;  %v4451_v14 = vunpack.c.l.b16 %v4250_v21  ;;  %v6023_v27 = vunpack.c.l.b16 %v5507_v32  ;;  %v6024_v11 = vunpack.c.l.b16 %v5521_v20  ;;  %v10454_v53 = vrot.slane %v5528_v34, 5 }
 0x245   : > { %6904 = vmatmul.bf16.gmra.mxu0 %v6788_v16  ;;  %v6745_v16 = vunpack.c.l.b16 %v6541_v0  ;;  %v5534_v26 = vrot.slane %v5532_v31, 4  ;;  %v4252_v30 = vrot.slane %v8046_v23, 5  ;;  %v5525_v32 = vor.u32 %v5524_v48, %v10432_v63 }
 0x246   : > { %v2395_v59 = vpop.f32.mrf.mxu2  ;;  %v4494_v39 = vpack.c.b16 %v4451_v14, %v4450_v9  ;;  %v6547_v34 = vrot.slane %v8478_v10, 5  ;;  %v4251_v31 = vrot.slane %v4249_v60, 4  ;;  %v8368_v9 = vld [vmem:[%s9118_s26 + $0x60] sm:$0xf] }
 0x247   : > { %v2926_v28 = vpop.f32.mrf.mxu3  ;;  %v6067_v59 = vpack.c.b16 %v6024_v11, %v6023_v27  ;;  %v6789_v21 = vpack.c.b16 %v6746_v35, %v6745_v16  ;;  %v5535_v20 = vor.u32 %v5534_v26, %v10454_v53  ;;  %v4254_v2 = vrot.slane %v4252_v30, 4  ;;  %v8369_v11 = vld [vmem:[%s9118_s26 + $0x64] sm:$0xf]  ;;  %v11198_v16 = vld [vmem:[#allocation7_spill] sm:$0xff] }
 0x248   : > { %v1672_v54 = vpop.f32.mrf.mxu1  ;;  %v8047_v28 = vld [vmem:[%s9118_s26 + $0x4c] sm:$0x1]  ;;  %v5526_v6 = vrot.slane %v5525_v32, 4  ;;  %v5540_v27 = vrot.slane %v5538_v52, 5  ;;  %v6546_v35 = vrot.slane %v6544_v4, 4  ;;  %v6549_v48 = vrot.slane %v6547_v34, 4 }
 0x249   : > { %v1734_v29 = vadd.f32 %v1672_v54, %v11196_v47  ;;  %v4255_v23 = vrot.slane %v8047_v28, 5  ;;  %v8479_v47 = vld [vmem:[%s9118_s26 + $0x5c] sm:$0x1]  ;;  %v5536_v63 = vrot.slane %v5535_v20, 4 }
 0x24a   : > { %v3970_v17 = vpop.f32.mrf.mxu0  ;;  %v6550_v26 = vrot.slane %v8479_v47, 5  ;;  %v5531_v4 = vsel %vm9274_vm4, %v5526_v6, %v10454_v53 }
 0x24b   : > { %v4256_v15 = vsel %vm9279_vm5, %v4254_v2, %v4255_v23  ;;  %v6025_v47 = vunpack.c.l.b16 %v5531_v4 }
 0x24c   : > { %v4453_v20 = vunpack.c.l.b16 %v4256_v15 }
 0x24e   : > { %v2397_v19 = vpop.f32.mrf.mxu2 }
 0x24f   : > { %v2459_v43 = vadd.f32 %v2397_v19, %v1734_v29  ;;  %v2928_v44 = vpop.f32.mrf.mxu3  ;;  %v4253_v29 = vsel %vm9279_vm5, %v4251_v31, %v4252_v30  ;;  %v5541_v30 = vsel %vm9274_vm4, %v5536_v63, %v5540_v27  ;;  %v8370_v63 = vld [vmem:[%s9118_s26 + $0x68] sm:$0xf] }
 0x250   : > { %v1675_v49 = vpop.f32.mrf.mxu1  ;;  %v4452_v32 = vunpack.c.l.b16 %v4253_v29 }
 0x251   : > { %v2990_v54 = vadd.f32 %v2928_v44, %v2459_v43  ;;  %v1735_v18 = vadd.f32 %v1675_v49, %v11198_v16  ;;  %v5546_v43 = vshll.u32 %v8368_v9, 16  ;;  %v5552_v44 = vshll.u32 %v8369_v11, 16 }
 0x252   : > { %v3973_v0 = vpop.f32.mrf.mxu0  ;;  %v6548_v49 = vsel %vm9279_vm5, %v6546_v35, %v6547_v34 }
 0x253   : > { %4614 = vmatmul.bf16.gmra.mxu1 %v4494_v39  ;;  %5145 = vmatmul.bf16.gmra.mxu2 %v8243_v33  ;;  %v10464_v14 = vadd.f32 %v3970_v17, %v2990_v54  ;;  %v5543_v17 = vshrl.u32 %v8368_v9, 16  ;;  %v5556_v39 = vshrl.u32 %v8369_v11, 16  ;;  %v8049_v54 = vld [vmem:[%s9118_s26 + $0x54] sm:$0xf]  ;;  %v5548_v53 = vrot.slane %v5546_v43, 5 }
 0x254   : > { %6187 = vmatmul.bf16.gmra.mxu3 %v6067_v59  ;;  %v5554_v31 = vrot.slane %v5552_v44, 5  ;;  %v6026_v9 = vunpack.c.l.b16 %v5541_v30  ;;  %v6747_v6 = vunpack.c.l.b16 %v6548_v49  ;;  %v8048_v11 = vld [vmem:[%s9118_s26 + $0x50] sm:$0xe]  ;;  %v4259_v16 = vrot.slane %v8049_v54, 5 }
 0x255   : > { %11197 = vst [vmem:[#allocation6_spill] sm:$0xff] %v10464_v14  ;;  %6909 = vmatmul.bf16.gmra.mxu0 %v6789_v21  ;;  %v6551_v21 = vsel %vm9279_vm5, %v6549_v48, %v6550_v26  ;;  %v5545_v52 = vrot.slane %v5543_v17, 4  ;;  %v5558_v2 = vrot.slane %v5556_v39, 4  ;;  %v4495_v48 = vpack.c.b16 %v4453_v20, %v4452_v32  ;;  %v8696_v26 = vld [vmem:[%s9118_s26 + $0x54] sm:$0xff] }
 0x256   : > { %v2400_v60 = vpop.f32.mrf.mxu2  ;;  %v6748_v34 = vunpack.c.l.b16 %v6551_v21  ;;  %v8100_v44 = vrot.slane %v8048_v11, 9  ;;  %v11200_v32 = vld [vmem:[#allocation8_spill] sm:$0xff] }
 0x257   : > { %v2460_v19 = vadd.f32 %v2400_v60, %v1735_v18  ;;  %v2931_v10 = vpop.f32.mrf.mxu3  ;;  %v8481_v18 = vld [vmem:[%s9118_s26 + $0x64] sm:$0xf]  ;;  %v10489_v60 = vld [vmem:[%s9118_s26 + $0x58] sm:$0xf]  ;;  %v5549_v29 = vor.u32 %v5548_v53, %v5545_v52  ;;  %v5559_v15 = vor.u32 %v5558_v2, %v5554_v31  ;;  %v8372_v2 = vld [vmem:[%s9118_s26 + $0x70] sm:$0xf] }
 0x258   : > { %v1677_v33 = vpop.f32.mrf.mxu1  ;;  %v6554_v39 = vrot.slane %v8481_v18, 5  ;;  %v4262_v4 = vrot.slane %v10489_v60, 5  ;;  %v5580_v60 = vshll.u32 %v8372_v2, 16 }
 0x259   : > { %v2991_v59 = vadd.f32 %v2931_v10, %v2460_v19  ;;  %v6068_v19 = vpack.c.b16 %v6026_v9, %v6025_v47  ;;  %v6790_v10 = vpack.c.b16 %v6748_v34, %v6747_v6  ;;  %v4261_v33 = vrot.slane %v4259_v16, 4 }
 0x25a   : > { %v3975_v28 = vpop.f32.mrf.mxu0  ;;  %v5550_v30 = vrot.slane %v5549_v29, 4  ;;  %v5560_v49 = vrot.slane %v5559_v15, 4  ;;  %v6556_v54 = vrot.slane %v6554_v39, 4  ;;  %v4260_v9 = vsel %vm9279_vm5, %v8100_v44, %v4259_v16 }
 0x25b   : > { %v10482_v23 = vadd.f32 %v3973_v0, %v2991_v59  ;;  %v5562_v0 = vshll.u32 %v8370_v63, 16  ;;  %v8480_v59 = vld [vmem:[%s9118_s26 + $0x60] sm:$0xe]  ;;  %v10494_v28 = vld [vmem:[%s9118_s26 + $0x68] sm:$0xf]  ;;  %v4263_v6 = vsel %vm9279_vm5, %v4261_v33, %v4262_v4 }
 0x25c   : > { %v8532_v52 = vrot.slane %v8480_v59, 9  ;;  %v6557_v53 = vrot.slane %v10494_v28, 5  ;;  %v5555_v11 = vsel %vm9274_vm4, %v5550_v30, %v5554_v31  ;;  %v8371_v30 = vld [vmem:[%s9118_s26 + $0x6c] sm:$0x1] }
 0x25d   : > { %11199 = vst [vmem:[#allocation7_spill] sm:$0xff] %v10482_v23  ;;  %v5564_v21 = vrot.slane %v5562_v0, 5  ;;  %v4454_v0 = vunpack.c.l.b16 %v4260_v9 }
 0x25e   : > { %v2402_v27 = vpop.f32.mrf.mxu2  ;;  %v6555_v16 = vsel %vm9279_vm5, %v8532_v52, %v6554_v39  ;;  %v6558_v31 = vsel %vm9279_vm5, %v6556_v54, %v6557_v53  ;;  %v5582_v39 = vrot.slane %v5580_v60, 5  ;;  %v10522_v60 = vld [vmem:[%s9118_s26 + $0x64] sm:$0xf] }
 0x25f   : > { %v2933_v35 = vpop.f32.mrf.mxu3  ;;  %v5565_v18 = vsel %vm9274_vm4, %v5560_v49, %v5564_v21  ;;  %v6749_v33 = vunpack.c.l.b16 %v6555_v16  ;;  %v6750_v59 = vunpack.c.l.b16 %v6558_v31  ;;  %v8373_v49 = vld [vmem:[%s9118_s26 + $0x74] sm:$0xf] }
 0x260   : > { %v1680_v17 = vpop.f32.mrf.mxu1  ;;  %v5566_v35 = vshrl.u32 %v8370_v63, 16  ;;  %v6028_v63 = vunpack.c.l.b16 %v5565_v18  ;;  %v5586_v18 = vshll.u32 %v8373_v49, 16 }
 0x261   : > { %v1737_v20 = vadd.f32 %v1680_v17, %v11200_v32  ;;  %v4455_v17 = vunpack.c.l.b16 %v4263_v6 }
 0x262   : > { %v3978_v43 = vpop.f32.mrf.mxu0 }
 0x263   : > { %4619 = vmatmul.bf16.gmra.mxu1 %v4495_v48  ;;  %5150 = vmatmul.bf16.gmra.mxu2 %v8696_v26  ;;  %v5577_v26 = vshrl.u32 %v8372_v2, 16  ;;  %v8051_v2 = vld [vmem:[%s9118_s26 + $0x5c] sm:$0x1] }
 0x264   : > { %6192 = vmatmul.bf16.gmra.mxu3 %v6068_v19  ;;  %v6027_v19 = vunpack.c.l.b16 %v5555_v11  ;;  %v5572_v11 = vshll.u32 %v8371_v30, 16  ;;  %v4265_v16 = vrot.slane %v8051_v2, 5 }
 0x265   : > { %6914 = vmatmul.bf16.gmra.mxu0 %v6790_v10  ;;  %v5568_v10 = vrot.slane %v5566_v35, 4  ;;  %v5579_v32 = vrot.slane %v5577_v26, 4  ;;  %v8052_v26 = vld [vmem:[%s9118_s26 + $0x60] sm:$0xe] }
 0x266   : > { %v2405_v47 = vpop.f32.mrf.mxu2  ;;  %v6069_v9 = vpack.c.b16 %v6028_v63, %v6027_v19  ;;  %v8483_v19 = vld [vmem:[%s9118_s26 + $0x6c] sm:$0x1]  ;;  %v8484_v63 = vld [vmem:[%s9118_s26 + $0x70] sm:$0xe] }
 0x267   : > { %v2462_v34 = vadd.f32 %v2405_v47, %v1737_v20  ;;  %v2936_v27 = vpop.f32.mrf.mxu3  ;;  %v11202_v20 = vld [vmem:[#allocation9_spill] sm:$0xff]  ;;  %v4496_v47 = vpack.c.b16 %v4455_v17, %v4454_v0  ;;  %v5583_v31 = vor.u32 %v5582_v39, %v5579_v32  ;;  %v5588_v39 = vrot.slane %v5586_v18, 5 }
 0x268   : > { %v1682_v48 = vpop.f32.mrf.mxu1  ;;  %v6560_v2 = vrot.slane %v8483_v19, 5  ;;  %v8698_v19 = vld [vmem:[%s9118_s26 + $0x6c] sm:$0xf0] }
 0x269   : > { %v2993_v29 = vadd.f32 %v2936_v27, %v2462_v34  ;;  %v1738_v52 = vadd.f32 %v1682_v48, %v11202_v20  ;;  %v5569_v27 = vor.u32 %v5568_v10, %v5564_v21  ;;  %v4264_v48 = vrot.slane %v4262_v4, 4  ;;  %v10527_v20 = vld [vmem:[%s9118_s26 + $0x74] sm:$0xf] }
 0x26a   : > { %v3980_v15 = vpop.f32.mrf.mxu0  ;;  %v8101_v21 = vrot.slane %v8052_v26, 9  ;;  %v4269_v10 = vrot.slane %v10522_v60, 5  ;;  %v5584_v32 = vrot.slane %v5583_v31, 4 }
 0x26b   : > { %v10513_v44 = vadd.f32 %v3978_v43, %v2993_v29  ;;  %v8697_v43 = vld [vmem:[%s9118_s26 + $0x60] sm:$0xff]  ;;  %v6791_v29 = vpack.c.b16 %v6750_v59, %v6749_v33  ;;  %v5570_v30 = vrot.slane %v5569_v27, 4  ;;  %v8374_v33 = vld [vmem:[%s9118_s26 + $0x78] sm:$0xf]  ;;  %v4266_v4 = vsel %vm9279_vm5, %v4264_v48, %v4265_v16 }
 0x26c   : > { %v5574_v59 = vrot.slane %v5572_v11, 5  ;;  %v5600_v27 = vshrl.u32 %v8374_v33, 16  ;;  %v4270_v11 = vsel %vm9279_vm5, %v8101_v21, %v4269_v10  ;;  %v4456_v28 = vunpack.c.l.b16 %v4266_v4  ;;  %v8486_v4 = vld [vmem:[%s9118_s26 + $0x78] sm:$0xf] }
 0x26d   : > { %11201 = vst [vmem:[#allocation8_spill] sm:$0xff] %v10513_v44  ;;  %v4457_v48 = vunpack.c.l.b16 %v4270_v11  ;;  %v8055_v11 = vld [vmem:[%s9118_s26 + $0x6c] sm:$0x1]  ;;  %v8487_v44 = vld [vmem:[%s9118_s26 + $0x7c] sm:$0x1] }
 0x26e   : > { %v2407_v54 = vpop.f32.mrf.mxu2  ;;  %v5602_v31 = vrot.slane %v5600_v27, 4 }
 0x26f   : > { %v2463_v6 = vadd.f32 %v2407_v54, %v1738_v52  ;;  %v2938_v34 = vpop.f32.mrf.mxu3  ;;  %v6559_v52 = vrot.slane %v6557_v53, 4  ;;  %v8533_v54 = vrot.slane %v8484_v63, 9 }
 0x270   : > { %v1685_v35 = vpop.f32.mrf.mxu1 }
 0x271   : > { %v2994_v0 = vadd.f32 %v2938_v34, %v2463_v6  ;;  %v5590_v34 = vshrl.u32 %v8373_v49, 16  ;;  %v5589_v49 = vsel %vm9274_vm4, %v5584_v32, %v5588_v39  ;;  %v6561_v26 = vsel %vm9279_vm5, %v6559_v52, %v6560_v2 }
 0x272   : > { %v3983_v17 = vpop.f32.mrf.mxu0  ;;  %v6751_v21 = vunpack.c.l.b16 %v6561_v26  ;;  %v4497_v2 = vpack.c.b16 %v4457_v48, %v4456_v28  ;;  %v4275_v48 = vrot.slane %v8055_v11, 5 }
 0x273   : > { %4624 = vmatmul.bf16.gmra.mxu1 %v4496_v47  ;;  %5155 = vmatmul.bf16.gmra.mxu2 %v8697_v43  ;;  %v6564_v47 = vrot.slane %v10527_v20, 5  ;;  %v5596_v43 = vshll.u32 %v8374_v33, 16  ;;  %v10538_v35 = vadd.f32 %v3980_v15, %v2994_v0  ;;  %v5592_v15 = vrot.slane %v5590_v34, 4  ;;  %v8254_v0 = vld [vmem:[%s9118_s26 + $0x68] sm:$0xf] }
 0x274   : > { %6197 = vmatmul.bf16.gmra.mxu3 %v6069_v9  ;;  %v8054_v17 = vld [vmem:[%s9118_s26 + $0x68] sm:$0xf]  ;;  %v6030_v20 = vunpack.c.l.b16 %v5589_v49  ;;  %v8375_v33 = vld [vmem:[%s9118_s26 + $0x7c] sm:$0x1] }
 0x275   : > { %6919 = vmatmul.bf16.gmra.mxu0 %v6791_v29  ;;  %11203 = vst [vmem:[#allocation9_spill] sm:$0xff] %v10538_v35  ;;  %v5575_v29 = vsel %vm9274_vm4, %v5570_v30, %v5574_v59  ;;  %v6565_v60 = vsel %vm9279_vm5, %v8533_v54, %v6564_v47  ;;  %v10548_v16 = vrot.slane %v5596_v43, 5  ;;  %v11204_v59 = vld [vmem:[#allocation10_spill] sm:$0xff]  ;;  %v4272_v54 = vrot.slane %v8054_v17, 5 }
 0x276   : > { %v2410_v6 = vpop.f32.mrf.mxu2  ;;  %v6029_v63 = vunpack.c.l.b16 %v5575_v29  ;;  %v6752_v30 = vunpack.c.l.b16 %v6565_v60  ;;  %v5606_v35 = vshll.u32 %v8375_v33, 16  ;;  %v6567_v29 = vrot.slane %v8486_v4, 5  ;;  %v8377_v33 = vld [vmem:[%s9118_s26 + $0x84] sm:$0xf] }
 0x277   : > { %v2941_v9 = vpop.f32.mrf.mxu3  ;;  %v5593_v6 = vor.u32 %v5592_v15, %v5588_v39  ;;  %v5603_v34 = vor.u32 %v5602_v31, %v10548_v16  ;;  %v4274_v28 = vrot.slane %v4272_v54, 4 }
 0x278   : > { %v1687_v18 = vpop.f32.mrf.mxu1  ;;  %v8255_v9 = vor.u32 %v8698_v19, %v8254_v0  ;;  %v6070_v26 = vpack.c.b16 %v6030_v20, %v6029_v63  ;;  %v6792_v60 = vpack.c.b16 %v6752_v30, %v6751_v21  ;;  %v5608_v31 = vrot.slane %v5606_v35, 5  ;;  %v11205_v20 = vld [vmem:[#allocation11_spill] sm:$0xff]  ;;  %v8376_v30 = vld [vmem:[%s9118_s26 + $0x80] sm:$0xf] }
 0x279   : > { %v1740_v32 = vadd.f32 %v1687_v18, %v11204_v59  ;;  %v4271_v18 = vrot.slane %v4269_v10, 4  ;;  %v5594_v39 = vrot.slane %v5593_v6, 4  ;;  %v5604_v15 = vrot.slane %v5603_v34, 4 }
 0x27a   : > { %v3985_v53 = vpop.f32.mrf.mxu0  ;;  %v6566_v0 = vrot.slane %v6564_v47, 4  ;;  %v6569_v17 = vrot.slane %v6567_v29, 4  ;;  %v6570_v19 = vrot.slane %v8487_v44, 5  ;;  %v4276_v59 = vsel %vm9279_vm5, %v4274_v28, %v4275_v48 }
 0x27b   : > { %v4273_v4 = vsel %vm9279_vm5, %v4271_v18, %v4272_v54  ;;  %v5599_v47 = vsel %vm9274_vm4, %v5594_v39, %v10548_v16  ;;  %v5614_v54 = vshll.u32 %v8376_v30, 16  ;;  %v5620_v6 = vshll.u32 %v8377_v33, 16  ;;  %v8057_v18 = vld [vmem:[%s9118_s26 + $0x74] sm:$0xf] }
 0x27c   : > { %v5624_v34 = vshrl.u32 %v8377_v33, 16  ;;  %v6031_v11 = vunpack.c.l.b16 %v5599_v47  ;;  %v4279_v33 = vrot.slane %v8057_v18, 5 }
 0x27d   : > { %v5616_v48 = vrot.slane %v5614_v54, 5  ;;  %v5622_v39 = vrot.slane %v5620_v6, 5 }
 0x27e   : > { %v2412_v52 = vpop.f32.mrf.mxu2  ;;  %v4281_v54 = vrot.slane %v4279_v33, 4 }
 0x27f   : > { %v2465_v43 = vadd.f32 %v2412_v52, %v1740_v32  ;;  %v2943_v27 = vpop.f32.mrf.mxu3  ;;  %v6571_v32 = vsel %vm9279_vm5, %v6569_v17, %v6570_v19  ;;  %v8489_v17 = vld [vmem:[%s9118_s26 + $0x84] sm:$0xf] }
 0x280   : > { %v1690_v49 = vpop.f32.mrf.mxu1 }
 0x281   : > { %v2996_v23 = vadd.f32 %v2943_v27, %v2465_v43  ;;  %v1741_v21 = vadd.f32 %v1690_v49, %v11205_v20  ;;  %v4458_v27 = vunpack.c.l.b16 %v4273_v4  ;;  %v8056_v4 = vld [vmem:[%s9118_s26 + $0x70] sm:$0xe] }
 0x282   : > { %v3988_v14 = vpop.f32.mrf.mxu0 }
 0x283   : > { %4629 = vmatmul.bf16.gmra.mxu1 %v4497_v2  ;;  %5160 = vmatmul.bf16.gmra.mxu2 %v8255_v9  ;;  %v10559_v63 = vadd.f32 %v3985_v53, %v2996_v23  ;;  %v5609_v23 = vsel %vm9274_vm4, %v5604_v15, %v5608_v31  ;;  %v6568_v53 = vsel %vm9279_vm5, %v6566_v0, %v6567_v29  ;;  %v5611_v2 = vshrl.u32 %v8376_v30, 16  ;;  %v8378_v31 = vld [vmem:[%s9118_s26 + $0x88] sm:$0xf] }
 0x284   : > { %6202 = vmatmul.bf16.gmra.mxu3 %v6070_v26  ;;  %v4459_v9 = vunpack.c.l.b16 %v4276_v59  ;;  %v6032_v49 = vunpack.c.l.b16 %v5609_v23  ;;  %v6753_v26 = vunpack.c.l.b16 %v6568_v53  ;;  %v6754_v29 = vunpack.c.l.b16 %v6571_v32  ;;  %v10585_v59 = vld [vmem:[%s9118_s26 + $0x78] sm:$0xf]  ;;  %v8488_v32 = vld [vmem:[%s9118_s26 + $0x80] sm:$0xe] }
 0x285   : > { %6924 = vmatmul.bf16.gmra.mxu0 %v6792_v60  ;;  %v5613_v28 = vrot.slane %v5611_v2, 4  ;;  %v5626_v15 = vrot.slane %v5624_v34, 4  ;;  %v6574_v53 = vrot.slane %v8489_v17, 5  ;;  %v8102_v2 = vrot.slane %v8056_v4, 9 }
 0x286   : > { %v2415_v10 = vpop.f32.mrf.mxu2  ;;  %v4498_v20 = vpack.c.b16 %v4459_v9, %v4458_v27  ;;  %v6071_v30 = vpack.c.b16 %v6032_v49, %v6031_v11  ;;  %v4282_v6 = vrot.slane %v10585_v59, 5  ;;  %v8534_v9 = vrot.slane %v8488_v32, 9 }
 0x287   : > { %v2466_v44 = vadd.f32 %v2415_v10, %v1741_v21  ;;  %v2946_v35 = vpop.f32.mrf.mxu3  ;;  %v8699_v21 = vld [vmem:[%s9118_s26 + $0x74] sm:$0xff]  ;;  %v5617_v47 = vor.u32 %v5616_v48, %v5613_v28  ;;  %v6576_v11 = vrot.slane %v6574_v53, 4  ;;  %v4280_v48 = vsel %vm9279_vm5, %v8102_v2, %v4279_v33 }
 0x288   : > { %v1692_v52 = vpop.f32.mrf.mxu1  ;;  %v4460_v33 = vunpack.c.l.b16 %v4280_v48  ;;  %v8060_v48 = vld [vmem:[%s9118_s26 + $0x80] sm:$0xe] }
 0x289   : > { %v2997_v43 = vadd.f32 %v2946_v35, %v2466_v44  ;;  %v5627_v44 = vor.u32 %v5626_v15, %v5622_v39  ;;  %v5630_v35 = vshll.u32 %v8378_v31, 16  ;;  %v10589_v52 = vld [vmem:[%s9118_s26 + $0x88] sm:$0xf]  ;;  %v5618_v34 = vrot.slane %v5617_v47, 4 }
 0x28a   : > { %v3990_v16 = vpop.f32.mrf.mxu0  ;;  %v6577_v49 = vrot.slane %v10589_v52, 5  ;;  %v4283_v15 = vsel %vm9279_vm5, %v4281_v54, %v4282_v6  ;;  %v8379_v54 = vld [vmem:[%s9118_s26 + $0x8c] sm:$0x1] }
 0x28b   : > { %v10577_v60 = vadd.f32 %v3988_v14, %v2997_v43  ;;  %v6793_v14 = vpack.c.b16 %v6754_v29, %v6753_v26  ;;  %v5628_v43 = vrot.slane %v5627_v44, 4  ;;  %v10592_v16 = vrot.slane %v5630_v35, 5  ;;  %v8380_v26 = vld [vmem:[%s9118_s26 + $0x90] sm:$0xf] }
 0x28e   : > { %v2417_v0 = vpop.f32.mrf.mxu2 }
 0x28f   : > { %v2948_v19 = vpop.f32.mrf.mxu3  ;;  %v5634_v0 = vshrl.u32 %v8378_v31, 16  ;;  %v6578_v31 = vsel %vm9279_vm5, %v6576_v11, %v6577_v49 }
 0x290   : > { %v4595_v10 = vpop.f32.mrf.mxu1  ;;  %v5623_v19 = vsel %vm9274_vm4, %v5618_v34, %v5622_v39  ;;  %v6756_v35 = vunpack.c.l.b16 %v6578_v31  ;;  %v10617_v34 = vld [vmem:[%s11171_s2] ss:$0 sm:$0xff] }
 0x291   : > { %v4715_v27 = vadd.f32 %v4595_v10, %v9690_v58  ;;  %v5633_v58 = vsel %vm9274_vm4, %v5628_v43, %v10592_v16  ;;  %v6575_v10 = vsel %vm9279_vm5, %v8534_v9, %v6574_v53  ;;  %v6033_v4 = vunpack.c.l.b16 %v5623_v19  ;;  %v10625_v19 = vld [vmem:[%s9118_s26 + $0x84] sm:$0xf] }
 0x292   : > { %v6890_v23 = vpop.f32.mrf.mxu0  ;;  %v6034_v59 = vunpack.c.l.b16 %v5633_v58  ;;  %v5636_v47 = vrot.slane %v5634_v0, 4  ;;  %v6755_v44 = vunpack.c.l.b16 %v6575_v10  ;;  %v5640_v58 = vshll.u32 %v8379_v54, 16 }
 0x293   : > { %4634 = vmatmul.bf16.gmra.mxu1 %v4498_v20  ;;  %5165 = vmatmul.bf16.gmra.mxu2 %v8699_v21  ;;  %v5645_v20 = vshrl.u32 %v8380_v26, 16  ;;  %v5648_v21 = vshll.u32 %v8380_v26, 16  ;;  %v4284_v10 = vrot.slane %v4282_v6, 4 }
 0x294   : > { %6207 = vmatmul.bf16.gmra.mxu3 %v6071_v30  ;;  %v6072_v0 = vpack.c.b16 %v6034_v59, %v6033_v4  ;;  %v5642_v6 = vrot.slane %v5640_v58, 5 }
 0x295   : > { %6929 = vmatmul.bf16.gmra.mxu0 %v6793_v14  ;;  %v4461_v14 = vunpack.c.l.b16 %v4283_v15  ;;  %v5647_v32 = vrot.slane %v5645_v20, 4  ;;  %v5650_v2 = vrot.slane %v5648_v21, 5 }
 0x296   : > { %v5126_v29 = vpop.f32.mrf.mxu2 }
 0x297   : > { %v5246_v18 = vadd.f32 %v5126_v29, %v4715_v27  ;;  %v6168_v28 = vpop.f32.mrf.mxu3  ;;  %v8381_v27 = vld [vmem:[%s9118_s26 + $0x94] sm:$0xf]  ;;  %v4499_v29 = vpack.c.b16 %v4461_v14, %v4460_v33  ;;  %v5651_v20 = vor.u32 %v5650_v2, %v5647_v32  ;;  %v8491_v33 = vld [vmem:[%s9118_s26 + $0x8c] sm:$0x1]  ;;  %v6579_v2 = vrot.slane %v6577_v49, 4 }
 0x298   : > { %v4597_v17 = vpop.f32.mrf.mxu1  ;;  %v5654_v31 = vshll.u32 %v8381_v27, 16  ;;  %v6580_v54 = vrot.slane %v8491_v33, 5 }
 0x299   : > { %v6288_v39 = vadd.f32 %v6168_v28, %v5246_v18  ;;  %v4716_v53 = vadd.f32 %v4597_v17, %v9696_v51  ;;  %v8700_v18 = vld [vmem:[%s9118_s26 + $0x80] sm:$0xff]  ;;  %v8059_v28 = vld [vmem:[%s9118_s26 + $0x7c] sm:$0x1]  ;;  %v5637_v51 = vor.u32 %v5636_v47, %v10592_v16  ;;  %v6794_v17 = vpack.c.b16 %v6756_v35, %v6755_v44  ;;  %v10631_v16 = vld [vmem:[%s9118_s26 + $0x94] sm:$0xf] }
 0x29a   : > { %v6892_v30 = vpop.f32.mrf.mxu0  ;;  %v4285_v14 = vrot.slane %v8059_v28, 5  ;;  %v11177_v47 = vrot.slane %v10625_v19, 5  ;;  %v8382_v35 = vld [vmem:[%s9118_s26 + $0x98] sm:$0xf]  ;;  %v5652_v32 = vrot.slane %v5651_v20, 4 }
 0x29b   : > { %v7010_v9 = vadd.f32 %v6890_v23, %v6288_v39  ;;  %v8103_v39 = vrot.slane %v8060_v48, 9  ;;  %v5638_v44 = vrot.slane %v5637_v51, 4  ;;  %v5668_v28 = vshrl.u32 %v8382_v35, 16 }
 0x29c   : > { %v4286_v52 = vsel %vm9279_vm5, %v4284_v10, %v4285_v14  ;;  %v8062_v10 = vld [vmem:[%s9118_s26 + $0x88] sm:$0xf] }
 0x29d   : > { %v7158_v4 = vadd.f32 %v10617_v34, %v7010_v9  ;;  %v4290_v49 = vsel %vm9279_vm5, %v8103_v39, %v11177_v47  ;;  %v5670_v14 = vrot.slane %v5668_v28, 4  ;;  %v4462_v39 = vunpack.c.l.b16 %v4286_v52  ;;  %v8063_v52 = vld [vmem:[%s9118_s26 + $0x8c] sm:$0x1] }
 0x29e   : > { %v5128_v43 = vpop.f32.mrf.mxu2 }
 0x29f   : > { %v5247_v11 = vadd.f32 %v5128_v43, %v4716_v53  ;;  %v6170_v26 = vpop.f32.mrf.mxu3  ;;  %v8492_v53 = vld [vmem:[%s9118_s26 + $0x90] sm:$0xe]  ;;  %v7206_v48 = vmax.f32 %v7158_v4, 0.0  ;;  %v8266_v4 = vld [vmem:[%s9118_s26 + $0x88] sm:$0xf] }
 0x2a0   : > { %v4600_v15 = vpop.f32.mrf.mxu1  ;;  %v8535_v9 = vrot.slane %v8492_v53, 9  ;;  %v4463_v53 = vunpack.c.l.b16 %v4290_v49 }
 0x2a1   : > { %v6289_v23 = vadd.f32 %v6170_v26, %v5247_v11  ;;  %v6584_v11 = vrot.slane %v10631_v16, 5  ;;  %v8383_v16 = vld [vmem:[%s9118_s26 + $0x9c] sm:$0x1] }
 0x2a2   : > { %v6895_v21 = vpop.f32.mrf.mxu0 }
 0x2a3   : > { %v7011_v59 = vadd.f32 %v6892_v30, %v6289_v23  ;;  %4639 = vmatmul.bf16.gmra.mxu1 %v4499_v29  ;;  %5170 = vmatmul.bf16.gmra.mxu2 %v8700_v18  ;;  %v5656_v30 = vrot.slane %v5654_v31, 5  ;;  %v5658_v29 = vshrl.u32 %v8381_v27, 16  ;;  %v5664_v18 = vshll.u32 %v8382_v35, 16 }
 0x2a4   : > { %6212 = vmatmul.bf16.gmra.mxu3 %v6072_v0  ;;  %v5643_v27 = vsel %vm9274_vm4, %v5638_v44, %v5642_v6  ;;  %v6581_v23 = vsel %vm9279_vm5, %v6579_v2, %v6580_v54  ;;  %v6585_v21 = vsel %vm9279_vm5, %v8535_v9, %v6584_v11  ;;  %v8494_v2 = vld [vmem:[%s9118_s26 + $0x98] sm:$0xf] }
 0x2a5   : > { %6934 = vmatmul.bf16.gmra.mxu0 %v6794_v17  ;;  %v7159_v43 = vadd.f32 %v10617_v34, %v7011_v59  ;;  %v5657_v20 = vsel %vm9274_vm4, %v5652_v32, %v5656_v30  ;;  %v5660_v31 = vrot.slane %v5658_v29, 4  ;;  %v10659_v33 = vrot.slane %v5664_v18, 5  ;;  %v8701_v59 = vld [vmem:[%s9118_s26 + $0x8c] sm:$0xf0] }
 0x2a6   : > { %v5131_v26 = vpop.f32.mrf.mxu2  ;;  %v6035_v44 = vunpack.c.l.b16 %v5643_v27  ;;  %v6036_v35 = vunpack.c.l.b16 %v5657_v20  ;;  %v6757_v6 = vunpack.c.l.b16 %v6581_v23  ;;  %v6758_v32 = vunpack.c.l.b16 %v6585_v21  ;;  %v8495_v23 = vld [vmem:[%s9118_s26 + $0x9c] sm:$0x1] }
 0x2a7   : > { %v7207_v51 = vmax.f32 %v7159_v43, 0.0  ;;  %v6173_v15 = vpop.f32.mrf.mxu3  ;;  %v4292_v43 = vrot.slane %v8062_v10, 5  ;;  %v5661_v26 = vor.u32 %v5660_v31, %v5656_v30  ;;  %v5671_v29 = vor.u32 %v5670_v14, %v10659_v33 }
 0x2a8   : > { %v4602_v0 = vpop.f32.mrf.mxu1  ;;  %v5674_v18 = vshll.u32 %v8383_v16, 16  ;;  %v8267_v15 = vor.u32 %v8701_v59, %v8266_v4  ;;  %v6587_v49 = vrot.slane %v8494_v2, 5  ;;  %v6795_v20 = vpack.c.b16 %v6758_v32, %v6757_v6  ;;  %v11207_v6 = vld [vmem:[#allocation12_spill] sm:$0xff]  ;;  %v8384_v2 = vld [vmem:[%s9118_s26 + $0xa0] sm:$0xf] }
 0x2a9   : > { %v8742_v17 = vpack.c.bf16 %v7207_v51, %v7206_v48  ;;  %v4718_v54 = vadd.f32 %v4602_v0, %v9732_v3  ;;  %v4500_v51 = vpack.c.b16 %v4463_v53, %v4462_v39  ;;  %v11206_v3 = vrot.slane %v10625_v19, 5 }
 0x2aa   : > { %v6897_v58 = vpop.f32.mrf.mxu0  ;;  %v4294_v10 = vrot.slane %v4292_v43, 4  ;;  %v4295_v30 = vrot.slane %v8063_v52, 5  ;;  %v5662_v31 = vrot.slane %v5661_v26, 4  ;;  %v5672_v14 = vrot.slane %v5671_v29, 4 }
 0x2ab   : > { %8743 = vst [vmem:[%s10662_s19] sm:$0xff] %v8742_v17   ;;  %v6073_v17 = vpack.c.b16 %v6036_v35, %v6035_v44  ;;  %v4291_v0 = vrot.slane %v11206_v3, 4  ;;  %v5676_v16 = vrot.slane %v5674_v18, 5  ;;  %v6586_v53 = vrot.slane %v6584_v11, 4 }
 0x2ac   : > { %v6589_v4 = vrot.slane %v6587_v49, 4  ;;  %v6590_v59 = vrot.slane %v8495_v23, 5  ;;  %v9018_v35 = vmov 0.0|0.0   ;;  %v4296_v11 = vsel %vm9279_vm5, %v4294_v10, %v4295_v30 }
 0x2ad   : > { %v10676_v19 = vunpack.c.l.bf16 %v9018_v35  ;;  %v5667_v26 = vsel %vm9274_vm4, %v5662_v31, %v10659_v33  ;;  %v5677_v29 = vsel %vm9274_vm4, %v5672_v14, %v5676_v16  ;;  %v5679_v52 = vshrl.u32 %v8384_v2, 16  ;;  %v8065_v16 = vld [vmem:[%s9118_s26 + $0x94] sm:$0xf]  ;;  %v8386_v35 = vld [vmem:[%s9118_s26 + $0xa8] sm:$0xf] }
 0x2ae   : > { %v5133_v9 = vpop.f32.mrf.mxu2  ;;  %v6037_v10 = vunpack.c.l.b16 %v5667_v26  ;;  %v6038_v30 = vunpack.c.l.b16 %v5677_v29 }
 0x2af   : > { %v5249_v28 = vadd.f32 %v5133_v9, %v4718_v54  ;;  %v6175_v48 = vpop.f32.mrf.mxu3  ;;  %v8385_v54 = vld [vmem:[%s9118_s26 + $0xa4] sm:$0xf] }
 0x2b0   : > { %v4605_v27 = vpop.f32.mrf.mxu1 }
 0x2b1   : > { %v6291_v21 = vadd.f32 %v6175_v48, %v5249_v28  ;;  %v4719_v32 = vadd.f32 %v4605_v27, %v11207_v6  ;;  %v5682_v27 = vshll.u32 %v8384_v2, 16 }
 0x2b2   : > { %v6900_v47 = vpop.f32.mrf.mxu0 }
 0x2b3   : > { %v7013_v39 = vadd.f32 %v6897_v58, %v6291_v21  ;;  %4644 = vmatmul.bf16.gmra.mxu1 %v4500_v51  ;;  %5175 = vmatmul.bf16.gmra.mxu2 %v8267_v15  ;;  %v4293_v58 = vsel %vm9279_vm5, %v4291_v0, %v4292_v43  ;;  %v6588_v51 = vsel %vm9279_vm5, %v6586_v53, %v6587_v49  ;;  %v4465_v0 = vunpack.c.l.b16 %v4296_v11 }
 0x2b4   : > { %6217 = vmatmul.bf16.gmra.mxu3 %v6073_v17  ;;  %v6591_v43 = vsel %vm9279_vm5, %v6589_v4, %v6590_v59  ;;  %v5688_v17 = vshll.u32 %v8385_v54, 16  ;;  %v4464_v3 = vunpack.c.l.b16 %v4293_v58  ;;  %v6759_v31 = vunpack.c.l.b16 %v6588_v51 }
 0x2b5   : > { %6939 = vmatmul.bf16.gmra.mxu0 %v6795_v20  ;;  %v7161_v44 = vadd.f32 %v10617_v34, %v7013_v39  ;;  %v5692_v20 = vshrl.u32 %v8385_v54, 16  ;;  %v6760_v14 = vunpack.c.l.b16 %v6591_v43  ;;  %v5681_v39 = vrot.slane %v5679_v52, 4 }
 0x2b6   : > { %v5136_v9 = vpop.f32.mrf.mxu2  ;;  %v5684_v53 = vrot.slane %v5682_v27, 5  ;;  %v5690_v4 = vrot.slane %v5688_v17, 5  ;;  %v6074_v58 = vpack.c.b16 %v6038_v30, %v6037_v10  ;;  %v4299_v11 = vrot.slane %v8065_v16, 5  ;;  %v8496_v17 = vld [vmem:[%s9118_s26 + $0xa0] sm:$0xe] }
 0x2b7   : > { %v7209_v18 = vmax.f32 %v7161_v44, 0.0  ;;  %v5250_v28 = vadd.f32 %v5136_v9, %v4719_v32  ;;  %v6178_v48 = vpop.f32.mrf.mxu3  ;;  %v5694_v59 = vrot.slane %v5692_v20, 4  ;;  %v8497_v32 = vld [vmem:[%s9118_s26 + $0xa4] sm:$0xf]  ;;  %v8702_v9 = vld [vmem:[%s9118_s26 + $0x94] sm:$0xff]  ;;  %v6796_v29 = vpack.c.b16 %v6760_v14, %v6759_v31 }
 0x2b8   : > { %v4607_v15 = vpop.f32.mrf.mxu1  ;;  %v5698_v43 = vshll.u32 %v8386_v35, 16  ;;  %v6594_v27 = vrot.slane %v8497_v32, 5  ;;  %v10708_v20 = vld [vmem:[%s9118_s26 + $0xa8] sm:$0xf]  ;;  %v8536_v30 = vrot.slane %v8496_v17, 9  ;;  %v5702_v32 = vshrl.u32 %v8386_v35, 16 }
 0x2b9   : > { %v8747_v33 = vpack.c.bf16 %v7209_v18, %v10676_v19  ;;  %v6292_v23 = vadd.f32 %v6178_v48, %v5250_v28  ;;  %v8064_v18 = vld [vmem:[%s9118_s26 + $0x90] sm:$0xe]  ;;  %v10703_v28 = vld [vmem:[%s9118_s26 + $0x98] sm:$0xf]  ;;  %v5685_v48 = vor.u32 %v5684_v53, %v5681_v39  ;;  %v5695_v51 = vor.u32 %v5694_v59, %v5690_v4 }
 0x2ba   : > { %v6902_v21 = vpop.f32.mrf.mxu0  ;;  %v5700_v10 = vrot.slane %v5698_v43, 5  ;;  %v6596_v31 = vrot.slane %v6594_v27, 4  ;;  %v6597_v14 = vrot.slane %v10708_v20, 5  ;;  %v8388_v16 = vld [vmem:[%s9118_s26 + $0xb0] sm:$0xf] }
 0x2bb   : > { %8859 = vst [vmem:[%s10662_s19 + $0x8] sm:$0xff] %v8747_v33   ;;  %v7014_v49 = vadd.f32 %v6900_v47, %v6292_v23  ;;  %v4501_v47 = vpack.c.b16 %v4465_v0, %v4464_v3  ;;  %v8104_v33 = vrot.slane %v8064_v18, 9  ;;  %v4301_v23 = vrot.slane %v4299_v11, 4 }
 0x2bc   : > { %v4302_v21 = vrot.slane %v10703_v28, 5  ;;  %v5686_v3 = vrot.slane %v5685_v48, 4  ;;  %v5696_v0 = vrot.slane %v5695_v51, 4  ;;  %v6598_v35 = vsel %vm9279_vm5, %v6596_v31, %v6597_v14 }
 0x2bd   : > { %v7162_v44 = vadd.f32 %v10617_v34, %v7014_v49  ;;  %v5704_v48 = vrot.slane %v5702_v32, 4  ;;  %v6762_v43 = vunpack.c.l.b16 %v6598_v35 }
 0x2be   : > { %v5138_v6 = vpop.f32.mrf.mxu2 }
 0x2bf   : > { %v7210_v2 = vmax.f32 %v7162_v44, 0.0  ;;  %v6180_v54 = vpop.f32.mrf.mxu3  ;;  %v4300_v44 = vsel %vm9279_vm5, %v8104_v33, %v4299_v11  ;;  %v4303_v6 = vsel %vm9279_vm5, %v4301_v23, %v4302_v21  ;;  %v8387_v33 = vld [vmem:[%s9118_s26 + $0xac] sm:$0x1] }
 0x2c0   : > { %v4610_v26 = vpop.f32.mrf.mxu1  ;;  %v5691_v54 = vsel %vm9274_vm4, %v5686_v3, %v5690_v4  ;;  %v4466_v11 = vunpack.c.l.b16 %v4300_v44  ;;  %v8389_v3 = vld [vmem:[%s9118_s26 + $0xb4] sm:$0xf] }
 0x2c1   : > { %v8752_v15 = vpack.c.bf16 %v10676_v19, %v7210_v2  ;;  %v4721_v49 = vadd.f32 %v4610_v26, %v9826_v38  ;;  %v5701_v38 = vsel %vm9274_vm4, %v5696_v0, %v5700_v10  ;;  %v6595_v26 = vsel %vm9279_vm5, %v8536_v30, %v6594_v27 }
 0x2c2   : > { %v6905_v52 = vpop.f32.mrf.mxu0  ;;  %v6039_v4 = vunpack.c.l.b16 %v5691_v54  ;;  %v6040_v28 = vunpack.c.l.b16 %v5701_v38  ;;  %v6761_v51 = vunpack.c.l.b16 %v6595_v26  ;;  %v10736_v54 = vld [vmem:[%s9118_s26 + $0xa4] sm:$0xf]  ;;  %v8499_v26 = vld [vmem:[%s9118_s26 + $0xac] sm:$0x1] }
 0x2c3   : > { %8860 = vst [vmem:[%s10662_s19 + $0x10] sm:$0xff] %v8752_v15   ;;  %4649 = vmatmul.bf16.gmra.mxu1 %v4501_v47  ;;  %5180 = vmatmul.bf16.gmra.mxu2 %v8702_v9  ;;  %v5713_v47 = vshrl.u32 %v8388_v16, 16  ;;  %v5716_v9 = vshll.u32 %v8388_v16, 16  ;;  %v8703_v16 = vld [vmem:[%s9118_s26 + $0xa0] sm:$0xff] }
 0x2c4   : > { %6222 = vmatmul.bf16.gmra.mxu3 %v6074_v58  ;;  %v6797_v32 = vpack.c.b16 %v6762_v43, %v6761_v51  ;;  %v8390_v51 = vld [vmem:[%s9118_s26 + $0xb8] sm:$0xf] }
 0x2c5   : > { %6944 = vmatmul.bf16.gmra.mxu0 %v6796_v29  ;;  %v4467_v29 = vunpack.c.l.b16 %v4303_v6  ;;  %v5715_v15 = vrot.slane %v5713_v47, 4  ;;  %v5718_v17 = vrot.slane %v5716_v9, 5  ;;  %v6075_v6 = vpack.c.b16 %v6040_v28, %v6039_v4 }
 0x2c6   : > { %v5141_v39 = vpop.f32.mrf.mxu2  ;;  %v4304_v47 = vrot.slane %v4302_v21, 4  ;;  %v5722_v9 = vshll.u32 %v8389_v3, 16  ;;  %v4309_v4 = vrot.slane %v10736_v54, 5 }
 0x2c7   : > { %v5252_v53 = vadd.f32 %v5141_v39, %v4721_v49  ;;  %v6183_v59 = vpop.f32.mrf.mxu3  ;;  %v4502_v31 = vpack.c.b16 %v4467_v29, %v4466_v11  ;;  %v8067_v39 = vld [vmem:[%s9118_s26 + $0x9c] sm:$0x1]  ;;  %v8500_v29 = vld [vmem:[%s9118_s26 + $0xb0] sm:$0xe] }
 0x2c8   : > { %v4612_v2 = vpop.f32.mrf.mxu1  ;;  %v4305_v35 = vrot.slane %v8067_v39, 5 }
 0x2c9   : > { %v6294_v18 = vadd.f32 %v6183_v59, %v5252_v53  ;;  %v4722_v27 = vadd.f32 %v4612_v2, %v9832_v41  ;;  %v8068_v53 = vld [vmem:[%s9118_s26 + $0xa0] sm:$0xe]  ;;  %v5705_v59 = vor.u32 %v5704_v48, %v5700_v10  ;;  %v5708_v41 = vshll.u32 %v8387_v33, 16 }
 0x2ca   : > { %v6907_v58 = vpop.f32.mrf.mxu0  ;;  %v5719_v2 = vor.u32 %v5718_v17, %v5715_v15  ;;  %v8105_v11 = vrot.slane %v8068_v53, 9  ;;  %v6599_v15 = vrot.slane %v6597_v14, 4  ;;  %v6600_v17 = vrot.slane %v8499_v26, 5 }
 0x2cb   : > { %v7016_v0 = vadd.f32 %v6905_v52, %v6294_v18  ;;  %v10741_v18 = vld [vmem:[%s9118_s26 + $0xb4] sm:$0xf]  ;;  %v5706_v28 = vrot.slane %v5705_v59, 4  ;;  %v5710_v43 = vrot.slane %v5708_v41, 5  ;;  %v5724_v33 = vrot.slane %v5722_v9, 5 }
 0x2cc   : > { %v5720_v21 = vrot.slane %v5719_v2, 4  ;;  %v4306_v20 = vsel %vm9279_vm5, %v4304_v47, %v4305_v35  ;;  %v4310_v14 = vsel %vm9279_vm5, %v8105_v11, %v4309_v4  ;;  %v6601_v54 = vsel %vm9279_vm5, %v6599_v15, %v6600_v17  ;;  %v8070_v2 = vld [vmem:[%s9118_s26 + $0xa8] sm:$0xf]  ;;  %v8391_v35 = vld [vmem:[%s9118_s26 + $0xbc] sm:$0x1] }
 0x2cd   : > { %v7164_v10 = vadd.f32 %v10617_v34, %v7016_v0  ;;  %v4468_v9 = vunpack.c.l.b16 %v4306_v20  ;;  %v4469_v26 = vunpack.c.l.b16 %v4310_v14  ;;  %v8278_v11 = vld [vmem:[%s9118_s26 + $0xa8] sm:$0xf] }
 0x2ce   : > { %v5143_v23 = vpop.f32.mrf.mxu2 }
 0x2cf   : > { %v5253_v49 = vadd.f32 %v5143_v23, %v4722_v27  ;;  %v6185_v30 = vpop.f32.mrf.mxu3  ;;  %v8537_v23 = vrot.slane %v8500_v29, 9  ;;  %v8704_v29 = vld [vmem:[%s9118_s26 + $0xac] sm:$0xf0] }
 0x2d0   : > { %v4615_v44 = vpop.f32.mrf.mxu1 }
 0x2d1   : > { %v6295_v38 = vadd.f32 %v6185_v30, %v5253_v49  ;;  %v5726_v49 = vshrl.u32 %v8389_v3, 16  ;;  %v5732_v30 = vshll.u32 %v8390_v51, 16  ;;  %v5711_v44 = vsel %vm9274_vm4, %v5706_v28, %v5710_v43 }
 0x2d2   : > { %v6910_v52 = vpop.f32.mrf.mxu0 }
 0x2d3   : > { %v7017_v48 = vadd.f32 %v6907_v58, %v6295_v38  ;;  %4654 = vmatmul.bf16.gmra.mxu1 %v4502_v31  ;;  %5185 = vmatmul.bf16.gmra.mxu2 %v8703_v16  ;;  %v6604_v58 = vrot.slane %v10741_v18, 5  ;;  %v5736_v31 = vshrl.u32 %v8390_v51, 16  ;;  %v7212_v16 = vmax.f32 %v7164_v10, 0.0  ;;  %v8502_v51 = vld [vmem:[%s9118_s26 + $0xb8] sm:$0xf] }
 0x2d4   : > { %6227 = vmatmul.bf16.gmra.mxu3 %v6075_v6  ;;  %v5728_v38 = vrot.slane %v5726_v49, 4  ;;  %v10763_v52 = vrot.slane %v5732_v30, 5  ;;  %v6041_v18 = vunpack.c.l.b16 %v5711_v44  ;;  %v4503_v30 = vpack.c.b16 %v4469_v26, %v4468_v9  ;;  %v8503_v44 = vld [vmem:[%s9118_s26 + $0xbc] sm:$0x1] }
 0x2d5   : > { %6949 = vmatmul.bf16.gmra.mxu0 %v6797_v32  ;;  %v7165_v27 = vadd.f32 %v10617_v34, %v7017_v48  ;;  %v5725_v32 = vsel %vm9274_vm4, %v5720_v21, %v5724_v33  ;;  %v6605_v41 = vsel %vm9279_vm5, %v8537_v23, %v6604_v58  ;;  %v5738_v47 = vrot.slane %v5736_v31, 4 }
 0x2d6   : > { %v5146_v0 = vpop.f32.mrf.mxu2  ;;  %v6042_v10 = vunpack.c.l.b16 %v5725_v32  ;;  %v6763_v48 = vunpack.c.l.b16 %v6601_v54  ;;  %v6764_v28 = vunpack.c.l.b16 %v6605_v41  ;;  %v4312_v21 = vrot.slane %v8070_v2, 5 }
 0x2d7   : > { %v7213_v39 = vmax.f32 %v7165_v27, 0.0  ;;  %v6188_v53 = vpop.f32.mrf.mxu3  ;;  %v5729_v17 = vor.u32 %v5728_v38, %v5724_v33  ;;  %v5739_v27 = vor.u32 %v5738_v47, %v10763_v52  ;;  %v5742_v23 = vshll.u32 %v8391_v35, 16 }
 0x2d8   : > { %v4617_v59 = vpop.f32.mrf.mxu1  ;;  %v8279_v31 = vor.u32 %v8704_v29, %v8278_v11  ;;  %v6076_v20 = vpack.c.b16 %v6042_v10, %v6041_v18  ;;  %v6798_v14 = vpack.c.b16 %v6764_v28, %v6763_v48  ;;  %v4311_v54 = vrot.slane %v4309_v4, 4  ;;  %v8392_v4 = vld [vmem:[%s9118_s26 + $0xc0] sm:$0xf]  ;;  %v8393_v29 = vld [vmem:[%s9118_s26 + $0xc4] sm:$0xf] }
 0x2d9   : > { %v8757_v3 = vpack.c.bf16 %v7213_v39, %v7212_v16  ;;  %v4724_v43 = vadd.f32 %v4617_v59, %v9868_v46  ;;  %v8071_v16 = vld [vmem:[%s9118_s26 + $0xac] sm:$0x1]  ;;  %v6607_v39 = vrot.slane %v8502_v51, 5  ;;  %v4314_v46 = vrot.slane %v4312_v21, 4 }
 0x2da   : > { %v6912_v6 = vpop.f32.mrf.mxu0  ;;  %v4315_v33 = vrot.slane %v8071_v16, 5  ;;  %v5730_v59 = vrot.slane %v5729_v17, 4  ;;  %v5740_v41 = vrot.slane %v5739_v27, 4  ;;  %v5744_v2 = vrot.slane %v5742_v23, 5 }
 0x2db   : > { %8861 = vst [vmem:[%s10662_s19 + $0x18] sm:$0xff] %v8757_v3   ;;  %v6606_v47 = vrot.slane %v6604_v58, 4  ;;  %v6609_v9 = vrot.slane %v6607_v39, 4  ;;  %v6610_v26 = vrot.slane %v8503_v44, 5  ;;  %v4313_v10 = vsel %vm9279_vm5, %v4311_v54, %v4312_v21 }
 0x2dc   : > { %v5735_v58 = vsel %vm9274_vm4, %v5730_v59, %v10763_v52  ;;  %v5745_v48 = vsel %vm9274_vm4, %v5740_v41, %v5744_v2  ;;  %v5747_v17 = vshrl.u32 %v8392_v4, 16  ;;  %v5750_v27 = vshll.u32 %v8392_v4, 16  ;;  %v8394_v2 = vld [vmem:[%s9118_s26 + $0xc8] sm:$0xf] }
 0x2dd   : > { %v6611_v21 = vsel %vm9279_vm5, %v6609_v9, %v6610_v26  ;;  %v5756_v23 = vshll.u32 %v8393_v29, 16 }
 0x2de   : > { %v5148_v15 = vpop.f32.mrf.mxu2  ;;  %v6766_v44 = vunpack.c.l.b16 %v6611_v21  ;;  %v5749_v54 = vrot.slane %v5747_v17, 4  ;;  %v8504_v21 = vld [vmem:[%s9118_s26 + $0xc0] sm:$0xe] }
 0x2df   : > { %v5255_v0 = vadd.f32 %v5148_v15, %v4724_v43  ;;  %v6190_v49 = vpop.f32.mrf.mxu3  ;;  %v6608_v43 = vsel %vm9279_vm5, %v6606_v47, %v6607_v39  ;;  %v8505_v47 = vld [vmem:[%s9118_s26 + $0xc4] sm:$0xf] }
 0x2e0   : > { %v4620_v53 = vpop.f32.mrf.mxu1 }
 0x2e1   : > { %v6297_v3 = vadd.f32 %v6190_v49, %v5255_v0  ;;  %v4725_v11 = vadd.f32 %v4620_v53, %v9904_v61  ;;  %v5760_v0 = vshrl.u32 %v8393_v29, 16  ;;  %v6043_v53 = vunpack.c.l.b16 %v5735_v58 }
 0x2e2   : > { %v6915_v32 = vpop.f32.mrf.mxu0 }
 0x2e3   : > { %v7019_v38 = vadd.f32 %v6912_v6, %v6297_v3  ;;  %4659 = vmatmul.bf16.gmra.mxu1 %v4503_v30  ;;  %5190 = vmatmul.bf16.gmra.mxu2 %v8279_v31  ;;  %v4316_v6 = vsel %vm9279_vm5, %v4314_v46, %v4315_v33  ;;  %v4470_v31 = vunpack.c.l.b16 %v4313_v10  ;;  %v8073_v3 = vld [vmem:[%s9118_s26 + $0xb4] sm:$0xf]  ;;  %v5752_v46 = vrot.slane %v5750_v27, 5  ;;  %v8072_v10 = vld [vmem:[%s9118_s26 + $0xb0] sm:$0xe] }
 0x2e4   : > { %6232 = vmatmul.bf16.gmra.mxu3 %v6076_v20  ;;  %v4471_v16 = vunpack.c.l.b16 %v4316_v6  ;;  %v6044_v20 = vunpack.c.l.b16 %v5745_v48  ;;  %v5758_v33 = vrot.slane %v5756_v23, 5  ;;  %v5762_v59 = vrot.slane %v5760_v0, 4  ;;  %v10800_v6 = vld [vmem:[%s9118_s26 + $0xb8] sm:$0xf] }
 0x2e5   : > { %6954 = vmatmul.bf16.gmra.mxu0 %v6798_v14  ;;  %v7167_v35 = vadd.f32 %v10617_v34, %v7019_v38  ;;  %v6765_v14 = vunpack.c.l.b16 %v6608_v43  ;;  %v4319_v4 = vrot.slane %v8073_v3, 5  ;;  %v5753_v58 = vor.u32 %v5752_v46, %v5749_v54 }
 0x2e6   : > { %v5151_v18 = vpop.f32.mrf.mxu2  ;;  %v5763_v48 = vor.u32 %v5762_v59, %v5758_v33  ;;  %v6614_v43 = vrot.slane %v8505_v47, 5  ;;  %v8106_v17 = vrot.slane %v8072_v10, 9  ;;  %v4322_v23 = vrot.slane %v10800_v6, 5 }
 0x2e7   : > { %v7215_v28 = vmax.f32 %v7167_v35, 0.0  ;;  %v5256_v51 = vadd.f32 %v5151_v18, %v4725_v11  ;;  %v6193_v61 = vpop.f32.mrf.mxu3  ;;  %v8705_v35 = vld [vmem:[%s9118_s26 + $0xb4] sm:$0xff]  ;;  %v6077_v11 = vpack.c.b16 %v6044_v20, %v6043_v53  ;;  %v6799_v18 = vpack.c.b16 %v6766_v44, %v6765_v14 }
 0x2e8   : > { %v4622_v15 = vpop.f32.mrf.mxu1  ;;  %v4321_v27 = vrot.slane %v4319_v4, 4  ;;  %v5754_v0 = vrot.slane %v5753_v58, 4  ;;  %v4320_v3 = vsel %vm9279_vm5, %v8106_v17, %v4319_v4  ;;  %v5770_v46 = vshrl.u32 %v8394_v2, 16 }
 0x2e9   : > { %v8762_v52 = vpack.c.bf16 %v7215_v28, %v10676_v19  ;;  %v6298_v49 = vadd.f32 %v6193_v61, %v5256_v51  ;;  %v5766_v28 = vshll.u32 %v8394_v2, 16  ;;  %v10805_v15 = vld [vmem:[%s9118_s26 + $0xc8] sm:$0xf] }
 0x2ea   : > { %v6917_v30 = vpop.f32.mrf.mxu0  ;;  %v6617_v53 = vrot.slane %v10805_v15, 5  ;;  %v4323_v54 = vsel %vm9279_vm5, %v4321_v27, %v4322_v23 }
 0x2eb   : > { %8862 = vst [vmem:[%s10662_s19 + $0x20] sm:$0xff] %v8762_v52   ;;  %v7020_v39 = vadd.f32 %v6915_v32, %v6298_v49  ;;  %v4504_v32 = vpack.c.b16 %v4471_v16, %v4470_v31  ;;  %v5764_v52 = vrot.slane %v5763_v48, 4  ;;  %v5768_v49 = vrot.slane %v5766_v28, 5  ;;  %v11208_v48 = vld [vmem:[#allocation13_spill] sm:$0xff] }
 0x2ec   : > { %v8538_v31 = vrot.slane %v8504_v21, 9  ;;  %v6616_v16 = vrot.slane %v6614_v43, 4  ;;  %v8397_v21 = vld [vmem:[%s9118_s26 + $0xd4] sm:$0xf] }
 0x2ed   : > { %v7168_v41 = vadd.f32 %v10617_v34, %v7020_v39  ;;  %v8396_v39 = vld [vmem:[%s9118_s26 + $0xd0] sm:$0xf] }
 0x2ee   : > { %v5153_v38 = vpop.f32.mrf.mxu2  ;;  %v5784_v47 = vshll.u32 %v8396_v39, 16  ;;  %v6618_v2 = vsel %vm9279_vm5, %v6616_v16, %v6617_v53  ;;  %v8076_v16 = vld [vmem:[%s9118_s26 + $0xc0] sm:$0xe] }
 0x2ef   : > { %v7216_v9 = vmax.f32 %v7168_v41, 0.0  ;;  %v6195_v26 = vpop.f32.mrf.mxu3  ;;  %v5759_v41 = vsel %vm9274_vm4, %v5754_v0, %v5758_v33  ;;  %v5781_v38 = vshrl.u32 %v8396_v39, 16  ;;  %v6768_v10 = vunpack.c.l.b16 %v6618_v2  ;;  %v8508_v2 = vld [vmem:[%s9118_s26 + $0xd0] sm:$0xe] }
 0x2f0   : > { %v4625_v29 = vpop.f32.mrf.mxu1  ;;  %v6615_v26 = vsel %vm9279_vm5, %v8538_v31, %v6614_v43  ;;  %v6045_v33 = vunpack.c.l.b16 %v5759_v41  ;;  %v5786_v58 = vrot.slane %v5784_v47, 5  ;;  %v8075_v31 = vld [vmem:[%s9118_s26 + $0xbc] sm:$0x1]  ;;  %v4324_v41 = vrot.slane %v4322_v23, 4 }
 0x2f1   : > { %v8767_v51 = vpack.c.bf16 %v10676_v19, %v7216_v9  ;;  %v4727_v30 = vadd.f32 %v4625_v29, %v9959_v7  ;;  %v5769_v7 = vsel %vm9274_vm4, %v5764_v52, %v5768_v49  ;;  %v5772_v29 = vrot.slane %v5770_v46, 4 }
 0x2f2   : > { %v6920_v61 = vpop.f32.mrf.mxu0  ;;  %v6046_v4 = vunpack.c.l.b16 %v5769_v7  ;;  %v5783_v6 = vrot.slane %v5781_v38, 4  ;;  %v5790_v7 = vshll.u32 %v8397_v21, 16  ;;  %v8507_v38 = vld [vmem:[%s9118_s26 + $0xcc] sm:$0x1]  ;;  %v4325_v47 = vrot.slane %v8075_v31, 5 }
 0x2f3   : > { %8863 = vst [vmem:[%s10662_s19 + $0x28] sm:$0xff] %v8767_v51   ;;  %4664 = vmatmul.bf16.gmra.mxu1 %v4504_v32  ;;  %5195 = vmatmul.bf16.gmra.mxu2 %v8705_v35  ;;  %v4472_v32 = vunpack.c.l.b16 %v4320_v3  ;;  %v4473_v35 = vunpack.c.l.b16 %v4323_v54  ;;  %v8395_v51 = vld [vmem:[%s9118_s26 + $0xcc] sm:$0x1]  ;;  %v5773_v39 = vor.u32 %v5772_v29, %v5768_v49  ;;  %v10833_v3 = vld [vmem:[%s9118_s26 + $0xc4] sm:$0xf] }
 0x2f4   : > { %6237 = vmatmul.bf16.gmra.mxu3 %v6077_v11  ;;  %v5776_v54 = vshll.u32 %v8395_v51, 16  ;;  %v5787_v46 = vor.u32 %v5786_v58, %v5783_v6  ;;  %v5792_v58 = vrot.slane %v5790_v7, 5  ;;  %v5794_v51 = vshrl.u32 %v8397_v21, 16  ;;  %v8707_v7 = vld [vmem:[%s9118_s26 + $0xcc] sm:$0xf0] }
 0x2f5   : > { %6959 = vmatmul.bf16.gmra.mxu0 %v6799_v18  ;;  %v6767_v18 = vunpack.c.l.b16 %v6615_v26  ;;  %v4505_v52 = vpack.c.b16 %v4473_v35, %v4472_v32  ;;  %v8107_v26 = vrot.slane %v8076_v16, 9  ;;  %v10838_v32 = vld [vmem:[%s9118_s26 + $0xd4] sm:$0xf]  ;;  %v4326_v15 = vsel %vm9279_vm5, %v4324_v41, %v4325_v47  ;;  %v8290_v41 = vld [vmem:[%s9118_s26 + $0xc8] sm:$0xf] }
 0x2f6   : > { %v5156_v20 = vpop.f32.mrf.mxu2  ;;  %v5778_v29 = vrot.slane %v5776_v54, 5  ;;  %v5788_v23 = vrot.slane %v5787_v46, 4  ;;  %v4474_v46 = vunpack.c.l.b16 %v4326_v15 }
 0x2f7   : > { %v5258_v14 = vadd.f32 %v5156_v20, %v4727_v30  ;;  %v6198_v44 = vpop.f32.mrf.mxu3  ;;  %v8706_v30 = vld [vmem:[%s9118_s26 + $0xc0] sm:$0xff] }
 0x2f8   : > { %v4627_v59 = vpop.f32.mrf.mxu1  ;;  %v5793_v16 = vsel %vm9274_vm4, %v5788_v23, %v5792_v58 }
 0x2f9   : > { %v6300_v11 = vadd.f32 %v6198_v44, %v5258_v14  ;;  %v4728_v28 = vadd.f32 %v4627_v59, %v11208_v48  ;;  %v6078_v14 = vpack.c.b16 %v6046_v4, %v6045_v33  ;;  %v6800_v44 = vpack.c.b16 %v6768_v10, %v6767_v18  ;;  %v8398_v4 = vld [vmem:[%s9118_s26 + $0xd8] sm:$0xf] }
 0x2fa   : > { %v6922_v9 = vpop.f32.mrf.mxu0  ;;  %v5774_v33 = vrot.slane %v5773_v39, 4  ;;  %v6619_v18 = vrot.slane %v6617_v53, 4  ;;  %v6620_v10 = vrot.slane %v8507_v38, 5  ;;  %v8539_v48 = vrot.slane %v8508_v2, 9 }
 0x2fb   : > { %v7022_v17 = vadd.f32 %v6920_v61, %v6300_v11  ;;  %v4329_v11 = vrot.slane %v10833_v3, 5  ;;  %v6048_v47 = vunpack.c.l.b16 %v5793_v16 }
 0x2fc   : > { %v5779_v53 = vsel %vm9274_vm4, %v5774_v33, %v5778_v29  ;;  %v6621_v39 = vsel %vm9279_vm5, %v6619_v18, %v6620_v10 }
 0x2fd   : > { %v7170_v49 = vadd.f32 %v10617_v34, %v7022_v17  ;;  %v5804_v17 = vshrl.u32 %v8398_v4, 16  ;;  %v6047_v38 = vunpack.c.l.b16 %v5779_v53 }
 0x2fe   : > { %v5158_v43 = vpop.f32.mrf.mxu2 }
 0x2ff   : > { %v5259_v27 = vadd.f32 %v5158_v43, %v4728_v28  ;;  %v6200_v0 = vpop.f32.mrf.mxu3  ;;  %v5800_v43 = vshll.u32 %v8398_v4, 16  ;;  %v5806_v54 = vrot.slane %v5804_v17, 4  ;;  %v6079_v17 = vpack.c.b16 %v6048_v47, %v6047_v38 }
 0x300   : > { %v4630_v20 = vpop.f32.mrf.mxu1 }
 0x301   : > { %v6301_v59 = vadd.f32 %v6200_v0, %v5259_v27  ;;  %v7218_v27 = vmax.f32 %v7170_v49, 0.0  ;;  %v10860_v3 = vrot.slane %v5800_v43, 5 }
 0x302   : > { %v6925_v61 = vpop.f32.mrf.mxu0 }
 0x303   : > { %v7023_v35 = vadd.f32 %v6922_v9, %v6301_v59  ;;  %4669 = vmatmul.bf16.gmra.mxu1 %v4505_v52  ;;  %5200 = vmatmul.bf16.gmra.mxu2 %v8706_v30  ;;  %v6624_v9 = vrot.slane %v10838_v32, 5  ;;  %v8399_v61 = vld [vmem:[%s9118_s26 + $0xdc] sm:$0x1]  ;;  %v8510_v32 = vld [vmem:[%s9118_s26 + $0xd8] sm:$0xf]  ;;  %v5807_v29 = vor.u32 %v5806_v54, %v10860_v3 }
 0x304   : > { %6242 = vmatmul.bf16.gmra.mxu3 %v6078_v14  ;;  %v8078_v14 = vld [vmem:[%s9118_s26 + $0xc8] sm:$0xf]  ;;  %v5810_v23 = vshll.u32 %v8399_v61, 16 }
 0x305   : > { %6964 = vmatmul.bf16.gmra.mxu0 %v6800_v44  ;;  %v7171_v6 = vadd.f32 %v10617_v34, %v7023_v35  ;;  %v4330_v34 = vsel %vm9279_vm5, %v8107_v26, %v4329_v11  ;;  %v6625_v20 = vsel %vm9279_vm5, %v8539_v48, %v6624_v9  ;;  %v5796_v44 = vrot.slane %v5794_v51, 4 }
 0x306   : > { %v5161_v28 = vpop.f32.mrf.mxu2  ;;  %v4475_v59 = vunpack.c.l.b16 %v4330_v34  ;;  %v6769_v26 = vunpack.c.l.b16 %v6621_v39  ;;  %v6770_v2 = vunpack.c.l.b16 %v6625_v20  ;;  %v4332_v35 = vrot.slane %v8078_v14, 5 }
 0x307   : > { %v7219_v0 = vmax.f32 %v7171_v6, 0.0  ;;  %v6203_v52 = vpop.f32.mrf.mxu3  ;;  %v5797_v4 = vor.u32 %v5796_v44, %v5792_v58  ;;  %v8291_v48 = vor.u32 %v8707_v7, %v8290_v41  ;;  %v8079_v28 = vld [vmem:[%s9118_s26 + $0xcc] sm:$0x1]  ;;  %v6627_v51 = vrot.slane %v8510_v32, 5  ;;  %v10874_v44 = vld [vmem:[%s11171_s2] ss:$0 sm:$0xff] }
 0x308   : > { %v4632_v30 = vpop.f32.mrf.mxu1  ;;  %v4506_v6 = vpack.c.b16 %v4475_v59, %v4474_v46  ;;  %v4331_v34 = vrot.slane %v4329_v11, 4  ;;  %v5808_v53 = vrot.slane %v5807_v29, 4  ;;  %v6626_v39 = vrot.slane %v6624_v9, 4  ;;  %v8400_v46 = vld [vmem:[%s9118_s26 + $0xe0] sm:$0xf] }
 0x309   : > { %v8772_v21 = vpack.c.bf16 %v7219_v0, %v7218_v27  ;;  %v4730_v49 = vadd.f32 %v4632_v30, %v9994_v24  ;;  %v6801_v27 = vpack.c.b16 %v6770_v2, %v6769_v26  ;;  %v8511_v0 = vld [vmem:[%s9118_s26 + $0xdc] sm:$0x1]  ;;  %v4334_v24 = vrot.slane %v4332_v35, 4  ;;  %v8401_v59 = vld [vmem:[%s9118_s26 + $0xe4] sm:$0xf] }
 0x30a   : > { %v6927_v31 = vpop.f32.mrf.mxu0  ;;  %v4335_v30 = vrot.slane %v8079_v28, 5  ;;  %v5798_v58 = vrot.slane %v5797_v4, 4  ;;  %v6629_v20 = vrot.slane %v6627_v51, 4  ;;  %v6630_v14 = vrot.slane %v8511_v0, 5 }
 0x30b   : > { %8864 = vst [vmem:[%s10662_s19 + $0x30] sm:$0xff] %v8772_v21   ;;  %v5812_v21 = vrot.slane %v5810_v23, 5  ;;  %v6628_v26 = vsel %vm9279_vm5, %v6626_v39, %v6627_v51  ;;  %v5828_v4 = vshrl.u32 %v8401_v59, 16  ;;  %v8708_v39 = vld [vmem:[%s9118_s26 + $0xd4] sm:$0xff] }
 0x30c   : > { %v4336_v9 = vsel %vm9279_vm5, %v4334_v24, %v4335_v30  ;;  %v5803_v41 = vsel %vm9274_vm4, %v5798_v58, %v10860_v3  ;;  %v6631_v2 = vsel %vm9279_vm5, %v6629_v20, %v6630_v14  ;;  %v6771_v51 = vunpack.c.l.b16 %v6628_v26  ;;  %v8402_v30 = vld [vmem:[%s9118_s26 + $0xe8] sm:$0xf] }
 0x30d   : > { %v5813_v7 = vsel %vm9274_vm4, %v5808_v53, %v5812_v21  ;;  %v8513_v53 = vld [vmem:[%s9118_s26 + $0xe4] sm:$0xf] }
 0x30e   : > { %v5163_v33 = vpop.f32.mrf.mxu2  ;;  %v6050_v28 = vunpack.c.l.b16 %v5813_v7 }
 0x30f   : > { %v5261_v18 = vadd.f32 %v5163_v33, %v4730_v49  ;;  %v6205_v10 = vpop.f32.mrf.mxu3  ;;  %v5815_v49 = vshrl.u32 %v8400_v46, 16  ;;  %v5824_v33 = vshll.u32 %v8401_v59, 16  ;;  %v10902_v59 = vld [vmem:[%s9118_s26 + $0xd8] sm:$0xf] }
 0x310   : > { %v4635_v43 = vpop.f32.mrf.mxu1 }
 0x311   : > { %v6303_v52 = vadd.f32 %v6205_v10, %v5261_v18  ;;  %v4731_v54 = vadd.f32 %v4635_v43, %v10029_v12  ;;  %v4477_v10 = vunpack.c.l.b16 %v4336_v9  ;;  %v6772_v43 = vunpack.c.l.b16 %v6631_v2 }
 0x312   : > { %v6930_v15 = vpop.f32.mrf.mxu0  ;;  %v5834_v9 = vshll.u32 %v8402_v30, 16 }
 0x313   : > { %v7025_v16 = vadd.f32 %v6927_v31, %v6303_v52  ;;  %4674 = vmatmul.bf16.gmra.mxu1 %v4506_v6  ;;  %5205 = vmatmul.bf16.gmra.mxu2 %v8291_v48  ;;  %v4333_v31 = vsel %vm9279_vm5, %v4331_v34, %v4332_v35  ;;  %v5818_v35 = vshll.u32 %v8400_v46, 16  ;;  %v6049_v6 = vunpack.c.l.b16 %v5803_v41  ;;  %v8080_v46 = vld [vmem:[%s9118_s26 + $0xd0] sm:$0xe] }
 0x314   : > { %6247 = vmatmul.bf16.gmra.mxu3 %v6079_v17  ;;  %v4476_v18 = vunpack.c.l.b16 %v4333_v31  ;;  %v8081_v17 = vld [vmem:[%s9118_s26 + $0xd4] sm:$0xf]  ;;  %v5826_v52 = vrot.slane %v5824_v33, 5  ;;  %v5830_v34 = vrot.slane %v5828_v4, 4  ;;  %v8108_v26 = vrot.slane %v8080_v46, 9 }
 0x315   : > { %6969 = vmatmul.bf16.gmra.mxu0 %v6801_v27  ;;  %v7173_v11 = vadd.f32 %v10874_v44, %v7025_v16  ;;  %v5817_v27 = vrot.slane %v5815_v49, 4  ;;  %v5820_v0 = vrot.slane %v5818_v35, 5  ;;  %v6080_v20 = vpack.c.b16 %v6050_v28, %v6049_v6 }
 0x316   : > { %v5166_v61 = vpop.f32.mrf.mxu2  ;;  %v4339_v14 = vrot.slane %v8081_v17, 5  ;;  %v5831_v31 = vor.u32 %v5830_v34, %v5826_v52  ;;  %v5836_v33 = vrot.slane %v5834_v9, 5 }
 0x317   : > { %v7221_v38 = vmax.f32 %v7173_v11, 0.0  ;;  %v5262_v47 = vadd.f32 %v5166_v61, %v4731_v54  ;;  %v6208_v12 = vpop.f32.mrf.mxu3  ;;  %v6802_v54 = vpack.c.b16 %v6772_v43, %v6771_v51  ;;  %v5821_v61 = vor.u32 %v5820_v0, %v5817_v27 }
 0x318   : > { %v4637_v32 = vpop.f32.mrf.mxu1  ;;  %v4341_v2 = vrot.slane %v4339_v14, 4  ;;  %v5832_v35 = vrot.slane %v5831_v31, 4  ;;  %v4340_v28 = vsel %vm9279_vm5, %v8108_v26, %v4339_v14  ;;  %v5838_v43 = vshrl.u32 %v8402_v30, 16  ;;  %v8405_v31 = vld [vmem:[%s9118_s26 + $0xf4] sm:$0xf]  ;;  %v8709_v26 = vld [vmem:[%s9118_s26 + $0xe0] sm:$0xff] }
 0x319   : > { %v8777_v3 = vpack.c.bf16 %v7221_v38, %v10676_v19  ;;  %v6304_v29 = vadd.f32 %v6208_v12, %v5262_v47  ;;  %v6634_v38 = vrot.slane %v8513_v53, 5  ;;  %v8512_v47 = vld [vmem:[%s9118_s26 + $0xe0] sm:$0xe]  ;;  %v10907_v12 = vld [vmem:[%s9118_s26 + $0xe8] sm:$0xf]  ;;  %v4342_v32 = vrot.slane %v10902_v59, 5 }
 0x31a   : > { %v6932_v23 = vpop.f32.mrf.mxu0  ;;  %v5822_v49 = vrot.slane %v5821_v61, 4  ;;  %v4478_v53 = vunpack.c.l.b16 %v4340_v28  ;;  %v8403_v59 = vld [vmem:[%s9118_s26 + $0xec] sm:$0x1]  ;;  %v5858_v28 = vshll.u32 %v8405_v31, 16 }
 0x31b   : > { %8865 = vst [vmem:[%s10662_s19 + $0x38] sm:$0xff] %v8777_v3   ;;  %v7026_v48 = vadd.f32 %v6930_v15, %v6304_v29  ;;  %v4507_v15 = vpack.c.b16 %v4477_v10, %v4476_v18  ;;  %v8540_v3 = vrot.slane %v8512_v47, 9  ;;  %v6636_v29 = vrot.slane %v6634_v38, 4  ;;  %v8404_v18 = vld [vmem:[%s9118_s26 + $0xf0] sm:$0xf] }
 0x31c   : > { %v6637_v23 = vrot.slane %v10907_v12, 5  ;;  %v4343_v51 = vsel %vm9279_vm5, %v4341_v2, %v4342_v32  ;;  %v5827_v27 = vsel %vm9274_vm4, %v5822_v49, %v5826_v52  ;;  %v5849_v0 = vshrl.u32 %v8404_v18, 16  ;;  %v8083_v2 = vld [vmem:[%s9118_s26 + $0xdc] sm:$0x1]  ;;  %v8084_v49 = vld [vmem:[%s9118_s26 + $0xe0] sm:$0xe] }
 0x31d   : > { %v7174_v24 = vadd.f32 %v10874_v44, %v7026_v48  ;;  %v5852_v34 = vshll.u32 %v8404_v18, 16  ;;  %v6051_v52 = vunpack.c.l.b16 %v5827_v27  ;;  %v10935_v18 = vld [vmem:[%s9118_s26 + $0xe4] sm:$0xf]  ;;  %v8516_v27 = vld [vmem:[%s9118_s26 + $0xf0] sm:$0xe] }
 0x31e   : > { %v5168_v58 = vpop.f32.mrf.mxu2  ;;  %v6638_v30 = vsel %vm9279_vm5, %v6636_v29, %v6637_v23 }
 0x31f   : > { %v7222_v21 = vmax.f32 %v7174_v24, 0.0  ;;  %v6210_v16 = vpop.f32.mrf.mxu3  ;;  %v6635_v58 = vsel %vm9279_vm5, %v8540_v3, %v6634_v38  ;;  %v6774_v14 = vunpack.c.l.b16 %v6638_v30  ;;  %v8406_v30 = vld [vmem:[%s9118_s26 + $0xf8] sm:$0xf] }
 0x320   : > { %v4640_v11 = vpop.f32.mrf.mxu1 }
 0x321   : > { %v8782_v41 = vpack.c.bf16 %v10676_v19, %v7222_v21  ;;  %v4733_v4 = vadd.f32 %v4640_v11, %v10089_v45  ;;  %v5837_v45 = vsel %vm9274_vm4, %v5832_v35, %v5836_v33  ;;  %v4479_v21 = vunpack.c.l.b16 %v4343_v51  ;;  %v8515_v51 = vld [vmem:[%s9118_s26 + $0xec] sm:$0x1] }
 0x322   : > { %v6935_v7 = vpop.f32.mrf.mxu0  ;;  %v5851_v11 = vrot.slane %v5849_v0, 4 }
 0x323   : > { %8866 = vst [vmem:[%s10662_s19 + $0x40] sm:$0xff] %v8782_v41   ;;  %4679 = vmatmul.bf16.gmra.mxu1 %v4507_v15  ;;  %5210 = vmatmul.bf16.gmra.mxu2 %v8708_v39  ;;  %v6052_v15 = vunpack.c.l.b16 %v5837_v45  ;;  %v5840_v39 = vrot.slane %v5838_v43, 4  ;;  %v4508_v47 = vpack.c.b16 %v4479_v21, %v4478_v53  ;;  %v4345_v43 = vrot.slane %v8083_v2, 5  ;;  %v10940_v45 = vld [vmem:[%s9118_s26 + $0xf4] sm:$0xf] }
 0x324   : > { %6252 = vmatmul.bf16.gmra.mxu3 %v6080_v20  ;;  %v6773_v20 = vunpack.c.l.b16 %v6635_v58  ;;  %v6639_v21 = vrot.slane %v6637_v23, 4 }
 0x325   : > { %6974 = vmatmul.bf16.gmra.mxu0 %v6802_v54  ;;  %v5854_v54 = vrot.slane %v5852_v34, 5  ;;  %v5841_v35 = vor.u32 %v5840_v39, %v5836_v33  ;;  %v6081_v3 = vpack.c.b16 %v6052_v15, %v6051_v52  ;;  %v4349_v34 = vrot.slane %v10935_v18, 5 }
 0x326   : > { %v5171_v10 = vpop.f32.mrf.mxu2  ;;  %v6803_v29 = vpack.c.b16 %v6774_v14, %v6773_v20  ;;  %v5860_v15 = vrot.slane %v5858_v28, 5  ;;  %v8541_v39 = vrot.slane %v8516_v27, 9  ;;  %v5862_v14 = vshrl.u32 %v8405_v31, 16 }
 0x327   : > { %v5264_v6 = vadd.f32 %v5171_v10, %v4733_v4  ;;  %v6213_v48 = vpop.f32.mrf.mxu3  ;;  %v5855_v10 = vor.u32 %v5854_v54, %v5851_v11  ;;  %v5842_v58 = vrot.slane %v5841_v35, 4  ;;  %v5868_v11 = vshll.u32 %v8406_v30, 16 }
 0x328   : > { %v4642_v17 = vpop.f32.mrf.mxu1  ;;  %v5872_v54 = vshrl.u32 %v8406_v30, 16  ;;  %v5864_v35 = vrot.slane %v5862_v14, 4 }
 0x329   : > { %v6306_v16 = vadd.f32 %v6213_v48, %v5264_v6  ;;  %v4734_v46 = vadd.f32 %v4642_v17, %v10095_v36  ;;  %v5844_v36 = vshll.u32 %v8403_v59, 16  ;;  %v4344_v48 = vrot.slane %v4342_v32, 4 }
 0x32a   : > { %v6937_v24 = vpop.f32.mrf.mxu0  ;;  %v8109_v17 = vrot.slane %v8084_v49, 9  ;;  %v5856_v32 = vrot.slane %v5855_v10, 4  ;;  %v8086_v49 = vld [vmem:[%s9118_s26 + $0xe8] sm:$0xf] }
 0x32b   : > { %v7028_v9 = vadd.f32 %v6935_v7, %v6306_v16  ;;  %v5846_v53 = vrot.slane %v5844_v36, 5  ;;  %v6640_v16 = vrot.slane %v8515_v51, 5  ;;  %v4346_v12 = vsel %vm9279_vm5, %v4344_v48, %v4345_v43  ;;  %v8407_v36 = vld [vmem:[%s9118_s26 + $0xfc] sm:$0x1]  ;;  %v8302_v10 = vld [vmem:[%s9118_s26 + $0xe8] sm:$0xf] }
 0x32c   : > { %v4350_v23 = vsel %vm9279_vm5, %v8109_v17, %v4349_v34  ;;  %v8518_v43 = vld [vmem:[%s9118_s26 + $0xf8] sm:$0xf]  ;;  %v4352_v27 = vrot.slane %v8086_v49, 5  ;;  %v8409_v49 = vld [vmem:[%s9118_s26 + $0x104] sm:$0xf] }
 0x32d   : > { %v7176_v33 = vadd.f32 %v10874_v44, %v7028_v9  ;;  %v4481_v18 = vunpack.c.l.b16 %v4350_v23 }
 0x32e   : > { %v5173_v61 = vpop.f32.mrf.mxu2 }
 0x32f   : > { %v5265_v41 = vadd.f32 %v5173_v61, %v4734_v46  ;;  %v6215_v38 = vpop.f32.mrf.mxu3  ;;  %v7224_v46 = vmax.f32 %v7176_v33, 0.0  ;;  %v5865_v33 = vor.u32 %v5864_v35, %v5860_v15 }
 0x330   : > { %v4645_v4 = vpop.f32.mrf.mxu1 }
 0x331   : > { %v6307_v6 = vadd.f32 %v6215_v38, %v5265_v41  ;;  %v5847_v41 = vsel %vm9274_vm4, %v5842_v58, %v5846_v53  ;;  %v10962_v4 = vrot.slane %v5868_v11, 5  ;;  %v5878_v58 = vshll.u32 %v8407_v36, 16  ;;  %v8519_v11 = vld [vmem:[%s9118_s26 + $0xfc] sm:$0x1] }
 0x332   : > { %v6940_v7 = vpop.f32.mrf.mxu0 }
 0x333   : > { %v7029_v0 = vadd.f32 %v6937_v24, %v6307_v6  ;;  %4684 = vmatmul.bf16.gmra.mxu1 %v4508_v47  ;;  %5215 = vmatmul.bf16.gmra.mxu2 %v8709_v26  ;;  %v6644_v24 = vrot.slane %v10940_v45, 5  ;;  %v5861_v47 = vsel %vm9274_vm4, %v5856_v32, %v5860_v15  ;;  %v6641_v26 = vsel %vm9279_vm5, %v6639_v21, %v6640_v16  ;;  %v8710_v6 = vld [vmem:[%s9118_s26 + $0xec] sm:$0xf0]  ;;  %v8087_v16 = vld [vmem:[%s9118_s26 + $0xec] sm:$0x1] }
 0x334   : > { %6257 = vmatmul.bf16.gmra.mxu3 %v6081_v3  ;;  %v5874_v3 = vrot.slane %v5872_v54, 4  ;;  %v6053_v7 = vunpack.c.l.b16 %v5847_v41  ;;  %v6054_v48 = vunpack.c.l.b16 %v5861_v47  ;;  %v6775_v28 = vunpack.c.l.b16 %v6641_v26 }
 0x335   : > { %6979 = vmatmul.bf16.gmra.mxu0 %v6803_v29  ;;  %v7177_v52 = vadd.f32 %v10874_v44, %v7029_v0  ;;  %v6645_v2 = vsel %vm9279_vm5, %v8541_v39, %v6644_v24  ;;  %v4480_v29 = vunpack.c.l.b16 %v4346_v12  ;;  %v8303_v21 = vor.u32 %v8710_v6, %v8302_v10 }
 0x336   : > { %v5176_v20 = vpop.f32.mrf.mxu2  ;;  %v6776_v51 = vunpack.c.l.b16 %v6645_v2  ;;  %v5875_v0 = vor.u32 %v5874_v3, %v10962_v4  ;;  %v4355_v15 = vrot.slane %v8087_v16, 5  ;;  %v5880_v12 = vrot.slane %v5878_v58, 5 }
 0x337   : > { %v7225_v59 = vmax.f32 %v7177_v52, 0.0  ;;  %v6218_v61 = vpop.f32.mrf.mxu3  ;;  %v4509_v32 = vpack.c.b16 %v4481_v18, %v4480_v29  ;;  %v6647_v52 = vrot.slane %v8518_v43, 5  ;;  %v6082_v20 = vpack.c.b16 %v6054_v48, %v6053_v7 }
 0x338   : > { %v4647_v9 = vpop.f32.mrf.mxu1  ;;  %v6804_v14 = vpack.c.b16 %v6776_v51, %v6775_v28  ;;  %v5866_v61 = vrot.slane %v5865_v33, 4  ;;  %v6646_v41 = vrot.slane %v6644_v24, 4  ;;  %v6650_v47 = vrot.slane %v8519_v11, 5  ;;  %v8410_v11 = vld [vmem:[%s9118_s26 + $0x108] sm:$0xf] }
 0x339   : > { %v8787_v31 = vpack.c.bf16 %v7225_v59, %v7224_v46  ;;  %v4736_v17 = vadd.f32 %v4647_v9, %v10134_v13  ;;  %v4351_v59 = vrot.slane %v4349_v34, 4  ;;  %v4354_v13 = vrot.slane %v4352_v27, 4  ;;  %v8408_v34 = vld [vmem:[%s9118_s26 + $0x100] sm:$0xf] }
 0x33a   : > { %v6942_v38 = vpop.f32.mrf.mxu0  ;;  %v5876_v9 = vrot.slane %v5875_v0, 4  ;;  %v5871_v24 = vsel %vm9274_vm4, %v5866_v61, %v10962_v4  ;;  %v6648_v10 = vsel %vm9279_vm5, %v6646_v41, %v6647_v52  ;;  %v5883_v48 = vshrl.u32 %v8408_v34, 16  ;;  %v8711_v61 = vld [vmem:[%s9118_s26 + $0xf4] sm:$0xff] }
 0x33b   : > { %8867 = vst [vmem:[%s10662_s19 + $0x48] sm:$0xff] %v8787_v31   ;;  %v6649_v31 = vrot.slane %v6647_v52, 4  ;;  %v4353_v3 = vsel %vm9279_vm5, %v4351_v59, %v4352_v27  ;;  %v5886_v28 = vshll.u32 %v8408_v34, 16  ;;  %v5892_v51 = vshll.u32 %v8409_v49, 16  ;;  %v8521_v59 = vld [vmem:[%s9118_s26 + $0x104] sm:$0xf] }
 0x33c   : > { %v5881_v29 = vsel %vm9274_vm4, %v5876_v9, %v5880_v12  ;;  %v5896_v43 = vshrl.u32 %v8409_v49, 16  ;;  %v6055_v0 = vunpack.c.l.b16 %v5871_v24  ;;  %v5885_v16 = vrot.slane %v5883_v48, 4  ;;  %v11004_v24 = vld [vmem:[%s9118_s26 + $0x108] sm:$0xf] }
 0x33d   : > { %v6651_v6 = vsel %vm9279_vm5, %v6649_v31, %v6650_v47  ;;  %v5888_v52 = vrot.slane %v5886_v28, 5  ;;  %v8088_v31 = vld [vmem:[%s9118_s26 + $0xf0] sm:$0xe]  ;;  %v10999_v47 = vld [vmem:[%s9118_s26 + $0xf8] sm:$0xf]  ;;  %v5902_v34 = vshll.u32 %v8410_v11, 16 }
 0x33e   : > { %v5178_v45 = vpop.f32.mrf.mxu2 }
 0x33f   : > { %v5267_v30 = vadd.f32 %v5178_v45, %v4736_v17  ;;  %v6220_v53 = vpop.f32.mrf.mxu3  ;;  %v4482_v45 = vunpack.c.l.b16 %v4353_v3  ;;  %v6654_v3 = vrot.slane %v8521_v59, 5 }
 0x340   : > { %v4650_v39 = vpop.f32.mrf.mxu1 }
 0x341   : > { %v6309_v54 = vadd.f32 %v6220_v53, %v5267_v30  ;;  %v4737_v2 = vadd.f32 %v4650_v39, %v10170_v25  ;;  %v6056_v30 = vunpack.c.l.b16 %v5881_v29  ;;  %v6777_v53 = vunpack.c.l.b16 %v6648_v10 }
 0x342   : > { %v6945_v46 = vpop.f32.mrf.mxu0  ;;  %v5894_v39 = vrot.slane %v5892_v51, 5  ;;  %v8110_v29 = vrot.slane %v8088_v31, 9  ;;  %v6656_v28 = vrot.slane %v6654_v3, 4  ;;  %v6657_v51 = vrot.slane %v11004_v24, 5 }
 0x343   : > { %v7031_v23 = vadd.f32 %v6942_v38, %v6309_v54  ;;  %4689 = vmatmul.bf16.gmra.mxu1 %v4509_v32  ;;  %5220 = vmatmul.bf16.gmra.mxu2 %v8303_v21  ;;  %v4356_v38 = vsel %vm9279_vm5, %v4354_v13, %v4355_v15  ;;  %v6778_v32 = vunpack.c.l.b16 %v6651_v6  ;;  %v8089_v21 = vld [vmem:[%s9118_s26 + $0xf4] sm:$0xf]  ;;  %v6083_v9 = vpack.c.b16 %v6056_v30, %v6055_v0 }
 0x344   : > { %6262 = vmatmul.bf16.gmra.mxu3 %v6082_v20  ;;  %v4483_v33 = vunpack.c.l.b16 %v4356_v38  ;;  %v5898_v20 = vrot.slane %v5896_v43, 4  ;;  %v4359_v12 = vrot.slane %v8089_v21, 5  ;;  %v8520_v38 = vld [vmem:[%s9118_s26 + $0x100] sm:$0xe]  ;;  %v5904_v6 = vrot.slane %v5902_v34, 5 }
 0x345   : > { %6984 = vmatmul.bf16.gmra.mxu0 %v6804_v14  ;;  %v7179_v26 = vadd.f32 %v10874_v44, %v7031_v23  ;;  %v6805_v41 = vpack.c.b16 %v6778_v32, %v6777_v53  ;;  %v8542_v48 = vrot.slane %v8520_v38, 9  ;;  %v8412_v43 = vld [vmem:[%s9118_s26 + $0x110] sm:$0xf] }
 0x346   : > { %v5181_v35 = vpop.f32.mrf.mxu2  ;;  %v5917_v53 = vshrl.u32 %v8412_v43, 16  ;;  %v5920_v32 = vshll.u32 %v8412_v43, 16 }
 0x347   : > { %v7227_v18 = vmax.f32 %v7179_v26, 0.0  ;;  %v5268_v36 = vadd.f32 %v5181_v35, %v4737_v2  ;;  %v6223_v25 = vpop.f32.mrf.mxu3  ;;  %v5889_v26 = vor.u32 %v5888_v52, %v5885_v16  ;;  %v5899_v2 = vor.u32 %v5898_v20, %v5894_v39 }
 0x348   : > { %v4652_v7 = vpop.f32.mrf.mxu1  ;;  %v6655_v16 = vsel %vm9279_vm5, %v8542_v48, %v6654_v3  ;;  %v6658_v52 = vsel %vm9279_vm5, %v6656_v28, %v6657_v51  ;;  %v8523_v28 = vld [vmem:[%s9118_s26 + $0x10c] sm:$0x1] }
 0x349   : > { %v8792_v4 = vpack.c.bf16 %v7227_v18, %v10676_v19  ;;  %v6310_v17 = vadd.f32 %v6223_v25, %v5268_v36  ;;  %v4361_v18 = vrot.slane %v4359_v12, 4  ;;  %v4362_v36 = vrot.slane %v10999_v47, 5  ;;  %v8091_v47 = vld [vmem:[%s9118_s26 + $0xfc] sm:$0x1] }
 0x34a   : > { %v6947_v27 = vpop.f32.mrf.mxu0  ;;  %v5890_v25 = vrot.slane %v5889_v26, 4  ;;  %v5900_v10 = vrot.slane %v5899_v2, 4  ;;  %v8092_v26 = vld [vmem:[%s9118_s26 + $0x100] sm:$0xe]  ;;  %v11031_v2 = vld [vmem:[%s9118_s26 + $0x104] sm:$0xf] }
 0x34b   : > { %8868 = vst [vmem:[%s10662_s19 + $0x50] sm:$0xff] %v8792_v4   ;;  %v7032_v58 = vadd.f32 %v6945_v46, %v6310_v17  ;;  %v4510_v46 = vpack.c.b16 %v4483_v33, %v4482_v45  ;;  %v5906_v17 = vshrl.u32 %v8410_v11, 16  ;;  %v4360_v33 = vsel %vm9279_vm5, %v8110_v29, %v4359_v12  ;;  %v8712_v29 = vld [vmem:[%s9118_s26 + $0x100] sm:$0xff] }
 0x34c   : > { %v4363_v0 = vsel %vm9279_vm5, %v4361_v18, %v4362_v36  ;;  %v5905_v30 = vsel %vm9274_vm4, %v5900_v10, %v5904_v6  ;;  %v4484_v20 = vunpack.c.l.b16 %v4360_v33  ;;  %v4364_v10 = vrot.slane %v4362_v36, 4  ;;  %v8524_v33 = vld [vmem:[%s9118_s26 + $0x110] sm:$0xe] }
 0x34d   : > { %v7180_v14 = vadd.f32 %v10874_v44, %v7032_v58  ;;  %v5908_v11 = vrot.slane %v5906_v17, 4  ;;  %v4365_v17 = vrot.slane %v8091_v47, 5  ;;  %v6659_v36 = vrot.slane %v6657_v51, 4 }
 0x34e   : > { %v5183_v54 = vpop.f32.mrf.mxu2 }
 0x34f   : > { %v7228_v13 = vmax.f32 %v7180_v14, 0.0  ;;  %v6225_v15 = vpop.f32.mrf.mxu3  ;;  %v8411_v14 = vld [vmem:[%s9118_s26 + $0x10c] sm:$0x1]  ;;  %v4485_v54 = vunpack.c.l.b16 %v4363_v0  ;;  %v5909_v34 = vor.u32 %v5908_v11, %v5904_v6  ;;  %v11039_v0 = vld [vmem:[%s9118_s26 + $0x114] sm:$0xf] }
 0x350   : > { %v4655_v23 = vpop.f32.mrf.mxu1  ;;  %v6779_v15 = vunpack.c.l.b16 %v6655_v16 }
 0x351   : > { %v8797_v49 = vpack.c.bf16 %v10676_v19, %v7228_v13  ;;  %v4739_v7 = vadd.f32 %v4655_v23, %v10226_v37  ;;  %v5895_v37 = vsel %vm9274_vm4, %v5890_v25, %v5894_v39  ;;  %v6058_v13 = vunpack.c.l.b16 %v5905_v30  ;;  %v11026_v23 = vld [vmem:[%s9118_s26 + $0x114] sm:$0xf] }
 0x352   : > { %v6950_v35 = vpop.f32.mrf.mxu0  ;;  %v6057_v59 = vunpack.c.l.b16 %v5895_v37  ;;  %v4511_v24 = vpack.c.b16 %v4485_v54, %v4484_v20  ;;  %v5926_v48 = vshll.u32 %v11026_v23, 16  ;;  %v5910_v6 = vrot.slane %v5909_v34, 4 }
 0x353   : > { %8869 = vst [vmem:[%s10662_s19 + $0x58] sm:$0xff] %v8797_v49   ;;  %4694 = vmatmul.bf16.gmra.mxu1 %v4510_v46  ;;  %5225 = vmatmul.bf16.gmra.mxu2 %v8711_v61  ;;  %v6780_v46 = vunpack.c.l.b16 %v6658_v52  ;;  %v5919_v61 = vrot.slane %v5917_v53, 4  ;;  %v6660_v30 = vrot.slane %v8523_v28, 5  ;;  %v8543_v52 = vrot.slane %v8524_v33, 9  ;;  %v8415_v28 = vld [vmem:[%s9118_s26 + $0x11c] sm:$0x1] }
 0x354   : > { %6267 = vmatmul.bf16.gmra.mxu3 %v6083_v9  ;;  %v5922_v9 = vrot.slane %v5920_v32, 5  ;;  %v6084_v18 = vpack.c.b16 %v6058_v13, %v6057_v59  ;;  %v5928_v32 = vrot.slane %v5926_v48, 5  ;;  %v6664_v20 = vrot.slane %v11039_v0, 5 }
 0x355   : > { %6989 = vmatmul.bf16.gmra.mxu0 %v6805_v41  ;;  %v5912_v41 = vshll.u32 %v8411_v14, 16  ;;  %v8414_v14 = vld [vmem:[%s9118_s26 + $0x118] sm:$0xf] }
 0x356   : > { %v5186_v4 = vpop.f32.mrf.mxu2 }
 0x357   : > { %v5270_v27 = vadd.f32 %v5186_v4, %v4739_v7  ;;  %v6228_v45 = vpop.f32.mrf.mxu3  ;;  %v5923_v7 = vor.u32 %v5922_v9, %v5919_v61  ;;  %v5930_v9 = vshrl.u32 %v11026_v23, 16 }
 0x358   : > { %v4657_v58 = vpop.f32.mrf.mxu1 }
 0x359   : > { %v6312_v39 = vadd.f32 %v6228_v45, %v5270_v27  ;;  %v4740_v12 = vadd.f32 %v4657_v58, %v10234_v40  ;;  %v6806_v40 = vpack.c.b16 %v6780_v46, %v6779_v15  ;;  %v8111_v27 = vrot.slane %v8092_v26, 9 }
 0x35a   : > { %v6952_v21 = vpop.f32.mrf.mxu0  ;;  %v5914_v45 = vrot.slane %v5912_v41, 5  ;;  %v5924_v53 = vrot.slane %v5923_v7, 4  ;;  %v6661_v15 = vsel %vm9279_vm5, %v6659_v36, %v6660_v30  ;;  %v5940_v41 = vshrl.u32 %v8414_v14, 16  ;;  %v8095_v36 = vld [vmem:[%s9118_s26 + $0x10c] sm:$0x1] }
 0x35b   : > { %v7034_v49 = vadd.f32 %v6950_v35, %v6312_v39  ;;  %v4369_v35 = vrot.slane %v11031_v2, 5  ;;  %v4366_v39 = vsel %vm9279_vm5, %v4364_v10, %v4365_v17  ;;  %v6665_v26 = vsel %vm9279_vm5, %v8543_v52, %v6664_v20  ;;  %v8526_v17 = vld [vmem:[%s9118_s26 + $0x118] sm:$0xf] }
 0x35c   : > { %v5915_v13 = vsel %vm9274_vm4, %v5910_v6, %v5914_v45  ;;  %v5929_v61 = vsel %vm9274_vm4, %v5924_v53, %v5928_v32  ;;  %v4486_v34 = vunpack.c.l.b16 %v4366_v39  ;;  %v5932_v23 = vrot.slane %v5930_v9, 4 }
 0x35d   : > { %v7182_v58 = vadd.f32 %v10874_v44, %v7034_v49  ;;  %v4370_v51 = vsel %vm9279_vm5, %v8111_v27, %v4369_v35  ;;  %v5942_v7 = vrot.slane %v5940_v41, 4 }
 0x35e   : > { %v5188_v31 = vpop.f32.mrf.mxu2  ;;  %v4487_v49 = vunpack.c.l.b16 %v4370_v51  ;;  %v5933_v30 = vor.u32 %v5932_v23, %v5928_v32  ;;  %v4371_v51 = vrot.slane %v4369_v35, 4  ;;  %v6666_v32 = vrot.slane %v6664_v20, 4 }
 0x35f   : > { %v5271_v3 = vadd.f32 %v5188_v31, %v4740_v12  ;;  %v6230_v38 = vpop.f32.mrf.mxu3  ;;  %v5936_v12 = vshll.u32 %v8414_v14, 16 }
 0x360   : > { %v4660_v25 = vpop.f32.mrf.mxu1 }
 0x361   : > { %v6313_v43 = vadd.f32 %v6230_v38, %v5271_v3  ;;  %v8314_v3 = vld [vmem:[%s9118_s26 + $0x108] sm:$0xf]  ;;  %v8713_v38 = vld [vmem:[%s9118_s26 + $0x10c] sm:$0xf0]  ;;  %v6782_v25 = vunpack.c.l.b16 %v6665_v26  ;;  %v5938_v10 = vrot.slane %v5936_v12, 5 }
 0x362   : > { %v6955_v4 = vpop.f32.mrf.mxu0  ;;  %v8315_v45 = vor.u32 %v8713_v38, %v8314_v3 }
 0x363   : > { %v7035_v37 = vadd.f32 %v6952_v21, %v6313_v43  ;;  %4699 = vmatmul.bf16.gmra.mxu1 %v4511_v24  ;;  %5230 = vmatmul.bf16.gmra.mxu2 %v8712_v29  ;;  %v7230_v21 = vmax.f32 %v7182_v58, 0.0  ;;  %v6059_v24 = vunpack.c.l.b16 %v5915_v13  ;;  %v6060_v29 = vunpack.c.l.b16 %v5929_v61 }
 0x364   : > { %6272 = vmatmul.bf16.gmra.mxu3 %v6084_v18  ;;  %v6781_v18 = vunpack.c.l.b16 %v6661_v15  ;;  %v4512_v4 = vpack.c.b16 %v4487_v49, %v4486_v34  ;;  %v5943_v53 = vor.u32 %v5942_v7, %v5938_v10 }
 0x365   : > { %6994 = vmatmul.bf16.gmra.mxu0 %v6806_v40  ;;  %v7183_v16 = vadd.f32 %v10874_v44, %v7035_v37  ;;  %v8094_v40 = vld [vmem:[%s9118_s26 + $0x108] sm:$0xf]  ;;  %v6085_v33 = vpack.c.b16 %v6060_v29, %v6059_v24 }
 0x366   : > { %v5191_v11 = vpop.f32.mrf.mxu2  ;;  %v4372_v0 = vrot.slane %v8094_v40, 5  ;;  %v6807_v37 = vpack.c.b16 %v6782_v25, %v6781_v18  ;;  %v5944_v13 = vrot.slane %v5943_v53, 4 }
 0x367   : > { %v7231_v54 = vmax.f32 %v7183_v16, 0.0  ;;  %v6233_v59 = vpop.f32.mrf.mxu3  ;;  %v5946_v16 = vshll.u32 %v8415_v28, 16  ;;  %v6667_v11 = vrot.slane %v8526_v17, 5 }
 0x368   : > { %v4662_v46 = vpop.f32.mrf.mxu1  ;;  %v5934_v59 = vrot.slane %v5933_v30, 4  ;;  %v4373_v26 = vsel %vm9279_vm5, %v4371_v51, %v4372_v0 }
 0x369   : > { %v8802_v31 = vpack.c.bf16 %v7231_v54, %v7230_v21  ;;  %v4742_v48 = vadd.f32 %v4662_v46, %v10267_v1  ;;  %v8527_v1 = vld [vmem:[%s9118_s26 + $0x11c] sm:$0x1]  ;;  %v4374_v21 = vrot.slane %v4372_v0, 4  ;;  %v4375_v54 = vrot.slane %v8095_v36, 5 }
 0x36a   : > { %v6957_v47 = vpop.f32.mrf.mxu0  ;;  %v5948_v15 = vrot.slane %v5946_v16, 5  ;;  %v6669_v9 = vrot.slane %v6667_v11, 4  ;;  %v6670_v12 = vrot.slane %v8527_v1, 5  ;;  %v5939_v20 = vsel %vm9274_vm4, %v5934_v59, %v5938_v10 }
 0x36b   : > { %8870 = vst [vmem:[%s10662_s19 + $0x60] sm:$0xff] %v8802_v31   ;;  %v4376_v34 = vsel %vm9279_vm5, %v4374_v21, %v4375_v54  ;;  %v6668_v24 = vsel %vm9279_vm5, %v6666_v32, %v6667_v11  ;;  %v4488_v25 = vunpack.c.l.b16 %v4373_v26  ;;  %v6061_v23 = vunpack.c.l.b16 %v5939_v20 }
 0x36c   : > { %v6671_v29 = vsel %vm9279_vm5, %v6669_v9, %v6670_v12  ;;  %v4489_v40 = vunpack.c.l.b16 %v4376_v34  ;;  %v6783_v55 = vunpack.c.l.b16 %v6668_v24 }
 0x36d   : > { %v6784_v7 = vunpack.c.l.b16 %v6671_v29 }
 0x36e   : > { %v5193_v43 = vpop.f32.mrf.mxu2  ;;  %v4513_v17 = vpack.c.b16 %v4489_v40, %v4488_v25 }
 0x36f   : > { %v5273_v27 = vadd.f32 %v5193_v43, %v4742_v48  ;;  %v6235_v6 = vpop.f32.mrf.mxu3  ;;  %v6808_v57 = vpack.c.b16 %v6784_v7, %v6783_v55 }
 0x370   : > { %v4665_v58 = vpop.f32.mrf.mxu1 }
 0x371   : > { %v6315_v52 = vadd.f32 %v6235_v6, %v5273_v27  ;;  %v4743_v61 = vadd.f32 %v4665_v58, %v10285_v50  ;;  %v5949_v50 = vsel %vm9274_vm4, %v5944_v13, %v5948_v15  ;;  %v8714_v27 = vld [vmem:[%s9118_s26 + $0x114] sm:$0xff] }
 0x372   : > { %v6960_v14 = vpop.f32.mrf.mxu0  ;;  %v6062_v10 = vunpack.c.l.b16 %v5949_v50 }
 0x373   : > { %v7037_v39 = vadd.f32 %v6957_v47, %v6315_v52  ;;  %4704 = vmatmul.bf16.gmra.mxu1 %v4512_v4  ;;  %5235 = vmatmul.bf16.gmra.mxu2 %v8315_v45 }
 0x374   : > { %6277 = vmatmul.bf16.gmra.mxu3 %v6085_v33  ;;  %v6086_v45 = vpack.c.b16 %v6062_v10, %v6061_v23 }
 0x375   : > { %6999 = vmatmul.bf16.gmra.mxu0 %v6807_v37  ;;  %v7185_v46 = vadd.f32 %v10874_v44, %v7037_v39 }
 0x376   : > { %v5196_v41 = vpop.f32.mrf.mxu2 }
 0x377   : > { %v7233_v31 = vmax.f32 %v7185_v46, 0.0  ;;  %v5274_v47 = vadd.f32 %v5196_v41, %v4743_v61  ;;  %v6238_v2 = vpop.f32.mrf.mxu3 }
 0x378   : > { %v4667_v35 = vpop.f32.mrf.mxu1 }
 0x379   : > { %v8807_v49 = vpack.c.bf16 %v7233_v31, %v10676_v19  ;;  %v6316_v3 = vadd.f32 %v6238_v2, %v5274_v47 }
 0x37a   : > { %v6962_v38 = vpop.f32.mrf.mxu0 }
 0x37b   : > { %8871 = vst [vmem:[%s10662_s19 + $0x68] sm:$0xff] %v8807_v49   ;;  %v7038_v18 = vadd.f32 %v6960_v14, %v6316_v3 }
 0x37d   : > { %v7186_v48 = vadd.f32 %v10874_v44, %v7038_v18 }
 0x37e   : > { %v5198_v28 = vpop.f32.mrf.mxu2 }
 0x37f   : > { %v7234_v43 = vmax.f32 %v7186_v48, 0.0  ;;  %v6240_v4 = vpop.f32.mrf.mxu3 }
 0x380   : > { %v4670_v6 = vpop.f32.mrf.mxu1 }
 0x381   : > { %v8812_v33 = vpack.c.bf16 %v10676_v19, %v7234_v43  ;;  %v4745_v58 = vadd.f32 %v4670_v6, %v10320_v42 }
 0x382   : > { %v6965_v0 = vpop.f32.mrf.mxu0 }
 0x383   : > { %8872 = vst [vmem:[%s10662_s19 + $0x70] sm:$0xff] %v8812_v33   ;;  %4709 = vmatmul.bf16.gmra.mxu1 %v4513_v17  ;;  %5240 = vmatmul.bf16.gmra.mxu2 %v8714_v27 }
 0x384   : > { %6282 = vmatmul.bf16.gmra.mxu3 %v6086_v45 }
 0x385   : > { %7004 = vmatmul.bf16.gmra.mxu0 %v6808_v57 }
 0x386   : > { %v5201_v37 = vpop.f32.mrf.mxu2 }
 0x387   : > { %v5276_v36 = vadd.f32 %v5201_v37, %v4745_v58  ;;  %v6243_v30 = vpop.f32.mrf.mxu3 }
 0x388   : > { %v4672_v53 = vpop.f32.mrf.mxu1 }
 0x389   : > { %v6318_v52 = vadd.f32 %v6243_v30, %v5276_v36  ;;  %v4746_v14 = vadd.f32 %v4672_v53, %v10339_v5 }
 0x38a   : > { %v6967_v16 = vpop.f32.mrf.mxu0 }
 0x38b   : > { %v7040_v1 = vadd.f32 %v6965_v0, %v6318_v52 }
 0x38d   : > { %v7188_v13 = vadd.f32 %v10874_v44, %v7040_v1 }
 0x38e   : > { %v5203_v11 = vpop.f32.mrf.mxu2 }
 0x38f   : > { %v5277_v39 = vadd.f32 %v5203_v11, %v4746_v14  ;;  %v6245_v51 = vpop.f32.mrf.mxu3  ;;  %v7236_v46 = vmax.f32 %v7188_v13, 0.0 }
 0x390   : > { %v4675_v21 = vpop.f32.mrf.mxu1 }
 0x391   : > { %v6319_v54 = vadd.f32 %v6245_v51, %v5277_v39 }
 0x392   : > { %v6970_v59 = vpop.f32.mrf.mxu0 }
 0x393   : > { %v7041_v15 = vadd.f32 %v6967_v16, %v6319_v54 }
 0x395   : > { %v7189_v42 = vadd.f32 %v10874_v44, %v7041_v15  ;;  %v11209_v15 = vld [vmem:[#allocation6_spill] sm:$0xff] }
 0x396   : > { %v5206_v32 = vpop.f32.mrf.mxu2 }
 0x397   : > { %v7237_v61 = vmax.f32 %v7189_v42, 0.0  ;;  %v6248_v9 = vpop.f32.mrf.mxu3 }
 0x398   : > { %v4677_v12 = vpop.f32.mrf.mxu1 }
 0x399   : > { %v8817_v41 = vpack.c.bf16 %v7237_v61, %v7236_v46  ;;  %v4748_v31 = vadd.f32 %v4677_v12, %v10367_v8 }
 0x39a   : > { %v6972_v5 = vpop.f32.mrf.mxu0 }
 0x39b   : > { %8873 = vst [vmem:[%s10662_s19 + $0x78] sm:$0xff] %v8817_v41  }
 0x39e   : > { %v5208_v47 = vpop.f32.mrf.mxu2 }
 0x39f   : > { %v5279_v2 = vadd.f32 %v5208_v47, %v4748_v31  ;;  %v6250_v35 = vpop.f32.mrf.mxu3  ;;  %v11210_v47 = vld [vmem:[#allocation7_spill] sm:$0xff] }
 0x3a0   : > { %v4680_v26 = vpop.f32.mrf.mxu1 }
 0x3a1   : > { %v6321_v34 = vadd.f32 %v6250_v35, %v5279_v2  ;;  %v4749_v3 = vadd.f32 %v4680_v26, %v10385_v56 }
 0x3a2   : > { %v6975_v20 = vpop.f32.mrf.mxu0 }
 0x3a3   : > { %v7043_v50 = vadd.f32 %v6972_v5, %v6321_v34 }
 0x3a5   : > { %v7191_v49 = vadd.f32 %v10874_v44, %v7043_v50 }
 0x3a6   : > { %v5211_v38 = vpop.f32.mrf.mxu2 }
 0x3a7   : > { %v7239_v24 = vmax.f32 %v7191_v49, 0.0  ;;  %v5280_v29 = vadd.f32 %v5211_v38, %v4749_v3  ;;  %v6253_v18 = vpop.f32.mrf.mxu3 }
 0x3a8   : > { %v4682_v25 = vpop.f32.mrf.mxu1 }
 0x3a9   : > { %v8822_v8 = vpack.c.bf16 %v7239_v24, %v10676_v19  ;;  %v6322_v40 = vadd.f32 %v6253_v18, %v5280_v29 }
 0x3aa   : > { %v6977_v23 = vpop.f32.mrf.mxu0 }
 0x3ab   : > { %8874 = vst [vmem:[%s10662_s19 + $0x80] sm:$0xff] %v8822_v8   ;;  %v7044_v10 = vadd.f32 %v6975_v20, %v6322_v40 }
 0x3ad   : > { %v7192_v55 = vadd.f32 %v10874_v44, %v7044_v10 }
 0x3ae   : > { %v5213_v7 = vpop.f32.mrf.mxu2 }
 0x3af   : > { %v7240_v48 = vmax.f32 %v7192_v55, 0.0  ;;  %v6255_v28 = vpop.f32.mrf.mxu3  ;;  %v11211_v55 = vld [vmem:[#allocation8_spill] sm:$0xff] }
 0x3b0   : > { %v4685_v43 = vpop.f32.mrf.mxu1 }
 0x3b1   : > { %v8827_v56 = vpack.c.bf16 %v10676_v19, %v7240_v48  ;;  %v4751_v17 = vadd.f32 %v4685_v43, %v10415_v22  ;;  %v11109_v22 = vld [vmem:[%s11171_s2] ss:$0 sm:$0xff] }
 0x3b2   : > { %v6980_v4 = vpop.f32.mrf.mxu0 }
 0x3b3   : > { %8875 = vst [vmem:[%s10662_s19 + $0x88] sm:$0xff] %v8827_v56  }
 0x3b6   : > { %v5216_v27 = vpop.f32.mrf.mxu2 }
 0x3b7   : > { %v5282_v6 = vadd.f32 %v5216_v27, %v4751_v17  ;;  %v6258_v45 = vpop.f32.mrf.mxu3  ;;  %v11212_v27 = vld [vmem:[#allocation9_spill] sm:$0xff] }
 0x3b8   : > { %v4687_v57 = vpop.f32.mrf.mxu1 }
 0x3b9   : > { %v6324_v0 = vadd.f32 %v6258_v45, %v5282_v6  ;;  %v4752_v58 = vadd.f32 %v4687_v57, %v10434_v62 }
 0x3ba   : > { %v6982_v33 = vpop.f32.mrf.mxu0 }
 0x3bb   : > { %v7046_v44 = vadd.f32 %v6980_v4, %v6324_v0 }
 0x3bd   : > { %v7194_v14 = vadd.f32 %v11109_v22, %v7046_v44 }
 0x3be   : > { %v5218_v37 = vpop.f32.mrf.mxu2 }
 0x3bf   : > { %v5283_v36 = vadd.f32 %v5218_v37, %v4752_v58  ;;  %v6260_v30 = vpop.f32.mrf.mxu3  ;;  %v7242_v62 = vmax.f32 %v7194_v14, 0.0 }
 0x3c0   : > { %v4690_v53 = vpop.f32.mrf.mxu1 }
 0x3c1   : > { %v6325_v16 = vadd.f32 %v6260_v30, %v5283_v36 }
 0x3c2   : > { %v6985_v52 = vpop.f32.mrf.mxu0 }
 0x3c3   : > { %v7047_v11 = vadd.f32 %v6982_v33, %v6325_v16 }
 0x3c5   : > { %v7195_v1 = vadd.f32 %v11109_v22, %v7047_v11 }
 0x3c6   : > { %v5221_v39 = vpop.f32.mrf.mxu2 }
 0x3c7   : > { %v7243_v51 = vmax.f32 %v7195_v1, 0.0  ;;  %v6263_v21 = vpop.f32.mrf.mxu3 }
 0x3c8   : > { %v4692_v54 = vpop.f32.mrf.mxu1 }
 0x3c9   : > { %v8832_v59 = vpack.c.bf16 %v7243_v51, %v7242_v62  ;;  %v4754_v42 = vadd.f32 %v4692_v54, %v11209_v15 }
 0x3ca   : > { %v6987_v13 = vpop.f32.mrf.mxu0 }
 0x3cb   : > { %8876 = vst [vmem:[%s10662_s19 + $0x90] sm:$0xff] %v8832_v59  }
 0x3ce   : > { %v5223_v32 = vpop.f32.mrf.mxu2 }
 0x3cf   : > { %v5285_v46 = vadd.f32 %v5223_v32, %v4754_v42  ;;  %v6265_v61 = vpop.f32.mrf.mxu3 }
 0x3d0   : > { %v4695_v9 = vpop.f32.mrf.mxu1 }
 0x3d1   : > { %v6327_v12 = vadd.f32 %v6265_v61, %v5285_v46  ;;  %v4755_v2 = vadd.f32 %v4695_v9, %v11210_v47 }
 0x3d2   : > { %v6990_v41 = vpop.f32.mrf.mxu0 }
 0x3d3   : > { %v7049_v5 = vadd.f32 %v6987_v13, %v6327_v12 }
 0x3d5   : > { %v7197_v31 = vadd.f32 %v11109_v22, %v7049_v5 }
 0x3d6   : > { %v5226_v35 = vpop.f32.mrf.mxu2 }
 0x3d7   : > { %v7245_v26 = vmax.f32 %v7197_v31, 0.0  ;;  %v5286_v34 = vadd.f32 %v5226_v35, %v4755_v2  ;;  %v6268_v20 = vpop.f32.mrf.mxu3 }
 0x3d8   : > { %v4697_v50 = vpop.f32.mrf.mxu1 }
 0x3d9   : > { %v8837_v49 = vpack.c.bf16 %v7245_v26, %v10676_v19  ;;  %v6328_v3 = vadd.f32 %v6268_v20, %v5286_v34 }
 0x3da   : > { %v6992_v38 = vpop.f32.mrf.mxu0 }
 0x3db   : > { %8877 = vst [vmem:[%s10662_s19 + $0x98] sm:$0xff] %v8837_v49   ;;  %v7050_v24 = vadd.f32 %v6990_v41, %v6328_v3 }
 0x3dd   : > { %v7198_v29 = vadd.f32 %v11109_v22, %v7050_v24 }
 0x3de   : > { %v5228_v18 = vpop.f32.mrf.mxu2 }
 0x3df   : > { %v7246_v25 = vmax.f32 %v7198_v29, 0.0  ;;  %v6270_v8 = vpop.f32.mrf.mxu3 }
 0x3e0   : > { %v4700_v40 = vpop.f32.mrf.mxu1 }
 0x3e1   : > { %v8842_v23 = vpack.c.bf16 %v10676_v19, %v7246_v25  ;;  %v4757_v7 = vadd.f32 %v4700_v40, %v11211_v55 }
 0x3e2   : > { %v6995_v10 = vpop.f32.mrf.mxu0 }
 0x3e3   : > { %8878 = vst [vmem:[%s10662_s19 + $0xa0] sm:$0xff] %v8842_v23  }
 0x3e6   : > { %v5231_v48 = vpop.f32.mrf.mxu2 }
 0x3e7   : > { %v5288_v28 = vadd.f32 %v5231_v48, %v4757_v7  ;;  %v6273_v43 = vpop.f32.mrf.mxu3 }
 0x3e8   : > { %v4702_v56 = vpop.f32.mrf.mxu1 }
 0x3e9   : > { %v6330_v17 = vadd.f32 %v6273_v43, %v5288_v28  ;;  %v4758_v6 = vadd.f32 %v4702_v56, %v11212_v27 }
 0x3ea   : > { %v6997_v4 = vpop.f32.mrf.mxu0 }
 0x3eb   : > { %v7052_v57 = vadd.f32 %v6995_v10, %v6330_v17 }
 0x3ed   : > { %v7200_v36 = vadd.f32 %v11109_v22, %v7052_v57 }
 0x3ee   : > { %v5233_v45 = vpop.f32.mrf.mxu2 }
 0x3ef   : > { %v5289_v33 = vadd.f32 %v5233_v45, %v4758_v6  ;;  %v6275_v0 = vpop.f32.mrf.mxu3  ;;  %v7248_v52 = vmax.f32 %v7200_v36, 0.0 }
 0x3f0   : > { %v4705_v58 = vpop.f32.mrf.mxu1 }
 0x3f1   : > { %v6331_v37 = vadd.f32 %v6275_v0, %v5289_v33 }
 0x3f2   : > { %v7000_v44 = vpop.f32.mrf.mxu0 }
 0x3f3   : > { %v7053_v30 = vadd.f32 %v6997_v4, %v6331_v37 }
 0x3f5   : > { %v7201_v53 = vadd.f32 %v11109_v22, %v7053_v30 }
 0x3f6   : > { %v5236_v16 = vpop.f32.mrf.mxu2 }
 0x3f7   : > { %v7249_v14 = vmax.f32 %v7201_v53, 0.0  ;;  %v6278_v11 = vpop.f32.mrf.mxu3 }
 0x3f8   : > { %v4707_v1 = vpop.f32.mrf.mxu1 }
 0x3f9   : > { %v8847_v39 = vpack.c.bf16 %v7249_v14, %v7248_v52  ;;  %v4760_v51 = vadd.f32 %v4707_v1, %v10559_v63 }
 0x3fa   : > { %v7002_v62 = vpop.f32.mrf.mxu0 }
 0x3fb   : > { %8879 = vst [vmem:[%s10662_s19 + $0xa8] sm:$0xff] %v8847_v39  }
 0x3fe   : > { %v5238_v21 = vpop.f32.mrf.mxu2 }
 0x3ff   : > { %v5291_v54 = vadd.f32 %v5238_v21, %v4760_v51  ;;  %v6280_v59 = vpop.f32.mrf.mxu3 }
 0x400   : > { %v4710_v13 = vpop.f32.mrf.mxu1 }
 0x401   : > { %v6333_v15 = vadd.f32 %v6280_v59, %v5291_v54  ;;  %v4761_v61 = vadd.f32 %v4710_v13, %v10577_v60 }
 0x402   : > { %v7005_v42 = vpop.f32.mrf.mxu0 }
 0x403   : > { %v7055_v32 = vadd.f32 %v7002_v62, %v6333_v15 }
 0x405   : > { %v7203_v46 = vadd.f32 %v11109_v22, %v7055_v32 }
 0x406   : > { %v5241_v9 = vpop.f32.mrf.mxu2 }
 0x407   : > { %v7251_v12 = vmax.f32 %v7203_v46, 0.0  ;;  %v5292_v41 = vadd.f32 %v5241_v9, %v4761_v61  ;;  %v6283_v5 = vpop.f32.mrf.mxu3 }
 0x408   : > { %v4712_v31 = vpop.f32.mrf.mxu1 }
 0x409   : > { %v8852_v63 = vpack.c.bf16 %v7251_v12, %v10676_v19  ;;  %v6334_v47 = vadd.f32 %v6283_v5, %v5292_v41 }
 0x40a   : > { %v7007_v2 = vpop.f32.mrf.mxu0 }
 0x40b   : > { %8880 = vst [vmem:[%s10662_s19 + $0xb0] sm:$0xff] %v8852_v63   ;;  %v7056_v35 = vadd.f32 %v7005_v42, %v6334_v47 }
 0x40d   : > { %v7204_v60 = vadd.f32 %v11109_v22, %v7056_v35 }
 0x40e   : > { %v5243_v26 = vpop.f32.mrf.mxu2 }
 0x40f   : > { %v7252_v34 = vmax.f32 %v7204_v60, 0.0  ;;  %v6285_v20 = vpop.f32.mrf.mxu3 }
 0x411   : > { %v8857_v50 = vpack.c.bf16 %v10676_v19, %v7252_v34 }
 0x413   : > { %8881 = vst [vmem:[%s10662_s19 + $0xb8] sm:$0xff] %v8857_v50  }
 0x414   : > { %8981 = shalt.err (!%p8978_p3)
}
 0x415   : > { %s9019_s11 = smov 64   ;;  %s9020_s19 = smov 4  }
 0x416   : > { %8909 = dma.vmem_to_hbm [thread:$0]  (%p9079_p5), %s7419_s4, 3072, %s7421_s5, %s7406_s16, %s9019_s11, %s9019_s11, %s9020_s19  }
 0x417 PF: > { %p8915_p4 = scmp.ge.s32.totalorder %s9016_s15, 2  ;;  %s7435_s24 = sand.u32 1, %s9004_s12  }
 0x418   : > { %s7436_s26 = scalar_lea.sflag [#allocation4], %s7435_s24 }
 0x419   : > { %p8912_p7 = pnand %p8915_p4, %p9083_p6 }
 0x41b   : > { %p8913_p8 = pneg %p8912_p7 }
 0x41d   : > { %8999 = dma.done.wait (%p8913_p8), %s7436_s26, 3072  }
 0x41e   : > { %9001 = vsyncadd (%p8913_p8), %s7436_s26, 4294964224  ;;  %p13_p9 = scmp.ge.s32.totalorder %s9066_s18, 4   ;;  %s11213_s12 = smov %s9008_s13 }
 0x41f   : > { %s11214_s13 = smov %s9012_s14  ;;  %s11215_s14 = smov %s9077_s21 }
 0x420   : > { %s11216_s15 = smov %s9066_s18  ;;  %15 = sbr.rel (!%p13_p9) target bundleno = 3 (0x3), region = 77 }
 0x425   :  { %7442 = vsyncpa [#allocation4], 1 }
 0x426   :  { %7444 = vsyncpa [#allocation4 + $0x1], 1 }

</bundles_post_ra>
